<compile_context>
chip_gen: v7x
topology: tpu7x:2x2x1
jax: 0.10.0
libtpu: 0.0.40
codegen_flags: <defaults>
</compile_context>

<pallas_src>
import functools

import jax
import jax.numpy as jnp
from jax.experimental import pallas as pl
from jax.experimental.pallas import tpu as pltpu

# ---------------- tiny BERT config (shrunk from bert-base) ----------------
VOCAB = 100
TYPE_VOCAB = 2
MAX_POS = 32
HIDDEN = 32
HEADS = 4
HEAD_DIM = HIDDEN // HEADS
INTER = 64
LAYERS = 2
LN_EPS = 1e-12

_VMEM_SPEC = pl.BlockSpec(memory_space=pltpu.MemorySpace.VMEM)

# layout of the packed small-parameter array (one row per vector, 128 lanes)
_ROWS_PER_LAYER = 8          # bqkv, bo, ln1_g, ln1_b, b1, b2, ln2_g, ln2_b
_VEC_ROWS = 2 + LAYERS * _ROWS_PER_LAYER
_VEC_W = 128


# --------------------- single fused encoder kernel -------------------------
def _encoder_kernel(h_ref, mask_ref, vec_ref,
                    wqkv_ref, wo_ref, w1_ref, w2_ref,
                    o_ref, *, B, S):
    f32 = jnp.float32
    bf16 = jnp.bfloat16

    def vrow(r, w):
        # (1, w) slice of the packed small-param array; broadcasts over rows.
        return vec_ref[r:r + 1, 0:w]

    def ln(x, g, b):
        mean = jnp.mean(x, axis=-1, keepdims=True)
        var = jnp.mean(jnp.square(x - mean), axis=-1, keepdims=True)
        return (x - mean) * jax.lax.rsqrt(var + LN_EPS) * g + b

    h = h_ref[...].astype(f32)                                   # [B*S, H]
    h = ln(h, vrow(0, HIDDEN), vrow(1, HIDDEN))                  # embedding LN

    # Additive attention mask built in-kernel from the [B, S] key mask, hoisted
    # out of the layer/head loops (no [B, heads, S, S] HBM materialization).
    ext3 = ((1.0 - mask_ref[...].astype(f32)) * -10000.0)[:, None, :]   # [B,1,S]

    for li in range(LAYERS):                                     # static unroll
        base = 2 + li * _ROWS_PER_LAYER

        # ---- fused QKV projection: one bf16 MXU push, f32 accumulation ----
        # (attention scale 1/sqrt(HEAD_DIM) is pre-folded into the Q columns)
        qkv = jnp.dot(h.astype(bf16), wqkv_ref[li],
                      preferred_element_type=f32) + vrow(base + 0, 3 * HIDDEN)
        qkv3 = qkv.reshape(B, S, 3 * HIDDEN)

        ctx_heads = []
        for hd in range(HEADS):                                  # static unroll
            lo = hd * HEAD_DIM
            q = qkv3[:, :, lo:lo + HEAD_DIM]                               # [B,S,D]
            k = qkv3[:, :, HIDDEN + lo:HIDDEN + lo + HEAD_DIM]
            v = qkv3[:, :, 2 * HIDDEN + lo:2 * HIDDEN + lo + HEAD_DIM]

            s = jnp.einsum("bqd,bkd->bqk", q, k,
                           preferred_element_type=f32) + ext3
            s = s - jnp.max(s, axis=-1, keepdims=True)
            p = jnp.exp(s)
            p = p * pl.reciprocal(jnp.sum(p, axis=-1, keepdims=True), approx=True)

            ctx = jnp.einsum("bqk,bkd->bqd", p, v, preferred_element_type=f32)
            ctx_heads.append(ctx.reshape(B * S, HEAD_DIM))

        # merge heads in lanes, then ONE K=HIDDEN matmul against wo
        ctx_all = jnp.concatenate(ctx_heads, axis=-1)            # [B*S, H]
        attn = jnp.dot(ctx_all.astype(bf16), wo_ref[li],
                       preferred_element_type=f32) + vrow(base + 1, HIDDEN)
        h = ln(h + attn, vrow(base + 2, HIDDEN), vrow(base + 3, HIDDEN))

        # ---- FFN ----
        # TODO(synk): HF BERT default is exact erf GELU; tanh approximation kept.
        f = jnp.dot(h.astype(bf16), w1_ref[li],
                    preferred_element_type=f32) + vrow(base + 4, INTER)
        f = jax.nn.gelu(f, approximate=True)
        f = jnp.dot(f.astype(bf16), w2_ref[li],
                    preferred_element_type=f32) + vrow(base + 5, HIDDEN)
        h = ln(h + f, vrow(base + 6, HIDDEN), vrow(base + 7, HIDDEN))

    o_ref[...] = h.astype(o_ref.dtype)


def encoder_forward(packed, input_ids, attention_mask):
    """input_ids, attention_mask: [B, S] int32 -> sequence output [B, S, H]."""
    B, S = input_ids.shape
    # Embedding gather stays in JAX glue; everything after runs in one kernel.
    word = jnp.take(packed["word_emb"], input_ids, axis=0)        # [B, S, H]
    pos = packed["pos_emb"][:S][None, :, :]
    typ = packed["type_emb"][0][None, None, :]                    # token_type_ids == 0
    h0 = (word + pos + typ).reshape(B * S, HIDDEN)
    mask = attention_mask.astype(jnp.float32)                     # [B, S]

    out = pl.pallas_call(
        functools.partial(_encoder_kernel, B=B, S=S),
        out_shape=jax.ShapeDtypeStruct((B * S, HIDDEN), jnp.float32),
        in_specs=[_VMEM_SPEC] * 7,
        out_specs=_VMEM_SPEC,
    )(h0, mask, packed["vec"],
      packed["wqkv"], packed["wo"], packed["w1"], packed["w2"])
    return out.reshape(B, S, HIDDEN)


# ------------------------ pure-JAX reference (check) ------------------------
def encoder_reference(params, input_ids, attention_mask):
    """Mirrors the kernel's numerics contract (bf16 weights & matmul inputs,
    f32 accumulation / elementwise), exact softmax, batched-head layout."""
    bf16 = jnp.bfloat16
    B, S = input_ids.shape
    word = jnp.take(params["word_emb"], input_ids, axis=0)
    h = word + params["pos_emb"][:S][None] + params["type_emb"][0][None, None]
    h = h.reshape(B * S, HIDDEN)

    def ln(x, g, b):
        mean = jnp.mean(x, axis=-1, keepdims=True)
        var = jnp.mean(jnp.square(x - mean), axis=-1, keepdims=True)
        return (x - mean) * jax.lax.rsqrt(var + LN_EPS) * g + b

    h = ln(h, params["emb_ln_g"], params["emb_ln_b"])
    ext = (1.0 - attention_mask.astype(jnp.float32)) * -10000.0
    for li in range(LAYERS):
        qkv = jnp.dot(h.astype(bf16), params["wqkv"][li].astype(bf16),
                      preferred_element_type=jnp.float32) + params["bqkv"][li]
        q, k, v = jnp.split(qkv, 3, axis=-1)
        q = q.reshape(B, S, HEADS, HEAD_DIM).transpose(0, 2, 1, 3)
        k = k.reshape(B, S, HEADS, HEAD_DIM).transpose(0, 2, 1, 3)
        v = v.reshape(B, S, HEADS, HEAD_DIM).transpose(0, 2, 1, 3)
        # NOTE: 1/sqrt(HEAD_DIM) is already folded into wqkv's Q columns.
        s = jnp.einsum("bhqd,bhkd->bhqk", q, k) + ext[:, None, None, :]
        p = jax.nn.softmax(s, axis=-1)
        ctx = jnp.einsum("bhqk,bhkd->bhqd", p, v)
        ctx = ctx.transpose(0, 2, 1, 3).reshape(B * S, HIDDEN)
        attn = jnp.dot(ctx.astype(bf16), params["wo"][li].astype(bf16),
                       preferred_element_type=jnp.float32) + params["bo"][li]
        h = ln(h + attn, params["ln1_g"][li], params["ln1_b"][li])
        f = jnp.dot(h.astype(bf16), params["w1"][li].astype(bf16),
                    preferred_element_type=jnp.float32) + params["b1"][li]
        f = jax.nn.gelu(f, approximate=True)
        f = jnp.dot(f.astype(bf16), params["w2"][li].astype(bf16),
                    preferred_element_type=jnp.float32) + params["b2"][li]
        h = ln(h + f, params["ln2_g"][li], params["ln2_b"][li])
    return h.reshape(B, S, HIDDEN)


# --------------------------- param construction ----------------------------
def init_params(key):
    def normal(k, shape, scale=0.02):
        return scale * jax.random.normal(k, shape, dtype=jnp.float32)

    keys = jax.random.split(key, 7)
    L, H, I = LAYERS, HIDDEN, INTER
    wqkv = normal(keys[3], (L, H, 3 * H))                     # fused Q|K|V
    # fold attention scale 1/sqrt(HEAD_DIM) into the Q columns (kernel & ref
    # then skip the per-score scale entirely)
    wqkv = wqkv.at[:, :, :H].multiply(1.0 / (HEAD_DIM ** 0.5))
    return {
        "word_emb": normal(keys[0], (VOCAB, H)),
        "pos_emb": normal(keys[1], (MAX_POS, H)),
        "type_emb": normal(keys[2], (TYPE_VOCAB, H)),
        "emb_ln_g": jnp.ones((1, H), jnp.float32),
        "emb_ln_b": jnp.zeros((1, H), jnp.float32),
        "wqkv": wqkv,
        "bqkv": jnp.zeros((L, 1, 3 * H), jnp.float32),
        "wo": normal(keys[4], (L, H, H)),
        "bo": jnp.zeros((L, 1, H), jnp.float32),
        "ln1_g": jnp.ones((L, 1, H), jnp.float32),
        "ln1_b": jnp.zeros((L, 1, H), jnp.float32),
        "w1": normal(keys[5], (L, H, I)),
        "b1": jnp.zeros((L, 1, I), jnp.float32),
        "w2": normal(keys[6], (L, I, H)),
        "b2": jnp.zeros((L, 1, H), jnp.float32),
        "ln2_g": jnp.ones((L, 1, H), jnp.float32),
        "ln2_b": jnp.zeros((L, 1, H), jnp.float32),
    }


def pack_params(params):
    """Pack the 12+ tiny LN/bias vectors into ONE (rows,128) f32 VMEM operand
    and cast the matmul weights to bf16 (f32 accumulation happens in-kernel)."""
    def row(v, w):
        v = jnp.asarray(v, jnp.float32).reshape(-1)[:w]
        return jnp.pad(v, (0, _VEC_W - w))[None, :]

    rows = [row(params["emb_ln_g"], HIDDEN), row(params["emb_ln_b"], HIDDEN)]
    for li in range(LAYERS):
        rows += [row(params["bqkv"][li], 3 * HIDDEN),
                 row(params["bo"][li], HIDDEN),
                 row(params["ln1_g"][li], HIDDEN),
                 row(params["ln1_b"][li], HIDDEN),
                 row(params["b1"][li], INTER),
                 row(params["b2"][li], HIDDEN),
                 row(params["ln2_g"][li], HIDDEN),
                 row(params["ln2_b"][li], HIDDEN)]
    vec = jnp.concatenate(rows, axis=0)                       # (_VEC_ROWS, 128)
    assert vec.shape == (_VEC_ROWS, _VEC_W)
    return {
        "word_emb": params["word_emb"],
        "pos_emb": params["pos_emb"],
        "type_emb": params["type_emb"],
        "vec": vec,
        "wqkv": params["wqkv"].astype(jnp.bfloat16),
        "wo": params["wo"].astype(jnp.bfloat16),
        "w1": params["w1"].astype(jnp.bfloat16),
        "w2": params["w2"].astype(jnp.bfloat16),
    }


# ------------------------------ StrucShot -----------------------------------
class StrucShot:
    """JAX/Pallas re-implementation of the StrucShot forward pass."""

    def __init__(self, params, dot=False):
        self.params = params
        self.packed = pack_params(params)
        self.dot = dot
        self._encode = jax.jit(encoder_forward)

    def forward(self, support, query):
        # Batch support + query into ONE jitted fused-encoder call
        # (one pallas_call total instead of many tiny launches + host syncs).
        nb = support["input_ids"].shape[0]
        ids = jnp.concatenate([support["input_ids"], query["input_ids"]], axis=0)
        msk = jnp.concatenate([support["attention_mask"],
                               query["attention_mask"]], axis=0)
        emb = jax.block_until_ready(self._encode(self.packed, ids, msk))
        support_emb = emb[:nb]
        _query_emb = emb[nb:]
        print("this is the support embedding shape : ", support_emb.shape)
        return 1


# --------------------------------- main --------------------------------------
if __name__ == "__main__":
    key = jax.random.PRNGKey(0)
    pkey, skey, qkey = jax.random.split(key, 3)

    params = init_params(pkey)
    packed = pack_params(params)

    B, S = 2, 8
    support = {
        "input_ids": jax.random.randint(skey, (B, S), 0, VOCAB, dtype=jnp.int32),
        "attention_mask": jnp.ones((B, S), dtype=jnp.int32),
    }
    query = {
        "input_ids": jax.random.randint(qkey, (B, S), 0, VOCAB, dtype=jnp.int32),
        "attention_mask": jnp.ones((B, S), dtype=jnp.int32).at[:, -2:].set(0),
    }

    # numerical sanity check: fused Pallas kernel vs pure-JAX reference
    ids = jnp.concatenate([support["input_ids"], query["input_ids"]], axis=0)
    msk = jnp.concatenate([support["attention_mask"], query["attention_mask"]], axis=0)
    got = jax.block_until_ready(jax.jit(encoder_forward)(packed, ids, msk))
    ref = jax.block_until_ready(encoder_reference(params, ids, msk))
    max_err = float(jnp.max(jnp.abs(got - ref)))
    assert max_err < 5e-2, f"kernel mismatch vs reference: {max_err}"

    model = StrucShot(params)
    result = model.forward(support, query)
    assert result == 1
    print("KERNEL_OK")
</pallas_src>

<mosaic_0001>
module attributes {stable_mosaic.version = 11 : i64} {
  func.func @_encoder_kernel(%arg0: memref<32x32xf32, #tpu.memory_space<vmem>>, %arg1: memref<4x8xf32, #tpu.memory_space<vmem>>, %arg2: memref<18x128xf32, #tpu.memory_space<vmem>>, %arg3: memref<2x32x96xbf16, #tpu.memory_space<vmem>>, %arg4: memref<2x32x32xbf16, #tpu.memory_space<vmem>>, %arg5: memref<2x32x64xbf16, #tpu.memory_space<vmem>>, %arg6: memref<2x64x32xbf16, #tpu.memory_space<vmem>>, %arg7: memref<32x32xf32, #tpu.memory_space<vmem>>) attributes {dimension_semantics = [], scalar_prefetch = 0 : i64, scratch_operands = 0 : i64, tpu.core_type = #tpu.core_type<tc>} {
    %c0 = arith.constant 0 : index
    %c0_0 = arith.constant 0 : index
    %0 = vector.load %arg0[%c0, %c0_0] : memref<32x32xf32, #tpu.memory_space<vmem>>, vector<32x32xf32>
    %c0_1 = arith.constant 0 : index
    %c0_2 = arith.constant 0 : index
    %1 = vector.load %arg2[%c0_1, %c0_2] : memref<18x128xf32, #tpu.memory_space<vmem>>, vector<1x32xf32>
    %c1 = arith.constant 1 : index
    %c0_3 = arith.constant 0 : index
    %2 = vector.load %arg2[%c1, %c0_3] : memref<18x128xf32, #tpu.memory_space<vmem>>, vector<1x32xf32>
    %cst = arith.constant dense<0.000000e+00> : vector<32xf32>
    %3 = vector.multi_reduction <add>, %0, %cst [1] : vector<32x32xf32> to vector<32xf32>
    %4 = vector.shape_cast %3 : vector<32xf32> to vector<32x1xf32>
    %cst_4 = arith.constant 3.200000e+01 : f32
    %5 = vector.broadcast %cst_4 : f32 to vector<32x1xf32>
    %6 = arith.divf %4, %5 : vector<32x1xf32>
    %7 = vector.broadcast %6 : vector<32x1xf32> to vector<32x32xf32>
    %8 = arith.subf %0, %7 : vector<32x32xf32>
    %9 = arith.mulf %8, %8 : vector<32x32xf32>
    %cst_5 = arith.constant dense<0.000000e+00> : vector<32xf32>
    %10 = vector.multi_reduction <add>, %9, %cst_5 [1] : vector<32x32xf32> to vector<32xf32>
    %11 = vector.shape_cast %10 : vector<32xf32> to vector<32x1xf32>
    %cst_6 = arith.constant 3.200000e+01 : f32
    %12 = vector.broadcast %cst_6 : f32 to vector<32x1xf32>
    %13 = arith.divf %11, %12 : vector<32x1xf32>
    %14 = vector.broadcast %6 : vector<32x1xf32> to vector<32x32xf32>
    %15 = arith.subf %0, %14 : vector<32x32xf32>
    %cst_7 = arith.constant 9.99999996E-13 : f32
    %16 = vector.broadcast %cst_7 : f32 to vector<32x1xf32>
    %17 = arith.addf %13, %16 : vector<32x1xf32>
    %18 = math.rsqrt %17 : vector<32x1xf32>
    %19 = vector.broadcast %18 : vector<32x1xf32> to vector<32x32xf32>
    %20 = arith.mulf %15, %19 : vector<32x32xf32>
    %21 = vector.broadcast %1 : vector<1x32xf32> to vector<32x32xf32>
    %22 = arith.mulf %20, %21 : vector<32x32xf32>
    %23 = vector.broadcast %2 : vector<1x32xf32> to vector<32x32xf32>
    %24 = arith.addf %22, %23 : vector<32x32xf32>
    %c0_8 = arith.constant 0 : index
    %c0_9 = arith.constant 0 : index
    %25 = vector.load %arg1[%c0_8, %c0_9] : memref<4x8xf32, #tpu.memory_space<vmem>>, vector<4x8xf32>
    %cst_10 = arith.constant 1.000000e+00 : f32
    %26 = vector.broadcast %cst_10 : f32 to vector<4x8xf32>
    %27 = arith.subf %26, %25 : vector<4x8xf32>
    %cst_11 = arith.constant -1.000000e+04 : f32
    %28 = vector.broadcast %cst_11 : f32 to vector<4x8xf32>
    %29 = arith.mulf %27, %28 : vector<4x8xf32>
    %30 = vector.shape_cast %29 : vector<4x8xf32> to vector<4x1x8xf32>
    %31 = arith.truncf %24 : vector<32x32xf32> to vector<32x32xbf16>
    %c0_12 = arith.constant 0 : index
    %c0_13 = arith.constant 0 : index
    %c0_14 = arith.constant 0 : index
    %32 = vector.load %arg3[%c0_12, %c0_13, %c0_14] : memref<2x32x96xbf16, #tpu.memory_space<vmem>>, vector<1x32x96xbf16>
    %33 = vector.shape_cast %32 : vector<1x32x96xbf16> to vector<32x96xbf16>
    %cst_15 = arith.constant dense<0.000000e+00> : vector<32x96xf32>
    %34 = tpu.matmul %31, %33, %cst_15 {dimension_numbers = #tpu.dot_dimension_numbers<[1], [0], [0], [1], [0, 0, 1, 1], [], []>} : vector<32x32xbf16>, vector<32x96xbf16>, vector<32x96xf32> -> vector<32x96xf32>
    %c2 = arith.constant 2 : index
    %c0_16 = arith.constant 0 : index
    %35 = vector.load %arg2[%c2, %c0_16] : memref<18x128xf32, #tpu.memory_space<vmem>>, vector<1x96xf32>
    %36 = vector.broadcast %35 : vector<1x96xf32> to vector<32x96xf32>
    %37 = arith.addf %34, %36 : vector<32x96xf32>
    %38 = vector.shape_cast %37 : vector<32x96xf32> to vector<4x8x96xf32>
    %39 = vector.extract_strided_slice %38 {offsets = [0, 0, 0], sizes = [4, 8, 8], strides = [1, 1, 1]} : vector<4x8x96xf32> to vector<4x8x8xf32>
    %40 = vector.extract_strided_slice %38 {offsets = [0, 0, 32], sizes = [4, 8, 8], strides = [1, 1, 1]} : vector<4x8x96xf32> to vector<4x8x8xf32>
    %41 = vector.extract_strided_slice %38 {offsets = [0, 0, 64], sizes = [4, 8, 8], strides = [1, 1, 1]} : vector<4x8x96xf32> to vector<4x8x8xf32>
    "tpu.trace_start"() <{level = 10 : i32, message = "bqd,bkd->bqk"}> : () -> ()
    %cst_17 = arith.constant dense<0.000000e+00> : vector<4x8x8xf32>
    %42 = tpu.matmul %39, %40, %cst_17 {dimension_numbers = #tpu.dot_dimension_numbers<[2], [2], [1], [1], [0, 0, 0, 1, 1, 1], [0], [0]>} : vector<4x8x8xf32>, vector<4x8x8xf32>, vector<4x8x8xf32> -> vector<4x8x8xf32>
    "tpu.trace_stop"() : () -> ()
    %43 = vector.broadcast %30 : vector<4x1x8xf32> to vector<4x8x8xf32>
    %44 = arith.addf %42, %43 : vector<4x8x8xf32>
    %cst_18 = arith.constant dense<0xFF800000> : vector<4x8xf32>
    %45 = vector.multi_reduction <maximumf>, %44, %cst_18 [2] : vector<4x8x8xf32> to vector<4x8xf32>
    %46 = vector.shape_cast %45 : vector<4x8xf32> to vector<4x8x1xf32>
    %47 = vector.broadcast %46 : vector<4x8x1xf32> to vector<4x8x8xf32>
    %48 = arith.subf %44, %47 : vector<4x8x8xf32>
    %49 = math.exp %48 : vector<4x8x8xf32>
    %cst_19 = arith.constant dense<0.000000e+00> : vector<4x8xf32>
    %50 = vector.multi_reduction <add>, %49, %cst_19 [2] : vector<4x8x8xf32> to vector<4x8xf32>
    %51 = vector.shape_cast %50 : vector<4x8xf32> to vector<4x8x1xf32>
    %52 = tpu.reciprocal %51 {approx = true} : vector<4x8x1xf32> -> vector<4x8x1xf32>
    %53 = vector.broadcast %52 : vector<4x8x1xf32> to vector<4x8x8xf32>
    %54 = arith.mulf %49, %53 : vector<4x8x8xf32>
    "tpu.trace_start"() <{level = 10 : i32, message = "bqk,bkd->bqd"}> : () -> ()
    %cst_20 = arith.constant dense<0.000000e+00> : vector<4x8x8xf32>
    %55 = tpu.matmul %54, %41, %cst_20 {dimension_numbers = #tpu.dot_dimension_numbers<[2], [1], [1], [2], [0, 0, 0, 1, 1, 2], [0], [0]>} : vector<4x8x8xf32>, vector<4x8x8xf32>, vector<4x8x8xf32> -> vector<4x8x8xf32>
    "tpu.trace_stop"() : () -> ()
    %56 = vector.shape_cast %55 : vector<4x8x8xf32> to vector<32x8xf32>
    %57 = vector.extract_strided_slice %38 {offsets = [0, 0, 8], sizes = [4, 8, 8], strides = [1, 1, 1]} : vector<4x8x96xf32> to vector<4x8x8xf32>
    %58 = vector.extract_strided_slice %38 {offsets = [0, 0, 40], sizes = [4, 8, 8], strides = [1, 1, 1]} : vector<4x8x96xf32> to vector<4x8x8xf32>
    %59 = vector.extract_strided_slice %38 {offsets = [0, 0, 72], sizes = [4, 8, 8], strides = [1, 1, 1]} : vector<4x8x96xf32> to vector<4x8x8xf32>
    "tpu.trace_start"() <{level = 10 : i32, message = "bqd,bkd->bqk"}> : () -> ()
    %cst_21 = arith.constant dense<0.000000e+00> : vector<4x8x8xf32>
    %60 = tpu.matmul %57, %58, %cst_21 {dimension_numbers = #tpu.dot_dimension_numbers<[2], [2], [1], [1], [0, 0, 0, 1, 1, 1], [0], [0]>} : vector<4x8x8xf32>, vector<4x8x8xf32>, vector<4x8x8xf32> -> vector<4x8x8xf32>
    "tpu.trace_stop"() : () -> ()
    %61 = vector.broadcast %30 : vector<4x1x8xf32> to vector<4x8x8xf32>
    %62 = arith.addf %60, %61 : vector<4x8x8xf32>
    %cst_22 = arith.constant dense<0xFF800000> : vector<4x8xf32>
    %63 = vector.multi_reduction <maximumf>, %62, %cst_22 [2] : vector<4x8x8xf32> to vector<4x8xf32>
    %64 = vector.shape_cast %63 : vector<4x8xf32> to vector<4x8x1xf32>
    %65 = vector.broadcast %64 : vector<4x8x1xf32> to vector<4x8x8xf32>
    %66 = arith.subf %62, %65 : vector<4x8x8xf32>
    %67 = math.exp %66 : vector<4x8x8xf32>
    %cst_23 = arith.constant dense<0.000000e+00> : vector<4x8xf32>
    %68 = vector.multi_reduction <add>, %67, %cst_23 [2] : vector<4x8x8xf32> to vector<4x8xf32>
    %69 = vector.shape_cast %68 : vector<4x8xf32> to vector<4x8x1xf32>
    %70 = tpu.reciprocal %69 {approx = true} : vector<4x8x1xf32> -> vector<4x8x1xf32>
    %71 = vector.broadcast %70 : vector<4x8x1xf32> to vector<4x8x8xf32>
    %72 = arith.mulf %67, %71 : vector<4x8x8xf32>
    "tpu.trace_start"() <{level = 10 : i32, message = "bqk,bkd->bqd"}> : () -> ()
    %cst_24 = arith.constant dense<0.000000e+00> : vector<4x8x8xf32>
    %73 = tpu.matmul %72, %59, %cst_24 {dimension_numbers = #tpu.dot_dimension_numbers<[2], [1], [1], [2], [0, 0, 0, 1, 1, 2], [0], [0]>} : vector<4x8x8xf32>, vector<4x8x8xf32>, vector<4x8x8xf32> -> vector<4x8x8xf32>
    "tpu.trace_stop"() : () -> ()
    %74 = vector.shape_cast %73 : vector<4x8x8xf32> to vector<32x8xf32>
    %75 = vector.extract_strided_slice %38 {offsets = [0, 0, 16], sizes = [4, 8, 8], strides = [1, 1, 1]} : vector<4x8x96xf32> to vector<4x8x8xf32>
    %76 = vector.extract_strided_slice %38 {offsets = [0, 0, 48], sizes = [4, 8, 8], strides = [1, 1, 1]} : vector<4x8x96xf32> to vector<4x8x8xf32>
    %77 = vector.extract_strided_slice %38 {offsets = [0, 0, 80], sizes = [4, 8, 8], strides = [1, 1, 1]} : vector<4x8x96xf32> to vector<4x8x8xf32>
    "tpu.trace_start"() <{level = 10 : i32, message = "bqd,bkd->bqk"}> : () -> ()
    %cst_25 = arith.constant dense<0.000000e+00> : vector<4x8x8xf32>
    %78 = tpu.matmul %75, %76, %cst_25 {dimension_numbers = #tpu.dot_dimension_numbers<[2], [2], [1], [1], [0, 0, 0, 1, 1, 1], [0], [0]>} : vector<4x8x8xf32>, vector<4x8x8xf32>, vector<4x8x8xf32> -> vector<4x8x8xf32>
    "tpu.trace_stop"() : () -> ()
    %79 = vector.broadcast %30 : vector<4x1x8xf32> to vector<4x8x8xf32>
    %80 = arith.addf %78, %79 : vector<4x8x8xf32>
    %cst_26 = arith.constant dense<0xFF800000> : vector<4x8xf32>
    %81 = vector.multi_reduction <maximumf>, %80, %cst_26 [2] : vector<4x8x8xf32> to vector<4x8xf32>
    %82 = vector.shape_cast %81 : vector<4x8xf32> to vector<4x8x1xf32>
    %83 = vector.broadcast %82 : vector<4x8x1xf32> to vector<4x8x8xf32>
    %84 = arith.subf %80, %83 : vector<4x8x8xf32>
    %85 = math.exp %84 : vector<4x8x8xf32>
    %cst_27 = arith.constant dense<0.000000e+00> : vector<4x8xf32>
    %86 = vector.multi_reduction <add>, %85, %cst_27 [2] : vector<4x8x8xf32> to vector<4x8xf32>
    %87 = vector.shape_cast %86 : vector<4x8xf32> to vector<4x8x1xf32>
    %88 = tpu.reciprocal %87 {approx = true} : vector<4x8x1xf32> -> vector<4x8x1xf32>
    %89 = vector.broadcast %88 : vector<4x8x1xf32> to vector<4x8x8xf32>
    %90 = arith.mulf %85, %89 : vector<4x8x8xf32>
    "tpu.trace_start"() <{level = 10 : i32, message = "bqk,bkd->bqd"}> : () -> ()
    %cst_28 = arith.constant dense<0.000000e+00> : vector<4x8x8xf32>
    %91 = tpu.matmul %90, %77, %cst_28 {dimension_numbers = #tpu.dot_dimension_numbers<[2], [1], [1], [2], [0, 0, 0, 1, 1, 2], [0], [0]>} : vector<4x8x8xf32>, vector<4x8x8xf32>, vector<4x8x8xf32> -> vector<4x8x8xf32>
    "tpu.trace_stop"() : () -> ()
    %92 = vector.shape_cast %91 : vector<4x8x8xf32> to vector<32x8xf32>
    %93 = vector.extract_strided_slice %38 {offsets = [0, 0, 24], sizes = [4, 8, 8], strides = [1, 1, 1]} : vector<4x8x96xf32> to vector<4x8x8xf32>
    %94 = vector.extract_strided_slice %38 {offsets = [0, 0, 56], sizes = [4, 8, 8], strides = [1, 1, 1]} : vector<4x8x96xf32> to vector<4x8x8xf32>
    %95 = vector.extract_strided_slice %38 {offsets = [0, 0, 88], sizes = [4, 8, 8], strides = [1, 1, 1]} : vector<4x8x96xf32> to vector<4x8x8xf32>
    "tpu.trace_start"() <{level = 10 : i32, message = "bqd,bkd->bqk"}> : () -> ()
    %cst_29 = arith.constant dense<0.000000e+00> : vector<4x8x8xf32>
    %96 = tpu.matmul %93, %94, %cst_29 {dimension_numbers = #tpu.dot_dimension_numbers<[2], [2], [1], [1], [0, 0, 0, 1, 1, 1], [0], [0]>} : vector<4x8x8xf32>, vector<4x8x8xf32>, vector<4x8x8xf32> -> vector<4x8x8xf32>
    "tpu.trace_stop"() : () -> ()
    %97 = vector.broadcast %30 : vector<4x1x8xf32> to vector<4x8x8xf32>
    %98 = arith.addf %96, %97 : vector<4x8x8xf32>
    %cst_30 = arith.constant dense<0xFF800000> : vector<4x8xf32>
    %99 = vector.multi_reduction <maximumf>, %98, %cst_30 [2] : vector<4x8x8xf32> to vector<4x8xf32>
    %100 = vector.shape_cast %99 : vector<4x8xf32> to vector<4x8x1xf32>
    %101 = vector.broadcast %100 : vector<4x8x1xf32> to vector<4x8x8xf32>
    %102 = arith.subf %98, %101 : vector<4x8x8xf32>
    %103 = math.exp %102 : vector<4x8x8xf32>
    %cst_31 = arith.constant dense<0.000000e+00> : vector<4x8xf32>
    %104 = vector.multi_reduction <add>, %103, %cst_31 [2] : vector<4x8x8xf32> to vector<4x8xf32>
    %105 = vector.shape_cast %104 : vector<4x8xf32> to vector<4x8x1xf32>
    %106 = tpu.reciprocal %105 {approx = true} : vector<4x8x1xf32> -> vector<4x8x1xf32>
    %107 = vector.broadcast %106 : vector<4x8x1xf32> to vector<4x8x8xf32>
    %108 = arith.mulf %103, %107 : vector<4x8x8xf32>
    "tpu.trace_start"() <{level = 10 : i32, message = "bqk,bkd->bqd"}> : () -> ()
    %cst_32 = arith.constant dense<0.000000e+00> : vector<4x8x8xf32>
    %109 = tpu.matmul %108, %95, %cst_32 {dimension_numbers = #tpu.dot_dimension_numbers<[2], [1], [1], [2], [0, 0, 0, 1, 1, 2], [0], [0]>} : vector<4x8x8xf32>, vector<4x8x8xf32>, vector<4x8x8xf32> -> vector<4x8x8xf32>
    "tpu.trace_stop"() : () -> ()
    %110 = vector.shape_cast %109 : vector<4x8x8xf32> to vector<32x8xf32>
    %111 = tpu.concatenate %56, %74, %92, %110 in 1 : vector<32x8xf32>, vector<32x8xf32>, vector<32x8xf32>, vector<32x8xf32> -> vector<32x32xf32>
    %112 = arith.truncf %111 : vector<32x32xf32> to vector<32x32xbf16>
    %c0_33 = arith.constant 0 : index
    %c0_34 = arith.constant 0 : index
    %c0_35 = arith.constant 0 : index
    %113 = vector.load %arg4[%c0_33, %c0_34, %c0_35] : memref<2x32x32xbf16, #tpu.memory_space<vmem>>, vector<1x32x32xbf16>
    %114 = vector.shape_cast %113 : vector<1x32x32xbf16> to vector<32x32xbf16>
    %cst_36 = arith.constant dense<0.000000e+00> : vector<32x32xf32>
    %115 = tpu.matmul %112, %114, %cst_36 {dimension_numbers = #tpu.dot_dimension_numbers<[1], [0], [0], [1], [0, 0, 1, 1], [], []>} : vector<32x32xbf16>, vector<32x32xbf16>, vector<32x32xf32> -> vector<32x32xf32>
    %c3 = arith.constant 3 : index
    %c0_37 = arith.constant 0 : index
    %116 = vector.load %arg2[%c3, %c0_37] : memref<18x128xf32, #tpu.memory_space<vmem>>, vector<1x32xf32>
    %117 = vector.broadcast %116 : vector<1x32xf32> to vector<32x32xf32>
    %118 = arith.addf %115, %117 : vector<32x32xf32>
    %119 = arith.addf %24, %118 : vector<32x32xf32>
    %c4 = arith.constant 4 : index
    %c0_38 = arith.constant 0 : index
    %120 = vector.load %arg2[%c4, %c0_38] : memref<18x128xf32, #tpu.memory_space<vmem>>, vector<1x32xf32>
    %c5 = arith.constant 5 : index
    %c0_39 = arith.constant 0 : index
    %121 = vector.load %arg2[%c5, %c0_39] : memref<18x128xf32, #tpu.memory_space<vmem>>, vector<1x32xf32>
    %cst_40 = arith.constant dense<0.000000e+00> : vector<32xf32>
    %122 = vector.multi_reduction <add>, %119, %cst_40 [1] : vector<32x32xf32> to vector<32xf32>
    %123 = vector.shape_cast %122 : vector<32xf32> to vector<32x1xf32>
    %cst_41 = arith.constant 3.200000e+01 : f32
    %124 = vector.broadcast %cst_41 : f32 to vector<32x1xf32>
    %125 = arith.divf %123, %124 : vector<32x1xf32>
    %126 = vector.broadcast %125 : vector<32x1xf32> to vector<32x32xf32>
    %127 = arith.subf %119, %126 : vector<32x32xf32>
    %128 = arith.mulf %127, %127 : vector<32x32xf32>
    %cst_42 = arith.constant dense<0.000000e+00> : vector<32xf32>
    %129 = vector.multi_reduction <add>, %128, %cst_42 [1] : vector<32x32xf32> to vector<32xf32>
    %130 = vector.shape_cast %129 : vector<32xf32> to vector<32x1xf32>
    %cst_43 = arith.constant 3.200000e+01 : f32
    %131 = vector.broadcast %cst_43 : f32 to vector<32x1xf32>
    %132 = arith.divf %130, %131 : vector<32x1xf32>
    %133 = vector.broadcast %125 : vector<32x1xf32> to vector<32x32xf32>
    %134 = arith.subf %119, %133 : vector<32x32xf32>
    %cst_44 = arith.constant 9.99999996E-13 : f32
    %135 = vector.broadcast %cst_44 : f32 to vector<32x1xf32>
    %136 = arith.addf %132, %135 : vector<32x1xf32>
    %137 = math.rsqrt %136 : vector<32x1xf32>
    %138 = vector.broadcast %137 : vector<32x1xf32> to vector<32x32xf32>
    %139 = arith.mulf %134, %138 : vector<32x32xf32>
    %140 = vector.broadcast %120 : vector<1x32xf32> to vector<32x32xf32>
    %141 = arith.mulf %139, %140 : vector<32x32xf32>
    %142 = vector.broadcast %121 : vector<1x32xf32> to vector<32x32xf32>
    %143 = arith.addf %141, %142 : vector<32x32xf32>
    %144 = arith.truncf %143 : vector<32x32xf32> to vector<32x32xbf16>
    %c0_45 = arith.constant 0 : index
    %c0_46 = arith.constant 0 : index
    %c0_47 = arith.constant 0 : index
    %145 = vector.load %arg5[%c0_45, %c0_46, %c0_47] : memref<2x32x64xbf16, #tpu.memory_space<vmem>>, vector<1x32x64xbf16>
    %146 = vector.shape_cast %145 : vector<1x32x64xbf16> to vector<32x64xbf16>
    %cst_48 = arith.constant dense<0.000000e+00> : vector<32x64xf32>
    %147 = tpu.matmul %144, %146, %cst_48 {dimension_numbers = #tpu.dot_dimension_numbers<[1], [0], [0], [1], [0, 0, 1, 1], [], []>} : vector<32x32xbf16>, vector<32x64xbf16>, vector<32x64xf32> -> vector<32x64xf32>
    %c6 = arith.constant 6 : index
    %c0_49 = arith.constant 0 : index
    %148 = vector.load %arg2[%c6, %c0_49] : memref<18x128xf32, #tpu.memory_space<vmem>>, vector<1x64xf32>
    %149 = vector.broadcast %148 : vector<1x64xf32> to vector<32x64xf32>
    %150 = arith.addf %147, %149 : vector<32x64xf32>
    %151 = arith.mulf %150, %150 : vector<32x64xf32>
    %152 = arith.mulf %150, %151 : vector<32x64xf32>
    %cst_50 = arith.constant 4.471500e-02 : f32
    %153 = vector.broadcast %cst_50 : f32 to vector<32x64xf32>
    %154 = arith.mulf %153, %152 : vector<32x64xf32>
    %155 = arith.addf %150, %154 : vector<32x64xf32>
    %cst_51 = arith.constant 0.797884583 : f32
    %156 = vector.broadcast %cst_51 : f32 to vector<32x64xf32>
    %157 = arith.mulf %156, %155 : vector<32x64xf32>
    %158 = math.tanh %157 : vector<32x64xf32>
    %cst_52 = arith.constant 1.000000e+00 : f32
    %159 = vector.broadcast %cst_52 : f32 to vector<32x64xf32>
    %160 = arith.addf %159, %158 : vector<32x64xf32>
    %cst_53 = arith.constant 5.000000e-01 : f32
    %161 = vector.broadcast %cst_53 : f32 to vector<32x64xf32>
    %162 = arith.mulf %161, %160 : vector<32x64xf32>
    %163 = arith.mulf %150, %162 : vector<32x64xf32>
    %164 = arith.truncf %163 : vector<32x64xf32> to vector<32x64xbf16>
    %c0_54 = arith.constant 0 : index
    %c0_55 = arith.constant 0 : index
    %c0_56 = arith.constant 0 : index
    %165 = vector.load %arg6[%c0_54, %c0_55, %c0_56] : memref<2x64x32xbf16, #tpu.memory_space<vmem>>, vector<1x64x32xbf16>
    %166 = vector.shape_cast %165 : vector<1x64x32xbf16> to vector<64x32xbf16>
    %cst_57 = arith.constant dense<0.000000e+00> : vector<32x32xf32>
    %167 = tpu.matmul %164, %166, %cst_57 {dimension_numbers = #tpu.dot_dimension_numbers<[1], [0], [0], [1], [0, 0, 1, 1], [], []>} : vector<32x64xbf16>, vector<64x32xbf16>, vector<32x32xf32> -> vector<32x32xf32>
    %c7 = arith.constant 7 : index
    %c0_58 = arith.constant 0 : index
    %168 = vector.load %arg2[%c7, %c0_58] : memref<18x128xf32, #tpu.memory_space<vmem>>, vector<1x32xf32>
    %169 = vector.broadcast %168 : vector<1x32xf32> to vector<32x32xf32>
    %170 = arith.addf %167, %169 : vector<32x32xf32>
    %171 = arith.addf %143, %170 : vector<32x32xf32>
    %c8 = arith.constant 8 : index
    %c0_59 = arith.constant 0 : index
    %172 = vector.load %arg2[%c8, %c0_59] : memref<18x128xf32, #tpu.memory_space<vmem>>, vector<1x32xf32>
    %c9 = arith.constant 9 : index
    %c0_60 = arith.constant 0 : index
    %173 = vector.load %arg2[%c9, %c0_60] : memref<18x128xf32, #tpu.memory_space<vmem>>, vector<1x32xf32>
    %cst_61 = arith.constant dense<0.000000e+00> : vector<32xf32>
    %174 = vector.multi_reduction <add>, %171, %cst_61 [1] : vector<32x32xf32> to vector<32xf32>
    %175 = vector.shape_cast %174 : vector<32xf32> to vector<32x1xf32>
    %cst_62 = arith.constant 3.200000e+01 : f32
    %176 = vector.broadcast %cst_62 : f32 to vector<32x1xf32>
    %177 = arith.divf %175, %176 : vector<32x1xf32>
    %178 = vector.broadcast %177 : vector<32x1xf32> to vector<32x32xf32>
    %179 = arith.subf %171, %178 : vector<32x32xf32>
    %180 = arith.mulf %179, %179 : vector<32x32xf32>
    %cst_63 = arith.constant dense<0.000000e+00> : vector<32xf32>
    %181 = vector.multi_reduction <add>, %180, %cst_63 [1] : vector<32x32xf32> to vector<32xf32>
    %182 = vector.shape_cast %181 : vector<32xf32> to vector<32x1xf32>
    %cst_64 = arith.constant 3.200000e+01 : f32
    %183 = vector.broadcast %cst_64 : f32 to vector<32x1xf32>
    %184 = arith.divf %182, %183 : vector<32x1xf32>
    %185 = vector.broadcast %177 : vector<32x1xf32> to vector<32x32xf32>
    %186 = arith.subf %171, %185 : vector<32x32xf32>
    %cst_65 = arith.constant 9.99999996E-13 : f32
    %187 = vector.broadcast %cst_65 : f32 to vector<32x1xf32>
    %188 = arith.addf %184, %187 : vector<32x1xf32>
    %189 = math.rsqrt %188 : vector<32x1xf32>
    %190 = vector.broadcast %189 : vector<32x1xf32> to vector<32x32xf32>
    %191 = arith.mulf %186, %190 : vector<32x32xf32>
    %192 = vector.broadcast %172 : vector<1x32xf32> to vector<32x32xf32>
    %193 = arith.mulf %191, %192 : vector<32x32xf32>
    %194 = vector.broadcast %173 : vector<1x32xf32> to vector<32x32xf32>
    %195 = arith.addf %193, %194 : vector<32x32xf32>
    %196 = arith.truncf %195 : vector<32x32xf32> to vector<32x32xbf16>
    %c1_66 = arith.constant 1 : index
    %c0_67 = arith.constant 0 : index
    %c0_68 = arith.constant 0 : index
    %197 = vector.load %arg3[%c1_66, %c0_67, %c0_68] : memref<2x32x96xbf16, #tpu.memory_space<vmem>>, vector<1x32x96xbf16>
    %198 = vector.shape_cast %197 : vector<1x32x96xbf16> to vector<32x96xbf16>
    %cst_69 = arith.constant dense<0.000000e+00> : vector<32x96xf32>
    %199 = tpu.matmul %196, %198, %cst_69 {dimension_numbers = #tpu.dot_dimension_numbers<[1], [0], [0], [1], [0, 0, 1, 1], [], []>} : vector<32x32xbf16>, vector<32x96xbf16>, vector<32x96xf32> -> vector<32x96xf32>
    %c10 = arith.constant 10 : index
    %c0_70 = arith.constant 0 : index
    %200 = vector.load %arg2[%c10, %c0_70] : memref<18x128xf32, #tpu.memory_space<vmem>>, vector<1x96xf32>
    %201 = vector.broadcast %200 : vector<1x96xf32> to vector<32x96xf32>
    %202 = arith.addf %199, %201 : vector<32x96xf32>
    %203 = vector.shape_cast %202 : vector<32x96xf32> to vector<4x8x96xf32>
    %204 = vector.extract_strided_slice %203 {offsets = [0, 0, 0], sizes = [4, 8, 8], strides = [1, 1, 1]} : vector<4x8x96xf32> to vector<4x8x8xf32>
    %205 = vector.extract_strided_slice %203 {offsets = [0, 0, 32], sizes = [4, 8, 8], strides = [1, 1, 1]} : vector<4x8x96xf32> to vector<4x8x8xf32>
    %206 = vector.extract_strided_slice %203 {offsets = [0, 0, 64], sizes = [4, 8, 8], strides = [1, 1, 1]} : vector<4x8x96xf32> to vector<4x8x8xf32>
    "tpu.trace_start"() <{level = 10 : i32, message = "bqd,bkd->bqk"}> : () -> ()
    %cst_71 = arith.constant dense<0.000000e+00> : vector<4x8x8xf32>
    %207 = tpu.matmul %204, %205, %cst_71 {dimension_numbers = #tpu.dot_dimension_numbers<[2], [2], [1], [1], [0, 0, 0, 1, 1, 1], [0], [0]>} : vector<4x8x8xf32>, vector<4x8x8xf32>, vector<4x8x8xf32> -> vector<4x8x8xf32>
    "tpu.trace_stop"() : () -> ()
    %208 = vector.broadcast %30 : vector<4x1x8xf32> to vector<4x8x8xf32>
    %209 = arith.addf %207, %208 : vector<4x8x8xf32>
    %cst_72 = arith.constant dense<0xFF800000> : vector<4x8xf32>
    %210 = vector.multi_reduction <maximumf>, %209, %cst_72 [2] : vector<4x8x8xf32> to vector<4x8xf32>
    %211 = vector.shape_cast %210 : vector<4x8xf32> to vector<4x8x1xf32>
    %212 = vector.broadcast %211 : vector<4x8x1xf32> to vector<4x8x8xf32>
    %213 = arith.subf %209, %212 : vector<4x8x8xf32>
    %214 = math.exp %213 : vector<4x8x8xf32>
    %cst_73 = arith.constant dense<0.000000e+00> : vector<4x8xf32>
    %215 = vector.multi_reduction <add>, %214, %cst_73 [2] : vector<4x8x8xf32> to vector<4x8xf32>
    %216 = vector.shape_cast %215 : vector<4x8xf32> to vector<4x8x1xf32>
    %217 = tpu.reciprocal %216 {approx = true} : vector<4x8x1xf32> -> vector<4x8x1xf32>
    %218 = vector.broadcast %217 : vector<4x8x1xf32> to vector<4x8x8xf32>
    %219 = arith.mulf %214, %218 : vector<4x8x8xf32>
    "tpu.trace_start"() <{level = 10 : i32, message = "bqk,bkd->bqd"}> : () -> ()
    %cst_74 = arith.constant dense<0.000000e+00> : vector<4x8x8xf32>
    %220 = tpu.matmul %219, %206, %cst_74 {dimension_numbers = #tpu.dot_dimension_numbers<[2], [1], [1], [2], [0, 0, 0, 1, 1, 2], [0], [0]>} : vector<4x8x8xf32>, vector<4x8x8xf32>, vector<4x8x8xf32> -> vector<4x8x8xf32>
    "tpu.trace_stop"() : () -> ()
    %221 = vector.shape_cast %220 : vector<4x8x8xf32> to vector<32x8xf32>
    %222 = vector.extract_strided_slice %203 {offsets = [0, 0, 8], sizes = [4, 8, 8], strides = [1, 1, 1]} : vector<4x8x96xf32> to vector<4x8x8xf32>
    %223 = vector.extract_strided_slice %203 {offsets = [0, 0, 40], sizes = [4, 8, 8], strides = [1, 1, 1]} : vector<4x8x96xf32> to vector<4x8x8xf32>
    %224 = vector.extract_strided_slice %203 {offsets = [0, 0, 72], sizes = [4, 8, 8], strides = [1, 1, 1]} : vector<4x8x96xf32> to vector<4x8x8xf32>
    "tpu.trace_start"() <{level = 10 : i32, message = "bqd,bkd->bqk"}> : () -> ()
    %cst_75 = arith.constant dense<0.000000e+00> : vector<4x8x8xf32>
    %225 = tpu.matmul %222, %223, %cst_75 {dimension_numbers = #tpu.dot_dimension_numbers<[2], [2], [1], [1], [0, 0, 0, 1, 1, 1], [0], [0]>} : vector<4x8x8xf32>, vector<4x8x8xf32>, vector<4x8x8xf32> -> vector<4x8x8xf32>
    "tpu.trace_stop"() : () -> ()
    %226 = vector.broadcast %30 : vector<4x1x8xf32> to vector<4x8x8xf32>
    %227 = arith.addf %225, %226 : vector<4x8x8xf32>
    %cst_76 = arith.constant dense<0xFF800000> : vector<4x8xf32>
    %228 = vector.multi_reduction <maximumf>, %227, %cst_76 [2] : vector<4x8x8xf32> to vector<4x8xf32>
    %229 = vector.shape_cast %228 : vector<4x8xf32> to vector<4x8x1xf32>
    %230 = vector.broadcast %229 : vector<4x8x1xf32> to vector<4x8x8xf32>
    %231 = arith.subf %227, %230 : vector<4x8x8xf32>
    %232 = math.exp %231 : vector<4x8x8xf32>
    %cst_77 = arith.constant dense<0.000000e+00> : vector<4x8xf32>
    %233 = vector.multi_reduction <add>, %232, %cst_77 [2] : vector<4x8x8xf32> to vector<4x8xf32>
    %234 = vector.shape_cast %233 : vector<4x8xf32> to vector<4x8x1xf32>
    %235 = tpu.reciprocal %234 {approx = true} : vector<4x8x1xf32> -> vector<4x8x1xf32>
    %236 = vector.broadcast %235 : vector<4x8x1xf32> to vector<4x8x8xf32>
    %237 = arith.mulf %232, %236 : vector<4x8x8xf32>
    "tpu.trace_start"() <{level = 10 : i32, message = "bqk,bkd->bqd"}> : () -> ()
    %cst_78 = arith.constant dense<0.000000e+00> : vector<4x8x8xf32>
    %238 = tpu.matmul %237, %224, %cst_78 {dimension_numbers = #tpu.dot_dimension_numbers<[2], [1], [1], [2], [0, 0, 0, 1, 1, 2], [0], [0]>} : vector<4x8x8xf32>, vector<4x8x8xf32>, vector<4x8x8xf32> -> vector<4x8x8xf32>
    "tpu.trace_stop"() : () -> ()
    %239 = vector.shape_cast %238 : vector<4x8x8xf32> to vector<32x8xf32>
    %240 = vector.extract_strided_slice %203 {offsets = [0, 0, 16], sizes = [4, 8, 8], strides = [1, 1, 1]} : vector<4x8x96xf32> to vector<4x8x8xf32>
    %241 = vector.extract_strided_slice %203 {offsets = [0, 0, 48], sizes = [4, 8, 8], strides = [1, 1, 1]} : vector<4x8x96xf32> to vector<4x8x8xf32>
    %242 = vector.extract_strided_slice %203 {offsets = [0, 0, 80], sizes = [4, 8, 8], strides = [1, 1, 1]} : vector<4x8x96xf32> to vector<4x8x8xf32>
    "tpu.trace_start"() <{level = 10 : i32, message = "bqd,bkd->bqk"}> : () -> ()
    %cst_79 = arith.constant dense<0.000000e+00> : vector<4x8x8xf32>
    %243 = tpu.matmul %240, %241, %cst_79 {dimension_numbers = #tpu.dot_dimension_numbers<[2], [2], [1], [1], [0, 0, 0, 1, 1, 1], [0], [0]>} : vector<4x8x8xf32>, vector<4x8x8xf32>, vector<4x8x8xf32> -> vector<4x8x8xf32>
    "tpu.trace_stop"() : () -> ()
    %244 = vector.broadcast %30 : vector<4x1x8xf32> to vector<4x8x8xf32>
    %245 = arith.addf %243, %244 : vector<4x8x8xf32>
    %cst_80 = arith.constant dense<0xFF800000> : vector<4x8xf32>
    %246 = vector.multi_reduction <maximumf>, %245, %cst_80 [2] : vector<4x8x8xf32> to vector<4x8xf32>
    %247 = vector.shape_cast %246 : vector<4x8xf32> to vector<4x8x1xf32>
    %248 = vector.broadcast %247 : vector<4x8x1xf32> to vector<4x8x8xf32>
    %249 = arith.subf %245, %248 : vector<4x8x8xf32>
    %250 = math.exp %249 : vector<4x8x8xf32>
    %cst_81 = arith.constant dense<0.000000e+00> : vector<4x8xf32>
    %251 = vector.multi_reduction <add>, %250, %cst_81 [2] : vector<4x8x8xf32> to vector<4x8xf32>
    %252 = vector.shape_cast %251 : vector<4x8xf32> to vector<4x8x1xf32>
    %253 = tpu.reciprocal %252 {approx = true} : vector<4x8x1xf32> -> vector<4x8x1xf32>
    %254 = vector.broadcast %253 : vector<4x8x1xf32> to vector<4x8x8xf32>
    %255 = arith.mulf %250, %254 : vector<4x8x8xf32>
    "tpu.trace_start"() <{level = 10 : i32, message = "bqk,bkd->bqd"}> : () -> ()
    %cst_82 = arith.constant dense<0.000000e+00> : vector<4x8x8xf32>
    %256 = tpu.matmul %255, %242, %cst_82 {dimension_numbers = #tpu.dot_dimension_numbers<[2], [1], [1], [2], [0, 0, 0, 1, 1, 2], [0], [0]>} : vector<4x8x8xf32>, vector<4x8x8xf32>, vector<4x8x8xf32> -> vector<4x8x8xf32>
    "tpu.trace_stop"() : () -> ()
    %257 = vector.shape_cast %256 : vector<4x8x8xf32> to vector<32x8xf32>
    %258 = vector.extract_strided_slice %203 {offsets = [0, 0, 24], sizes = [4, 8, 8], strides = [1, 1, 1]} : vector<4x8x96xf32> to vector<4x8x8xf32>
    %259 = vector.extract_strided_slice %203 {offsets = [0, 0, 56], sizes = [4, 8, 8], strides = [1, 1, 1]} : vector<4x8x96xf32> to vector<4x8x8xf32>
    %260 = vector.extract_strided_slice %203 {offsets = [0, 0, 88], sizes = [4, 8, 8], strides = [1, 1, 1]} : vector<4x8x96xf32> to vector<4x8x8xf32>
    "tpu.trace_start"() <{level = 10 : i32, message = "bqd,bkd->bqk"}> : () -> ()
    %cst_83 = arith.constant dense<0.000000e+00> : vector<4x8x8xf32>
    %261 = tpu.matmul %258, %259, %cst_83 {dimension_numbers = #tpu.dot_dimension_numbers<[2], [2], [1], [1], [0, 0, 0, 1, 1, 1], [0], [0]>} : vector<4x8x8xf32>, vector<4x8x8xf32>, vector<4x8x8xf32> -> vector<4x8x8xf32>
    "tpu.trace_stop"() : () -> ()
    %262 = vector.broadcast %30 : vector<4x1x8xf32> to vector<4x8x8xf32>
    %263 = arith.addf %261, %262 : vector<4x8x8xf32>
    %cst_84 = arith.constant dense<0xFF800000> : vector<4x8xf32>
    %264 = vector.multi_reduction <maximumf>, %263, %cst_84 [2] : vector<4x8x8xf32> to vector<4x8xf32>
    %265 = vector.shape_cast %264 : vector<4x8xf32> to vector<4x8x1xf32>
    %266 = vector.broadcast %265 : vector<4x8x1xf32> to vector<4x8x8xf32>
    %267 = arith.subf %263, %266 : vector<4x8x8xf32>
    %268 = math.exp %267 : vector<4x8x8xf32>
    %cst_85 = arith.constant dense<0.000000e+00> : vector<4x8xf32>
    %269 = vector.multi_reduction <add>, %268, %cst_85 [2] : vector<4x8x8xf32> to vector<4x8xf32>
    %270 = vector.shape_cast %269 : vector<4x8xf32> to vector<4x8x1xf32>
    %271 = tpu.reciprocal %270 {approx = true} : vector<4x8x1xf32> -> vector<4x8x1xf32>
    %272 = vector.broadcast %271 : vector<4x8x1xf32> to vector<4x8x8xf32>
    %273 = arith.mulf %268, %272 : vector<4x8x8xf32>
    "tpu.trace_start"() <{level = 10 : i32, message = "bqk,bkd->bqd"}> : () -> ()
    %cst_86 = arith.constant dense<0.000000e+00> : vector<4x8x8xf32>
    %274 = tpu.matmul %273, %260, %cst_86 {dimension_numbers = #tpu.dot_dimension_numbers<[2], [1], [1], [2], [0, 0, 0, 1, 1, 2], [0], [0]>} : vector<4x8x8xf32>, vector<4x8x8xf32>, vector<4x8x8xf32> -> vector<4x8x8xf32>
    "tpu.trace_stop"() : () -> ()
    %275 = vector.shape_cast %274 : vector<4x8x8xf32> to vector<32x8xf32>
    %276 = tpu.concatenate %221, %239, %257, %275 in 1 : vector<32x8xf32>, vector<32x8xf32>, vector<32x8xf32>, vector<32x8xf32> -> vector<32x32xf32>
    %277 = arith.truncf %276 : vector<32x32xf32> to vector<32x32xbf16>
    %c1_87 = arith.constant 1 : index
    %c0_88 = arith.constant 0 : index
    %c0_89 = arith.constant 0 : index
    %278 = vector.load %arg4[%c1_87, %c0_88, %c0_89] : memref<2x32x32xbf16, #tpu.memory_space<vmem>>, vector<1x32x32xbf16>
    %279 = vector.shape_cast %278 : vector<1x32x32xbf16> to vector<32x32xbf16>
    %cst_90 = arith.constant dense<0.000000e+00> : vector<32x32xf32>
    %280 = tpu.matmul %277, %279, %cst_90 {dimension_numbers = #tpu.dot_dimension_numbers<[1], [0], [0], [1], [0, 0, 1, 1], [], []>} : vector<32x32xbf16>, vector<32x32xbf16>, vector<32x32xf32> -> vector<32x32xf32>
    %c11 = arith.constant 11 : index
    %c0_91 = arith.constant 0 : index
    %281 = vector.load %arg2[%c11, %c0_91] : memref<18x128xf32, #tpu.memory_space<vmem>>, vector<1x32xf32>
    %282 = vector.broadcast %281 : vector<1x32xf32> to vector<32x32xf32>
    %283 = arith.addf %280, %282 : vector<32x32xf32>
    %284 = arith.addf %195, %283 : vector<32x32xf32>
    %c12 = arith.constant 12 : index
    %c0_92 = arith.constant 0 : index
    %285 = vector.load %arg2[%c12, %c0_92] : memref<18x128xf32, #tpu.memory_space<vmem>>, vector<1x32xf32>
    %c13 = arith.constant 13 : index
    %c0_93 = arith.constant 0 : index
    %286 = vector.load %arg2[%c13, %c0_93] : memref<18x128xf32, #tpu.memory_space<vmem>>, vector<1x32xf32>
    %cst_94 = arith.constant dense<0.000000e+00> : vector<32xf32>
    %287 = vector.multi_reduction <add>, %284, %cst_94 [1] : vector<32x32xf32> to vector<32xf32>
    %288 = vector.shape_cast %287 : vector<32xf32> to vector<32x1xf32>
    %cst_95 = arith.constant 3.200000e+01 : f32
    %289 = vector.broadcast %cst_95 : f32 to vector<32x1xf32>
    %290 = arith.divf %288, %289 : vector<32x1xf32>
    %291 = vector.broadcast %290 : vector<32x1xf32> to vector<32x32xf32>
    %292 = arith.subf %284, %291 : vector<32x32xf32>
    %293 = arith.mulf %292, %292 : vector<32x32xf32>
    %cst_96 = arith.constant dense<0.000000e+00> : vector<32xf32>
    %294 = vector.multi_reduction <add>, %293, %cst_96 [1] : vector<32x32xf32> to vector<32xf32>
    %295 = vector.shape_cast %294 : vector<32xf32> to vector<32x1xf32>
    %cst_97 = arith.constant 3.200000e+01 : f32
    %296 = vector.broadcast %cst_97 : f32 to vector<32x1xf32>
    %297 = arith.divf %295, %296 : vector<32x1xf32>
    %298 = vector.broadcast %290 : vector<32x1xf32> to vector<32x32xf32>
    %299 = arith.subf %284, %298 : vector<32x32xf32>
    %cst_98 = arith.constant 9.99999996E-13 : f32
    %300 = vector.broadcast %cst_98 : f32 to vector<32x1xf32>
    %301 = arith.addf %297, %300 : vector<32x1xf32>
    %302 = math.rsqrt %301 : vector<32x1xf32>
    %303 = vector.broadcast %302 : vector<32x1xf32> to vector<32x32xf32>
    %304 = arith.mulf %299, %303 : vector<32x32xf32>
    %305 = vector.broadcast %285 : vector<1x32xf32> to vector<32x32xf32>
    %306 = arith.mulf %304, %305 : vector<32x32xf32>
    %307 = vector.broadcast %286 : vector<1x32xf32> to vector<32x32xf32>
    %308 = arith.addf %306, %307 : vector<32x32xf32>
    %309 = arith.truncf %308 : vector<32x32xf32> to vector<32x32xbf16>
    %c1_99 = arith.constant 1 : index
    %c0_100 = arith.constant 0 : index
    %c0_101 = arith.constant 0 : index
    %310 = vector.load %arg5[%c1_99, %c0_100, %c0_101] : memref<2x32x64xbf16, #tpu.memory_space<vmem>>, vector<1x32x64xbf16>
    %311 = vector.shape_cast %310 : vector<1x32x64xbf16> to vector<32x64xbf16>
    %cst_102 = arith.constant dense<0.000000e+00> : vector<32x64xf32>
    %312 = tpu.matmul %309, %311, %cst_102 {dimension_numbers = #tpu.dot_dimension_numbers<[1], [0], [0], [1], [0, 0, 1, 1], [], []>} : vector<32x32xbf16>, vector<32x64xbf16>, vector<32x64xf32> -> vector<32x64xf32>
    %c14 = arith.constant 14 : index
    %c0_103 = arith.constant 0 : index
    %313 = vector.load %arg2[%c14, %c0_103] : memref<18x128xf32, #tpu.memory_space<vmem>>, vector<1x64xf32>
    %314 = vector.broadcast %313 : vector<1x64xf32> to vector<32x64xf32>
    %315 = arith.addf %312, %314 : vector<32x64xf32>
    %316 = arith.mulf %315, %315 : vector<32x64xf32>
    %317 = arith.mulf %315, %316 : vector<32x64xf32>
    %cst_104 = arith.constant 4.471500e-02 : f32
    %318 = vector.broadcast %cst_104 : f32 to vector<32x64xf32>
    %319 = arith.mulf %318, %317 : vector<32x64xf32>
    %320 = arith.addf %315, %319 : vector<32x64xf32>
    %cst_105 = arith.constant 0.797884583 : f32
    %321 = vector.broadcast %cst_105 : f32 to vector<32x64xf32>
    %322 = arith.mulf %321, %320 : vector<32x64xf32>
    %323 = math.tanh %322 : vector<32x64xf32>
    %cst_106 = arith.constant 1.000000e+00 : f32
    %324 = vector.broadcast %cst_106 : f32 to vector<32x64xf32>
    %325 = arith.addf %324, %323 : vector<32x64xf32>
    %cst_107 = arith.constant 5.000000e-01 : f32
    %326 = vector.broadcast %cst_107 : f32 to vector<32x64xf32>
    %327 = arith.mulf %326, %325 : vector<32x64xf32>
    %328 = arith.mulf %315, %327 : vector<32x64xf32>
    %329 = arith.truncf %328 : vector<32x64xf32> to vector<32x64xbf16>
    %c1_108 = arith.constant 1 : index
    %c0_109 = arith.constant 0 : index
    %c0_110 = arith.constant 0 : index
    %330 = vector.load %arg6[%c1_108, %c0_109, %c0_110] : memref<2x64x32xbf16, #tpu.memory_space<vmem>>, vector<1x64x32xbf16>
    %331 = vector.shape_cast %330 : vector<1x64x32xbf16> to vector<64x32xbf16>
    %cst_111 = arith.constant dense<0.000000e+00> : vector<32x32xf32>
    %332 = tpu.matmul %329, %331, %cst_111 {dimension_numbers = #tpu.dot_dimension_numbers<[1], [0], [0], [1], [0, 0, 1, 1], [], []>} : vector<32x64xbf16>, vector<64x32xbf16>, vector<32x32xf32> -> vector<32x32xf32>
    %c15 = arith.constant 15 : index
    %c0_112 = arith.constant 0 : index
    %333 = vector.load %arg2[%c15, %c0_112] : memref<18x128xf32, #tpu.memory_space<vmem>>, vector<1x32xf32>
    %334 = vector.broadcast %333 : vector<1x32xf32> to vector<32x32xf32>
    %335 = arith.addf %332, %334 : vector<32x32xf32>
    %336 = arith.addf %308, %335 : vector<32x32xf32>
    %c16 = arith.constant 16 : index
    %c0_113 = arith.constant 0 : index
    %337 = vector.load %arg2[%c16, %c0_113] : memref<18x128xf32, #tpu.memory_space<vmem>>, vector<1x32xf32>
    %c17 = arith.constant 17 : index
    %c0_114 = arith.constant 0 : index
    %338 = vector.load %arg2[%c17, %c0_114] : memref<18x128xf32, #tpu.memory_space<vmem>>, vector<1x32xf32>
    %cst_115 = arith.constant dense<0.000000e+00> : vector<32xf32>
    %339 = vector.multi_reduction <add>, %336, %cst_115 [1] : vector<32x32xf32> to vector<32xf32>
    %340 = vector.shape_cast %339 : vector<32xf32> to vector<32x1xf32>
    %cst_116 = arith.constant 3.200000e+01 : f32
    %341 = vector.broadcast %cst_116 : f32 to vector<32x1xf32>
    %342 = arith.divf %340, %341 : vector<32x1xf32>
    %343 = vector.broadcast %342 : vector<32x1xf32> to vector<32x32xf32>
    %344 = arith.subf %336, %343 : vector<32x32xf32>
    %345 = arith.mulf %344, %344 : vector<32x32xf32>
    %cst_117 = arith.constant dense<0.000000e+00> : vector<32xf32>
    %346 = vector.multi_reduction <add>, %345, %cst_117 [1] : vector<32x32xf32> to vector<32xf32>
    %347 = vector.shape_cast %346 : vector<32xf32> to vector<32x1xf32>
    %cst_118 = arith.constant 3.200000e+01 : f32
    %348 = vector.broadcast %cst_118 : f32 to vector<32x1xf32>
    %349 = arith.divf %347, %348 : vector<32x1xf32>
    %350 = vector.broadcast %342 : vector<32x1xf32> to vector<32x32xf32>
    %351 = arith.subf %336, %350 : vector<32x32xf32>
    %cst_119 = arith.constant 9.99999996E-13 : f32
    %352 = vector.broadcast %cst_119 : f32 to vector<32x1xf32>
    %353 = arith.addf %349, %352 : vector<32x1xf32>
    %354 = math.rsqrt %353 : vector<32x1xf32>
    %355 = vector.broadcast %354 : vector<32x1xf32> to vector<32x32xf32>
    %356 = arith.mulf %351, %355 : vector<32x32xf32>
    %357 = vector.broadcast %337 : vector<1x32xf32> to vector<32x32xf32>
    %358 = arith.mulf %356, %357 : vector<32x32xf32>
    %359 = vector.broadcast %338 : vector<1x32xf32> to vector<32x32xf32>
    %360 = arith.addf %358, %359 : vector<32x32xf32>
    %c0_120 = arith.constant 0 : index
    %c0_121 = arith.constant 0 : index
    %361 = vector.load %arg7[%c0_120, %c0_121] : memref<32x32xf32, #tpu.memory_space<vmem>>, vector<32x32xf32>
    tpu.vector_store %arg7[%c0_120, %c0_121], %360 {strides = array<i32>} : memref<32x32xf32, #tpu.memory_space<vmem>>, vector<32x32xf32>,
    return
  }
}

</mosaic_0001>

<bundles_post_ra>
// kernel: encoder_forward.1
= control target key start
LH: loop header
LB: loop body
LE: loop exit
PB: predicated region body
PF: predicated region fallthrough
CT: control target
= control target key end

     0   :  { %vm34_vm0 = vcmask 261120   ;;  %s8645_s0 = inlined_call_operand.vmem [shape: f32[32,32], index: 0, kind: input, shape index: {}]   ;;  %s8646_s1 = inlined_call_operand.vmem [shape: f32[4,8], index: 1, kind: input, shape index: {}]   ;;  %s8647_s2 = inlined_call_operand.vmem [shape: f32[18,128], index: 2, kind: input, shape index: {}]   ;;  %s8648_s3 = inlined_call_operand.vmem [shape: bf16[2,32,96], index: 3, kind: input, shape index: {}]   ;;  %s8649_s4 = inlined_call_operand.vmem [shape: bf16[2,32,32], index: 4, kind: input, shape index: {}]   ;;  %s8650_s5 = inlined_call_operand.vmem [shape: bf16[2,32,64], index: 5, kind: input, shape index: {}]   ;;  %s8651_s6 = inlined_call_operand.vmem [shape: bf16[2,64,32], index: 6, kind: input, shape index: {}]   ;;  %s8652_s7 = inlined_call_operand.hbm [shape: f32[32,32], index: 7, kind: output, shape index: {}]  }
   0x1   :  { %v28_v0 = vld [vmem:[%s8645_s0] sm:$0xff]  ;;  %v30_v1 = vld [vmem:[%s8645_s0 + $0x10] sm:$0xff]  ;;  %v29_v2 = vld [vmem:[%s8645_s0 + $0x8] sm:$0xff] }
   0x2   :  { %v35_v3 = vsel %vm34_vm0, %v28_v0, 0.0  ;;  %v41_v4 = vsel %vm34_vm0, %v30_v1, 0.0  ;;  %v31_v5 = vld [vmem:[%s8645_s0 + $0x18] sm:$0xff]  ;;  %v38_v6 = vsel %vm34_vm0, %v29_v2, 0.0 }
   0x3   :  { %36 = vadd.xlane.f32.xlu0 %v35_v3  ;;  %42 = vadd.xlane.f32.xlu1 %v41_v4  ;;  %v44_v7 = vsel %vm34_vm0, %v31_v5, 0.0 }
   0x7   :  { %39 = vadd.xlane.f32.xlu0 %v38_v6  ;;  %45 = vadd.xlane.f32.xlu1 %v44_v7 }
   0x8   :  { %12 = vsyncpa [#allocation3], 0  ;;  %v7401_v28 = vld [vmem:[%s8648_s3] sm:$0xff]   ;;  %v7402_v29 = vld [vmem:[%s8648_s3 + $0x8] sm:$0xff]   ;;  %v7629_v62 = vmov 0.0   ;;  %vm7630_vm1 = vmmov 0  }
   0x9   :  { %6930 = vmatprep.subr.bf16.mxu0 %v7401_v28  ;;  %v6596_v44 = vld [vmem:[%s8647_s2] ss:$0 sm:$0xff]  ;;  %v6597_v49 = vld [vmem:[%s8647_s2 + $0x1] ss:$0 sm:$0xff]  ;;  %6943 = vmatprep.subr.mxu1 %v7629_v62  ;;  %v6598_v63 = vld [vmem:[%s8647_s2 + $0x2] ss:$0 sm:$0xff] }
   0xa   :  { %6931 = vmatpush3.bf16.msra.mxu0 %v7401_v28  ;;  %6945 = vmatprep.mubr.msk.f32.mxu1 %vm7630_vm1, %v7629_v62  ;;  %s7631_s18 = smov 96   ;;  %vm233_vm2 = vcmask 64512   ;;  %s7634_s21 = smov 88   ;;  %vm2919_vm3 = vcmask 130048   ;;  %vm2924_vm4 = vcmask 195584   ;;  %vm3234_vm5 = vcmask 523264  }
   0xb   :  { %6932 = vmatprep.subr.bf16.mxu0 %v7402_v29  ;;  %s7635_s22 = smov 120   ;;  %s7636_s23 = smov 56  }
   0xc   :  { %s7637_s24 = smov 80   ;;  %s7638_s25 = smov 112  }
   0xd   :  { %s7639_s26 = smov 48   ;;  %s7640_s27 = smov 72  }
   0xe   :  { %6933 = vmatpush3.bf16.msra.mxu0 %v7402_v29  ;;  %s7641_s28 = smov 104   ;;  %s7642_s29 = smov 40  }
   0xf   :  { %6938 = vmatprep.subr.mxu0 %v7629_v62  ;;  %s7643_s30 = smov 8   ;;  %s7644_s8 = smov 16  }
  0x10   :  { %s7645_s10 = smov 24  }
  0x90   :  { %v37_v8 = vpop.xlane.xlu0 %36  ;;  %v43_v9 = vpop.xlane.xlu1 %42 }
  0x91   :  { %v48_v10 = vmul.f32 0.03125, %v37_v8  ;;  %v50_v11 = vmul.f32 0.03125, %v43_v9 }
  0x93   :  { %v52_v12 = vsub.f32 %v28_v0, %v48_v10  ;;  %v54_v13 = vsub.f32 %v30_v1, %v50_v11 }
  0x94   :  { %v40_v14 = vpop.xlane.xlu0 %39  ;;  %v46_v15 = vpop.xlane.xlu1 %45 }
  0x95   :  { %v49_v16 = vmul.f32 0.03125, %v40_v14  ;;  %v51_v17 = vmul.f32 0.03125, %v46_v15  ;;  %v56_v18 = vmul.f32 %v52_v12, %v52_v12  ;;  %v58_v19 = vmul.f32 %v54_v13, %v54_v13  ;;  %v104_v15 = vld [vmem:[%s8646_s1] sm:$0xf]  ;;  %s7633_s1 = smov 64  }
  0x96   :  { %v111_v14 = vlaneseq }
  0x97   :  { %v53_v20 = vsub.f32 %v29_v2, %v49_v16  ;;  %v55_v21 = vsub.f32 %v31_v5, %v51_v17  ;;  %v60_v22 = vsel %vm34_vm0, %v56_v18, 0.0  ;;  %v66_v23 = vsel %vm34_vm0, %v58_v19, 0.0 }
  0x98   :  { %61 = vadd.xlane.f32.xlu0 %v60_v22  ;;  %v105_v16 = vsub.f32 1.0, %v104_v15  ;;  %v112_v18 = vshrl.u32 %v111_v14, 7 }
  0x99   :  { %v57_v24 = vmul.f32 %v53_v20, %v53_v20  ;;  %v59_v25 = vmul.f32 %v55_v21, %v55_v21 }
  0x9a   :  { %v106_v19 = vmul.f32 -10000.0, %v105_v16 }
  0x9b   :  { %v63_v26 = vsel %vm34_vm0, %v57_v24, 0.0  ;;  %v69_v27 = vsel %vm34_vm0, %v59_v25, 0.0  ;;  %v212_v24 = vsub.s32 0, %v112_v18 }
  0x9c   :  { %67 = vadd.xlane.f32.xlu0 %v66_v23  ;;  %64 = vadd.xlane.f32.xlu1 %v63_v26 }
  0xa0   :  { %70 = vadd.xlane.f32.xlu1 %v69_v27 }
 0x125   :  { %v62_v30 = vpop.xlane.xlu0 %61 }
 0x126   :  { %v72_v31 = vmul.f32 0.03125, %v62_v30 }
 0x128   :  { %v76_v32 = vadd.f32 1e-12, %v72_v31 }
 0x129   :  { %v65_v33 = vpop.xlane.xlu1 %64  ;;  %v68_v34 = vpop.xlane.xlu0 %67 }
 0x12a   :  { %7421 = vrsqrt.f32 %v76_v32  ;;  %v73_v35 = vmul.f32 0.03125, %v65_v33  ;;  %v74_v36 = vmul.f32 0.03125, %v68_v34 }
 0x12c   :  { %v77_v37 = vadd.f32 1e-12, %v73_v35  ;;  %v78_v38 = vadd.f32 1e-12, %v74_v36 }
 0x12d   :  { %v71_v39 = vpop.xlane.xlu1 %70 }
 0x12e   :  { %7423 = vrsqrt.f32 %v77_v37  ;;  %v75_v40 = vmul.f32 0.03125, %v71_v39 }
 0x12f   :  { %7425 = vrsqrt.f32 %v78_v38 }
 0x130   :  { %v79_v41 = vadd.f32 1e-12, %v75_v40 }
 0x132   :  { %7427 = vrsqrt.f32 %v79_v41 }
 0x134   :  { %v7422_v42 = vpop.eup %7421 }
 0x135   :  { %v84_v43 = vmul.f32 %v7422_v42, %v52_v12  ;;  %v7632_v12 = vmov 1966171168  }
 0x137   :  { %v92_v48 = vmul.f32 %v6596_v44, %v84_v43 }
 0x138   :  { %v7424_v45 = vpop.eup %7423 }
 0x139   :  { %v7426_v46 = vpop.eup %7425  ;;  %v85_v47 = vmul.f32 %v7424_v45, %v53_v20  ;;  %v7720_v53 = vadd.f32 %v6597_v49, %v92_v48 }
 0x13a   :  { %v86_v50 = vmul.f32 %v7426_v46, %v54_v13  ;;  %v109_v13 = vunpack.c.l.s4 %v7632_v12 }
 0x13b   :  { %v93_v51 = vmul.f32 %v6596_v44, %v85_v47 }
 0x13c   :  { %v7428_v52 = vpop.eup %7427  ;;  %v94_v56 = vmul.f32 %v6596_v44, %v86_v50  ;;  %v110_v17 = vunpack.c.0.s8 %v109_v13 }
 0x13d   :  { %v7722_v54 = vadd.f32 %v6597_v49, %v93_v51  ;;  %v87_v55 = vmul.f32 %v7428_v52, %v55_v21 }
 0x13e   :  { %v7727_v59 = vadd.f32 %v6597_v49, %v94_v56  ;;  %v113_v20 = vsub.s32 %v110_v17, %v112_v18 }
 0x13f   :  { %v132_v57 = vpack.c.bf16 %v7722_v54, %v7720_v53  ;;  %v95_v58 = vmul.f32 %v6596_v44, %v87_v55 }
 0x140   :  { %v114_v21 = vrot.slane %v106_v19, %v113_v20 }
 0x141   :  { %6934 = vmatprep.mubr.msk.bf16.mxu0 %vm34_vm0, %v132_v57  ;;  %v7729_v60 = vadd.f32 %v6597_v49, %v95_v58 }
 0x142   :  { %v115_v22 = vcombine.high %v114_v21, %v114_v21  ;;  %v122_v23 = vrot.slane %v114_v21, %v113_v20 }
 0x143   :  { %v133_v61 = vpack.c.bf16 %v7729_v60, %v7727_v59 }
 0x144   :  { %v129_v25 = vrot.slane %v115_v22, %v113_v20  ;;  %v7786_v26 = vrot.slane %v122_v23, %v212_v24  ;;  %v130_v28 = vcombine.high %v122_v23, %v122_v23 }
 0x145   :  { %6935 = vmatmul.mubr.msk.bf16.vlgmr.msra.gmra.mrb[0].mxu0 %vm34_vm0, %v133_v61 }
 0x146   :  { %6940 = vmatprep.mubr.msk.f32.mxu0 %vm7630_vm1, %v7629_v62  ;;  %v7788_v27 = vrot.slane %v129_v25, %v212_v24  ;;  %v7793_v36 = vrot.slane %v130_v28, %v212_v24  ;;  %v131_v37 = vcombine.high %v129_v25, %v129_v25 }
 0x148   :  { %v7797_v42 = vrot.slane %v131_v37, %v212_v24 }
 0x218   :  { %v6936_v0 = vpop.f32.mrb[0].mxu0 }
 0x219   :  { %v195_v1 = vpop.f32.mrb[1].mxu0  ;;  %v7751_v6 = vadd.f32 %v6936_v0, %v6598_v63 }
 0x21a   :  { %v7743_v2 = vadd.f32 %v6598_v63, %v195_v1  ;;  %v6937_v3 = vpop.f32.mrb[2].mxu0 }
 0x21b   :  { %v198_v4 = vpop.f32.mrb[3].mxu0  ;;  %v7755_v7 = vadd.f32 %v6937_v3, %v6598_v63 }
 0x21c   :  { %v7745_v5 = vadd.f32 %v6598_v63, %v198_v4  ;;  %231 = vrot.lane.b32.xlu0 %v7743_v2, %s7631_s18 }
 0x21e   :  { %309 = vrot.lane.b32.xlu1 %v7745_v5, %s7631_s18 }
 0x222   :  { %386 = vrot.lane.b32.xlu1 %v7751_v6, %s7631_s18 }
 0x226   :  { %463 = vrot.lane.b32.xlu1 %v7755_v7, %s7631_s18 }
 0x28e   :  { %v232_v8 = vpop.permute.xlu0 %231 }
 0x28f   :  { %6939 = vmatpush3.xpose.msk.msra.mxu0 %vm233_vm2, %v232_v8 }
 0x290   :  { %v310_v9 = vpop.permute.xlu1 %309  ;;  %6953 = vmatprep.subr.mxu0 %v7629_v62 }
 0x291   :  { %6944 = vmatpush3.xpose.msk.msra.mxu1 %vm233_vm2, %v310_v9 }
 0x292   :  { %6941 = vmatmul.mubr.msk.f32.vlgmr.msra.gmra.mrb[4].mxu0 %vm233_vm2, %v7743_v2  ;;  %6948 = vmatprep.subr.mxu1 %v7629_v62 }
 0x293   :  { %6955 = vmatprep.mubr.msk.f32.mxu0 %vm7630_vm1, %v7629_v62 }
 0x294   :  { %6946 = vmatmul.mubr.msk.f32.vlgmr.msra.gmra.mrb[0].mxu1 %vm233_vm2, %v7745_v5  ;;  %v387_v10 = vpop.permute.xlu1 %386 }
 0x295   :  { %6949 = vmatpush3.xpose.msk.msra.mxu1 %vm233_vm2, %v387_v10  ;;  %6950 = vmatprep.mubr.msk.f32.mxu1 %vm7630_vm1, %v7629_v62 }
 0x296   :  { %6958 = vmatprep.subr.mxu1 %v7629_v62 }
 0x298   :  { %6951 = vmatmul.mubr.msk.f32.vlgmr.msra.gmra.mrb[2].mxu1 %vm233_vm2, %v7751_v6  ;;  %v464_v11 = vpop.permute.xlu1 %463 }
 0x299   :  { %6954 = vmatpush3.xpose.msk.msra.mxu0 %vm233_vm2, %v464_v11  ;;  %6960 = vmatprep.mubr.msk.f32.mxu1 %vm7630_vm1, %v7629_v62 }
 0x29a   :  { %6963 = vmatprep.subr.mxu0 %v7629_v62 }
 0x29c   :  { %6956 = vmatmul.mubr.msk.f32.vlgmr.msra.gmra.mrb[6].mxu0 %vm233_vm2, %v7755_v7 }
 0x29d   :  { %6965 = vmatprep.mubr.msk.f32.mxu0 %vm7630_vm1, %v7629_v62 }
 0x365   :  { %v304_v29 = vpop.f32.mrb[4].mxu0 }
 0x366   :  { %v305_v30 = vadd.f32 %v304_v29, %v7786_v26  ;;  %v6942_v31 = vpop.f32.mrb[5].mxu0 }
 0x367   :  { %v381_v32 = vpop.f32.mrb[0].mxu1 }
 0x368   :  { %v382_v33 = vadd.f32 %v381_v32, %v7788_v27  ;;  %v6947_v34 = vpop.f32.mrb[1].mxu1  ;;  %v539_v35 = vsel %vm233_vm2, %v305_v30, -inf }
 0x369   :  { %540 = vmax.xlane.f32.xlu0 %v539_v35 }
 0x36a   :  { %v542_v38 = vsel %vm233_vm2, %v382_v33, -inf }
 0x36b   :  { %543 = vmax.xlane.f32.xlu1 %v542_v38  ;;  %v458_v39 = vpop.f32.mrb[2].mxu1 }
 0x36c   :  { %v459_v40 = vadd.f32 %v458_v39, %v7793_v36  ;;  %v6952_v41 = vpop.f32.mrb[3].mxu1 }
 0x36e   :  { %v545_v43 = vsel %vm233_vm2, %v459_v40, -inf }
 0x36f   :  { %546 = vmax.xlane.f32.xlu0 %v545_v43  ;;  %v535_v44 = vpop.f32.mrb[6].mxu0 }
 0x370   :  { %v536_v45 = vadd.f32 %v535_v44, %v7797_v42  ;;  %v6957_v46 = vpop.f32.mrb[7].mxu0 }
 0x372   :  { %v548_v47 = vsel %vm233_vm2, %v536_v45, -inf }
 0x373   :  { %549 = vmax.xlane.f32.xlu0 %v548_v47 }
 0x37c   :  { %659 = vrot.lane.b32.xlu1 %v7745_v5, %s7633_s1 }
 0x380   :  { %735 = vrot.lane.b32.xlu1 %v7751_v6, %s7633_s1 }
 0x384   :  { %811 = vrot.lane.b32.xlu1 %v7755_v7, %s7633_s1 }
 0x388   :  { %967 = vrot.lane.b32.xlu1 %v7745_v5, %s7634_s21 }
 0x389   :  { %583 = vrot.lane.b32.xlu0 %v7743_v2, %s7633_s1 }
 0x38d   :  { %889 = vrot.lane.b32.xlu0 %v7743_v2, %s7634_s21 }
 0x3f6   :  { %v541_v48 = vpop.xlane.xlu0 %540 }
 0x3f7   :  { %v551_v49 = vsub.f32 %v305_v30, %v541_v48 }
 0x3f8   :  { %v544_v50 = vpop.xlane.xlu1 %543 }
 0x3f9   :  { %v555_v51 = vmul.f32 1.442695, %v551_v49  ;;  %v552_v52 = vsub.f32 %v382_v33, %v544_v50 }
 0x3fb   :  { %7429 = vpow2.f32 %v555_v51  ;;  %v557_v55 = vmul.f32 1.442695, %v552_v52 }
 0x3fc   :  { %v660_v56 = vpop.permute.xlu1 %659  ;;  %v547_v57 = vpop.xlane.xlu0 %546 }
 0x3fd   :  { %7431 = vpow2.f32 %v557_v55  ;;  %v553_v58 = vsub.f32 %v459_v40, %v547_v57  ;;  %6964 = vmatpush3.msra.mxu0 %v660_v56 }
 0x3fe   :  { %6973 = vmatprep.subr.mxu0 %v7629_v62 }
 0x3ff   :  { %v559_v61 = vmul.f32 1.442695, %v553_v58 }
 0x400   :  { %v550_v63 = vpop.xlane.xlu0 %549  ;;  %v736_v15 = vpop.permute.xlu1 %735 }
 0x401   :  { %7433 = vpow2.f32 %v559_v61  ;;  %v554_v0 = vsub.f32 %v536_v45, %v550_v63 }
 0x403   :  { %v561_v1 = vmul.f32 1.442695, %v554_v0 }
 0x404   :  { %v584_v3 = vpop.permute.xlu0 %583  ;;  %v812_v16 = vpop.permute.xlu1 %811 }
 0x405   :  { %v7430_v4 = vpop.eup %7429  ;;  %7435 = vpow2.f32 %v561_v1  ;;  %6959 = vmatpush3.msra.mxu1 %v584_v3 }
 0x406   :  { %v563_v8 = vsel %vm233_vm2, %v7430_v4, 0.0  ;;  %6968 = vmatprep.subr.mxu1 %v7629_v62 }
 0x407   :  { %v7432_v9 = vpop.eup %7431  ;;  %564 = vadd.xlane.f32.xlu0 %v563_v8 }
 0x408   :  { %v566_v10 = vsel %vm233_vm2, %v7432_v9, 0.0  ;;  %v890_v17 = vpop.permute.xlu0 %889  ;;  %v968_v18 = vpop.permute.xlu1 %967 }
 0x409   :  { %567 = vadd.xlane.f32.xlu1 %v566_v10 }
 0x40b   :  { %v7434_v11 = vpop.eup %7433 }
 0x40c   :  { %v569_v12 = vsel %vm233_vm2, %v7434_v11, 0.0 }
 0x40d   :  { %570 = vadd.xlane.f32.xlu0 %v569_v12 }
 0x40f   :  { %v7436_v13 = vpop.eup %7435 }
 0x410   :  { %v572_v14 = vsel %vm233_vm2, %v7436_v13, 0.0 }
 0x411   :  { %573 = vadd.xlane.f32.xlu1 %v572_v14 }
 0x422   :  { %965 = vrot.lane.b32.xlu1 %v7745_v5, %s7635_s22 }
 0x423   :  { %887 = vrot.lane.b32.xlu0 %v7743_v2, %s7635_s22 }
 0x426   :  { %1123 = vrot.lane.b32.xlu1 %v7755_v7, %s7634_s21 }
 0x427   :  { %1045 = vrot.lane.b32.xlu0 %v7751_v6, %s7634_s21 }
 0x42a   :  { %1121 = vrot.lane.b32.xlu1 %v7755_v7, %s7635_s22 }
 0x42b   :  { %1043 = vrot.lane.b32.xlu0 %v7751_v6, %s7635_s22 }
 0x494   :  { %v565_v19 = vpop.xlane.xlu0 %564 }
 0x495   :  { %7437 = vrcp.f32 %v565_v19 }
 0x496   :  { %v568_v20 = vpop.xlane.xlu1 %567 }
 0x497   :  { %7439 = vrcp.f32 %v568_v20 }
 0x49a   :  { %v571_v21 = vpop.xlane.xlu0 %570 }
 0x49b   :  { %7441 = vrcp.f32 %v571_v21 }
 0x49e   :  { %v574_v22 = vpop.xlane.xlu1 %573  ;;  %v888_v29 = vpop.permute.xlu0 %887 }
 0x49f   :  { %v7438_v23 = vpop.eup %7437  ;;  %7443 = vrcp.f32 %v574_v22 }
 0x4a0   :  { %v579_v24 = vmul.f32 %v7438_v23, %v7430_v4 }
 0x4a1   :  { %v7440_v25 = vpop.eup %7439 }
 0x4a2   :  { %6961 = vmatmul.mubr.msk.f32.vlgmr.msra.gmra.mrb[4].mxu1 %vm233_vm2, %v579_v24  ;;  %v580_v28 = vmul.f32 %v7440_v25, %v7432_v9  ;;  %v966_v32 = vpop.permute.xlu1 %965  ;;  %v1046_v34 = vpop.permute.xlu0 %1045 }
 0x4a3   :  { %6969 = vmatpush3.msra.mxu1 %v736_v15  ;;  %6970 = vmatprep.mubr.msk.f32.mxu1 %vm7630_vm1, %v7629_v62 }
 0x4a4   :  { %6966 = vmatmul.mubr.msk.f32.vlgmr.msra.gmra.mrb[8].mxu0 %vm233_vm2, %v580_v28  ;;  %6978 = vmatprep.subr.mxu1 %v7629_v62 }
 0x4a5   :  { %v7442_v30 = vpop.eup %7441  ;;  %6974 = vmatpush3.msra.mxu0 %v812_v16  ;;  %6975 = vmatprep.mubr.msk.f32.mxu0 %vm7630_vm1, %v7629_v62 }
 0x4a6   :  { %v581_v31 = vmul.f32 %v7442_v30, %v7434_v11  ;;  %6983 = vmatprep.subr.mxu0 %v7629_v62  ;;  %v1124_v37 = vpop.permute.xlu1 %1123  ;;  %v1044_v38 = vpop.permute.xlu0 %1043 }
 0x4a8   :  { %6971 = vmatmul.mubr.msk.f32.vlgmr.msra.gmra.mrb[6].mxu1 %vm233_vm2, %v581_v31 }
 0x4a9   :  { %v7444_v33 = vpop.eup %7443  ;;  %6980 = vmatprep.mubr.msk.f32.mxu1 %vm7630_vm1, %v7629_v62 }
 0x4aa   :  { %6979 = vmatpush3.xpose.msk.msra.mxu1 %vm233_vm2, %v890_v17  ;;  %v582_v35 = vmul.f32 %v7444_v33, %v7436_v13  ;;  %v1122_v39 = vpop.permute.xlu1 %1121 }
 0x4ab   :  { %6988 = vmatprep.subr.mxu1 %v7629_v62 }
 0x4ac   :  { %6976 = vmatmul.mubr.msk.f32.vlgmr.msra.gmra.mrb[10].mxu0 %vm233_vm2, %v582_v35 }
 0x4ad   :  { %6981 = vmatmul.mubr.msk.f32.vlgmr.msra.gmra.mrb[8].mxu1 %vm233_vm2, %v888_v29  ;;  %6984 = vmatpush3.xpose.msk.msra.mxu0 %vm233_vm2, %v968_v18 }
 0x4ae   :  { %6989 = vmatpush3.xpose.msk.msra.mxu1 %vm233_vm2, %v1046_v34  ;;  %6985 = vmatprep.mubr.msk.f32.mxu0 %vm7630_vm1, %v7629_v62 }
 0x4af   :  { %6990 = vmatprep.mubr.msk.f32.mxu1 %vm7630_vm1, %v7629_v62  ;;  %6993 = vmatprep.subr.mxu0 %v7629_v62 }
 0x4b0   :  { %6986 = vmatmul.mubr.msk.f32.vlgmr.msra.gmra.mrb[12].mxu0 %vm233_vm2, %v966_v32  ;;  %6998 = vmatprep.subr.mxu1 %v7629_v62 }
 0x4b1   :  { %6991 = vmatmul.mubr.msk.f32.vlgmr.msra.gmra.mrb[10].mxu1 %vm233_vm2, %v1044_v38  ;;  %6994 = vmatpush3.xpose.msk.msra.mxu0 %vm233_vm2, %v1124_v37 }
 0x4b2   :  { %6995 = vmatprep.mubr.msk.f32.mxu0 %vm7630_vm1, %v7629_v62  ;;  %7003 = vmatprep.subr.mxu0 %v7629_v62 }
 0x4b3   :  { %7000 = vmatprep.mubr.msk.f32.mxu1 %vm7630_vm1, %v7629_v62 }
 0x4b4   :  { %6996 = vmatmul.mubr.msk.f32.vlgmr.msra.gmra.mrb[14].mxu0 %vm233_vm2, %v1122_v39 }
 0x4b5   :  { %7005 = vmatprep.mubr.msk.f32.mxu0 %vm7630_vm1, %v7629_v62 }
 0x575   :  { %v7866_v40 = vpop.f32.mrb[4].mxu1 }
 0x576   :  { %v6962_v41 = vpop.f32.mrb[5].mxu1 }
 0x577   :  { %v7868_v43 = vpop.f32.mrb[8].mxu0 }
 0x578   :  { %v6967_v44 = vpop.f32.mrb[9].mxu0 }
 0x57b   :  { %v7870_v45 = vpop.f32.mrb[6].mxu1 }
 0x57c   :  { %v6972_v46 = vpop.f32.mrb[7].mxu1 }
 0x57f   :  { %v7872_v47 = vpop.f32.mrb[10].mxu0 }
 0x580   :  { %v961_v48 = vpop.f32.mrb[8].mxu1  ;;  %v6977_v49 = vpop.f32.mrb[11].mxu0 }
 0x581   :  { %v962_v50 = vadd.f32 %v961_v48, %v7786_v26  ;;  %v6982_v51 = vpop.f32.mrb[9].mxu1 }
 0x583   :  { %v1199_v52 = vsel %vm233_vm2, %v962_v50, -inf  ;;  %v1039_v55 = vpop.f32.mrb[12].mxu0 }
 0x584   :  { %1200 = vmax.xlane.f32.xlu0 %v1199_v52  ;;  %v1040_v56 = vadd.f32 %v1039_v55, %v7788_v27  ;;  %v1117_v57 = vpop.f32.mrb[10].mxu1  ;;  %v6987_v58 = vpop.f32.mrb[13].mxu0 }
 0x585   :  { %v1118_v61 = vadd.f32 %v1117_v57, %v7793_v36  ;;  %v6992_v63 = vpop.f32.mrb[11].mxu1 }
 0x586   :  { %v1202_v0 = vsel %vm233_vm2, %v1040_v56, -inf }
 0x587   :  { %v1205_v1 = vsel %vm233_vm2, %v1118_v61, -inf  ;;  %1203 = vmax.xlane.f32.xlu1 %v1202_v0  ;;  %v1195_v3 = vpop.f32.mrb[14].mxu0 }
 0x588   :  { %1206 = vmax.xlane.f32.xlu0 %v1205_v1  ;;  %v1196_v4 = vadd.f32 %v1195_v3, %v7797_v42  ;;  %v6997_v8 = vpop.f32.mrb[15].mxu0 }
 0x58a   :  { %v1208_v9 = vsel %vm233_vm2, %v1196_v4, -inf }
 0x58c   :  { %1209 = vmax.xlane.f32.xlu0 %v1208_v9 }
 0x598   :  { %1319 = vrot.lane.b32.xlu1 %v7745_v5, %s7636_s23 }
 0x59c   :  { %1395 = vrot.lane.b32.xlu1 %v7751_v6, %s7636_s23 }
 0x5a0   :  { %1471 = vrot.lane.b32.xlu1 %v7755_v7, %s7636_s23 }
 0x5a2   :  { %1243 = vrot.lane.b32.xlu0 %v7743_v2, %s7636_s23 }
 0x5a4   :  { %1627 = vrot.lane.b32.xlu1 %v7745_v5, %s7637_s24 }
 0x5a6   :  { %1549 = vrot.lane.b32.xlu0 %v7743_v2, %s7637_s24 }
 0x611   :  { %v1201_v10 = vpop.xlane.xlu0 %1200 }
 0x612   :  { %v1211_v11 = vsub.f32 %v962_v50, %v1201_v10 }
 0x614   :  { %v1215_v12 = vmul.f32 1.442695, %v1211_v11  ;;  %v1204_v13 = vpop.xlane.xlu1 %1203 }
 0x615   :  { %v1207_v14 = vpop.xlane.xlu0 %1206  ;;  %v1212_v15 = vsub.f32 %v1040_v56, %v1204_v13 }
 0x616   :  { %7445 = vpow2.f32 %v1215_v12  ;;  %v1213_v16 = vsub.f32 %v1118_v61, %v1207_v14 }
 0x617   :  { %v1217_v17 = vmul.f32 1.442695, %v1212_v15 }
 0x618   :  { %v1219_v18 = vmul.f32 1.442695, %v1213_v16  ;;  %v1320_v19 = vpop.permute.xlu1 %1319 }
 0x619   :  { %7447 = vpow2.f32 %v1217_v17  ;;  %v1210_v20 = vpop.xlane.xlu0 %1209  ;;  %7004 = vmatpush3.msra.mxu0 %v1320_v19 }
 0x61a   :  { %7449 = vpow2.f32 %v1219_v18  ;;  %7013 = vmatprep.subr.mxu0 %v7629_v62  ;;  %v1214_v30 = vsub.f32 %v1196_v4, %v1210_v20 }
 0x61c   :  { %v1221_v31 = vmul.f32 1.442695, %v1214_v30  ;;  %v1396_v34 = vpop.permute.xlu1 %1395 }
 0x61d   :  { %v1244_v21 = vpop.permute.xlu0 %1243 }
 0x61e   :  { %6999 = vmatpush3.msra.mxu1 %v1244_v21  ;;  %7451 = vpow2.f32 %v1221_v31 }
 0x61f   :  { %7008 = vmatprep.subr.mxu1 %v7629_v62 }
 0x620   :  { %v7446_v22 = vpop.eup %7445  ;;  %v1472_v35 = vpop.permute.xlu1 %1471 }
 0x621   :  { %v1223_v23 = vsel %vm233_vm2, %v7446_v22, 0.0  ;;  %v1550_v37 = vpop.permute.xlu0 %1549 }
 0x622   :  { %1224 = vadd.xlane.f32.xlu0 %v1223_v23 }
 0x623   :  { %v7448_v24 = vpop.eup %7447 }
 0x624   :  { %v7450_v25 = vpop.eup %7449  ;;  %v1226_v28 = vsel %vm233_vm2, %v7448_v24, 0.0  ;;  %v1628_v38 = vpop.permute.xlu1 %1627 }
 0x625   :  { %1227 = vadd.xlane.f32.xlu1 %v1226_v28  ;;  %v1229_v29 = vsel %vm233_vm2, %v7450_v25, 0.0 }
 0x626   :  { %1230 = vadd.xlane.f32.xlu0 %v1229_v29 }
 0x628   :  { %v7452_v32 = vpop.eup %7451 }
 0x629   :  { %v1232_v33 = vsel %vm233_vm2, %v7452_v32, 0.0 }
 0x636   :  { %1625 = vrot.lane.b32.xlu1 %v7745_v5, %s7638_s25 }
 0x63c   :  { %1547 = vrot.lane.b32.xlu0 %v7743_v2, %s7638_s25 }
 0x640   :  { %1705 = vrot.lane.b32.xlu0 %v7751_v6, %s7637_s24 }
 0x644   :  { %1703 = vrot.lane.b32.xlu0 %v7751_v6, %s7638_s25 }
 0x648   :  { %1903 = vrot.lane.b32.xlu0 %v7743_v2, %s7639_s26 }
 0x65a   :  { %1233 = vadd.xlane.f32.xlu1 %v1232_v33 }
 0x66b   :  { %1783 = vrot.lane.b32.xlu1 %v7755_v7, %s7637_s24 }
 0x66f   :  { %1781 = vrot.lane.b32.xlu1 %v7755_v7, %s7638_s25 }
 0x673   :  { %1979 = vrot.lane.b32.xlu1 %v7745_v5, %s7639_s26 }
 0x677   :  { %2055 = vrot.lane.b32.xlu1 %v7751_v6, %s7639_s26 }
 0x67b   :  { %2131 = vrot.lane.b32.xlu1 %v7755_v7, %s7639_s26 }
 0x6af   :  { %v1225_v39 = vpop.xlane.xlu0 %1224 }
 0x6b0   :  { %7453 = vrcp.f32 %v1225_v39 }
 0x6b2   :  { %v1228_v41 = vpop.xlane.xlu1 %1227 }
 0x6b3   :  { %7455 = vrcp.f32 %v1228_v41  ;;  %v1231_v44 = vpop.xlane.xlu0 %1230 }
 0x6b4   :  { %7457 = vrcp.f32 %v1231_v44 }
 0x6b6   :  { %v1626_v61 = vpop.permute.xlu1 %1625 }
 0x6b7   :  { %v1548_v48 = vpop.permute.xlu0 %1547 }
 0x6ba   :  { %v7454_v46 = vpop.eup %7453 }
 0x6bb   :  { %v1239_v49 = vmul.f32 %v7454_v46, %v7446_v22  ;;  %v1706_v56 = vpop.permute.xlu0 %1705 }
 0x6bd   :  { %v7456_v50 = vpop.eup %7455  ;;  %7001 = vmatmul.mubr.msk.f32.vlgmr.msra.gmra.mrb[12].mxu1 %vm233_vm2, %v1239_v49 }
 0x6be   :  { %v7458_v51 = vpop.eup %7457  ;;  %7009 = vmatpush3.msra.mxu1 %v1396_v34  ;;  %7010 = vmatprep.mubr.msk.f32.mxu1 %vm7630_vm1, %v7629_v62  ;;  %v1240_v52 = vmul.f32 %v7456_v50, %v7448_v24 }
 0x6bf   :  { %v1241_v55 = vmul.f32 %v7458_v51, %v7450_v25  ;;  %7018 = vmatprep.subr.mxu1 %v7629_v62  ;;  %v1704_v57 = vpop.permute.xlu0 %1703 }
 0x6c0   :  { %7006 = vmatmul.mubr.msk.f32.vlgmr.msra.gmra.mrb[16].mxu0 %vm233_vm2, %v1240_v52 }
 0x6c1   :  { %7011 = vmatmul.mubr.msk.f32.vlgmr.msra.gmra.mrb[14].mxu1 %vm233_vm2, %v1241_v55  ;;  %7014 = vmatpush3.msra.mxu0 %v1472_v35 }
 0x6c2   :  { %7020 = vmatprep.mubr.msk.f32.mxu1 %vm7630_vm1, %v7629_v62  ;;  %7015 = vmatprep.mubr.msk.f32.mxu0 %vm7630_vm1, %v7629_v62 }
 0x6c3   :  { %7023 = vmatprep.subr.mxu0 %v7629_v62  ;;  %v1904_v58 = vpop.permute.xlu0 %1903 }
 0x6c5   :  { %7019 = vmatpush3.xpose.msk.msra.mxu1 %vm233_vm2, %v1550_v37 }
 0x6c6   :  { %7028 = vmatprep.subr.mxu1 %v7629_v62 }
 0x6c8   :  { %7021 = vmatmul.mubr.msk.f32.vlgmr.msra.gmra.mrb[16].mxu1 %vm233_vm2, %v1548_v48 }
 0x6c9   :  { %7029 = vmatpush3.xpose.msk.msra.mxu1 %vm233_vm2, %v1706_v56  ;;  %7030 = vmatprep.mubr.msk.f32.mxu1 %vm7630_vm1, %v7629_v62 }
 0x6ca   :  { %7038 = vmatprep.subr.mxu1 %v7629_v62 }
 0x6cc   :  { %7031 = vmatmul.mubr.msk.f32.vlgmr.msra.gmra.mrb[18].mxu1 %vm233_vm2, %v1704_v57 }
 0x6cd   :  { %7039 = vmatpush3.msra.mxu1 %v1904_v58  ;;  %7040 = vmatprep.mubr.msk.f32.mxu1 %vm7630_vm1, %v7629_v62 }
 0x6ce   :  { %7048 = vmatprep.subr.mxu1 %v7629_v62 }
 0x6e7   :  { %v1234_v63 = vpop.xlane.xlu1 %1233 }
 0x6e8   :  { %7459 = vrcp.f32 %v1234_v63 }
 0x6eb   :  { %v1784_v0 = vpop.permute.xlu1 %1783 }
 0x6ef   :  { %v1782_v4 = vpop.permute.xlu1 %1781 }
 0x6f2   :  { %v7460_v1 = vpop.eup %7459 }
 0x6f3   :  { %v1242_v3 = vmul.f32 %v7460_v1, %v7452_v32  ;;  %v1980_v8 = vpop.permute.xlu1 %1979 }
 0x6f5   :  { %7016 = vmatmul.mubr.msk.f32.vlgmr.msra.gmra.mrb[18].mxu0 %vm233_vm2, %v1242_v3 }
 0x6f6   :  { %7024 = vmatpush3.xpose.msk.msra.mxu0 %vm233_vm2, %v1628_v38  ;;  %7025 = vmatprep.mubr.msk.f32.mxu0 %vm7630_vm1, %v7629_v62 }
 0x6f7   :  { %7033 = vmatprep.subr.mxu0 %v7629_v62  ;;  %v2056_v48 = vpop.permute.xlu1 %2055 }
 0x6f9   :  { %7026 = vmatmul.mubr.msk.f32.vlgmr.msra.gmra.mrb[20].mxu0 %vm233_vm2, %v1626_v61 }
 0x6fa   :  { %7034 = vmatpush3.xpose.msk.msra.mxu0 %vm233_vm2, %v1784_v0  ;;  %7035 = vmatprep.mubr.msk.f32.mxu0 %vm7630_vm1, %v7629_v62 }
 0x6fb   :  { %7043 = vmatprep.subr.mxu0 %v7629_v62  ;;  %v2132_v49 = vpop.permute.xlu1 %2131 }
 0x6fd   :  { %7036 = vmatmul.mubr.msk.f32.vlgmr.msra.gmra.mrb[22].mxu0 %vm233_vm2, %v1782_v4 }
 0x6fe   :  { %7044 = vmatpush3.msra.mxu0 %v1980_v8  ;;  %7045 = vmatprep.mubr.msk.f32.mxu0 %vm7630_vm1, %v7629_v62 }
 0x6ff   :  { %7053 = vmatprep.subr.mxu0 %v7629_v62 }
 0x790   :  { %v7956_v9 = vpop.f32.mrb[12].mxu1 }
 0x791   :  { %v7002_v10 = vpop.f32.mrb[13].mxu1 }
 0x793   :  { %v7958_v11 = vpop.f32.mrb[16].mxu0 }
 0x794   :  { %v7341_v12 = vpack.i.bf16 %v7958_v11, %v7956_v9  ;;  %v7962_v13 = vpop.f32.mrb[14].mxu1  ;;  %v7007_v14 = vpop.f32.mrb[17].mxu0 }
 0x795   :  { %v7012_v15 = vpop.f32.mrb[15].mxu1 }
 0x79b   :  { %v1621_v16 = vpop.f32.mrb[16].mxu1 }
 0x79c   :  { %v1622_v17 = vadd.f32 %v1621_v16, %v7786_v26  ;;  %v7022_v18 = vpop.f32.mrb[17].mxu1 }
 0x79e   :  { %v1859_v19 = vsel %vm233_vm2, %v1622_v17, -inf }
 0x79f   :  { %1860 = vmax.xlane.f32.xlu0 %v1859_v19  ;;  %v1777_v20 = vpop.f32.mrb[18].mxu1 }
 0x7a0   :  { %v1778_v21 = vadd.f32 %v1777_v20, %v7793_v36  ;;  %v7032_v22 = vpop.f32.mrb[19].mxu1 }
 0x7a2   :  { %v1865_v23 = vsel %vm233_vm2, %v1778_v21, -inf }
 0x7a3   :  { %1866 = vmax.xlane.f32.xlu0 %v1865_v23 }
 0x7c8   :  { %v7968_v24 = vpop.f32.mrb[18].mxu0 }
 0x7c9   :  { %v7346_v25 = vpack.i.bf16 %v7968_v24, %v7962_v13  ;;  %v7017_v28 = vpop.f32.mrb[19].mxu0 }
 0x7cc   :  { %v1699_v29 = vpop.f32.mrb[20].mxu0 }
 0x7cd   :  { %v1700_v30 = vadd.f32 %v1699_v29, %v7788_v27  ;;  %v7027_v31 = vpop.f32.mrb[21].mxu0 }
 0x7cf   :  { %v1862_v32 = vsel %vm233_vm2, %v1700_v30, -inf }
 0x7d0   :  { %1863 = vmax.xlane.f32.xlu1 %v1862_v32  ;;  %v1855_v33 = vpop.f32.mrb[22].mxu0 }
 0x7d1   :  { %v1856_v34 = vadd.f32 %v1855_v33, %v7797_v42  ;;  %v7037_v35 = vpop.f32.mrb[23].mxu0 }
 0x7d3   :  { %v1868_v37 = vsel %vm233_vm2, %v1856_v34, -inf }
 0x7d4   :  { %1869 = vmax.xlane.f32.xlu0 %v1868_v37 }
 0x7e1   :  { %2287 = vrot.lane.b32.xlu1 %v7745_v5, %s7640_s27 }
 0x7e5   :  { %2285 = vrot.lane.b32.xlu1 %v7745_v5, %s7641_s28 }
 0x7ea   :  { %2209 = vrot.lane.b32.xlu0 %v7743_v2, %s7640_s27 }
 0x82c   :  { %v1861_v38 = vpop.xlane.xlu0 %1860 }
 0x82d   :  { %v1871_v39 = vsub.f32 %v1622_v17, %v1861_v38 }
 0x82f   :  { %v1875_v41 = vmul.f32 1.442695, %v1871_v39 }
 0x830   :  { %v1867_v50 = vpop.xlane.xlu0 %1866 }
 0x831   :  { %7461 = vpow2.f32 %v1875_v41  ;;  %v1873_v51 = vsub.f32 %v1778_v21, %v1867_v50 }
 0x833   :  { %v1879_v56 = vmul.f32 1.442695, %v1873_v51 }
 0x83b   :  { %v7462_v44 = vpop.eup %7461 }
 0x83c   :  { %v1883_v46 = vsel %vm233_vm2, %v7462_v44, 0.0 }
 0x83d   :  { %1884 = vadd.xlane.f32.xlu0 %v1883_v46 }
 0x853   :  { %2207 = vrot.lane.b32.xlu0 %v7743_v2, %s7641_s28 }
 0x85d   :  { %v1864_v52 = vpop.xlane.xlu1 %1863 }
 0x85e   :  { %v1872_v55 = vsub.f32 %v1700_v30, %v1864_v52 }
 0x860   :  { %v1877_v57 = vmul.f32 1.442695, %v1872_v55 }
 0x861   :  { %v1870_v1 = vpop.xlane.xlu0 %1869  ;;  %v2288_v18 = vpop.permute.xlu1 %2287 }
 0x862   :  { %7463 = vpow2.f32 %v1877_v57  ;;  %v1874_v3 = vsub.f32 %v1856_v34, %v1870_v1 }
 0x863   :  { %7465 = vpow2.f32 %v1879_v56 }
 0x864   :  { %v1881_v4 = vmul.f32 1.442695, %v1874_v3 }
 0x865   :  { %v2210_v14 = vpop.permute.xlu0 %2209  ;;  %v2286_v19 = vpop.permute.xlu1 %2285 }
 0x866   :  { %7467 = vpow2.f32 %v1881_v4 }
 0x86c   :  { %v7464_v58 = vpop.eup %7463 }
 0x86d   :  { %v1886_v61 = vsel %vm233_vm2, %v7464_v58, 0.0  ;;  %v7466_v63 = vpop.eup %7465 }
 0x86e   :  { %1887 = vadd.xlane.f32.xlu1 %v1886_v61  ;;  %v1889_v0 = vsel %vm233_vm2, %v7466_v63, 0.0 }
 0x870   :  { %v7468_v8 = vpop.eup %7467 }
 0x871   :  { %v1892_v10 = vsel %vm233_vm2, %v7468_v8, 0.0 }
 0x872   :  { %1890 = vadd.xlane.f32.xlu0 %v1889_v0 }
 0x87f   :  { %2443 = vrot.lane.b32.xlu1 %v7755_v7, %s7640_s27 }
 0x888   :  { %2365 = vrot.lane.b32.xlu0 %v7751_v6, %s7640_s27 }
 0x88c   :  { %2363 = vrot.lane.b32.xlu0 %v7751_v6, %s7641_s28 }
 0x8a3   :  { %1893 = vadd.xlane.f32.xlu1 %v1892_v10 }
 0x8b4   :  { %2441 = vrot.lane.b32.xlu1 %v7755_v7, %s7641_s28 }
 0x8ca   :  { %v1885_v15 = vpop.xlane.xlu0 %1884 }
 0x8cb   :  { %7469 = vrcp.f32 %v1885_v15 }
 0x8ce   :  { %v2208_v20 = vpop.permute.xlu0 %2207 }
 0x8d5   :  { %v7470_v16 = vpop.eup %7469 }
 0x8d6   :  { %v1899_v17 = vmul.f32 %v7470_v16, %v7462_v44 }
 0x8d8   :  { %7041 = vmatmul.mubr.msk.f32.vlgmr.msra.gmra.mrb[20].mxu1 %vm233_vm2, %v1899_v17 }
 0x8d9   :  { %7049 = vmatpush3.msra.mxu1 %v2056_v48  ;;  %7050 = vmatprep.mubr.msk.f32.mxu1 %vm7630_vm1, %v7629_v62 }
 0x8da   :  { %7058 = vmatprep.subr.mxu1 %v7629_v62 }
 0x8fb   :  { %v1888_v21 = vpop.xlane.xlu1 %1887 }
 0x8fc   :  { %7471 = vrcp.f32 %v1888_v21 }
 0x8ff   :  { %v1891_v22 = vpop.xlane.xlu0 %1890  ;;  %v2444_v33 = vpop.permute.xlu1 %2443 }
 0x900   :  { %7473 = vrcp.f32 %v1891_v22 }
 0x903   :  { %v2366_v31 = vpop.permute.xlu0 %2365 }
 0x906   :  { %v7472_v23 = vpop.eup %7471 }
 0x907   :  { %v1900_v28 = vmul.f32 %v7472_v23, %v7464_v58  ;;  %v2364_v32 = vpop.permute.xlu0 %2363 }
 0x909   :  { %7046 = vmatmul.mubr.msk.f32.vlgmr.msra.gmra.mrb[24].mxu0 %vm233_vm2, %v1900_v28 }
 0x90a   :  { %v7474_v29 = vpop.eup %7473  ;;  %7054 = vmatpush3.msra.mxu0 %v2132_v49  ;;  %7055 = vmatprep.mubr.msk.f32.mxu0 %vm7630_vm1, %v7629_v62 }
 0x90b   :  { %v1901_v30 = vmul.f32 %v7474_v29, %v7466_v63  ;;  %7063 = vmatprep.subr.mxu0 %v7629_v62 }
 0x90d   :  { %7051 = vmatmul.mubr.msk.f32.vlgmr.msra.gmra.mrb[22].mxu1 %vm233_vm2, %v1901_v30 }
 0x90e   :  { %7059 = vmatpush3.xpose.msk.msra.mxu1 %vm233_vm2, %v2210_v14  ;;  %7060 = vmatprep.mubr.msk.f32.mxu1 %vm7630_vm1, %v7629_v62 }
 0x90f   :  { %7068 = vmatprep.subr.mxu1 %v7629_v62 }
 0x911   :  { %7061 = vmatmul.mubr.msk.f32.vlgmr.msra.gmra.mrb[24].mxu1 %vm233_vm2, %v2208_v20 }
 0x912   :  { %7069 = vmatpush3.xpose.msk.msra.mxu1 %vm233_vm2, %v2366_v31  ;;  %7070 = vmatprep.mubr.msk.f32.mxu1 %vm7630_vm1, %v7629_v62 }
 0x913   :  { %7078 = vmatprep.subr.mxu1 %v7629_v62 }
 0x915   :  { %7071 = vmatmul.mubr.msk.f32.vlgmr.msra.gmra.mrb[26].mxu1 %vm233_vm2, %v2364_v32 }
 0x916   :  { %7080 = vmatprep.mubr.msk.f32.mxu1 %vm7630_vm1, %v7629_v62 }
 0x930   :  { %v1894_v34 = vpop.xlane.xlu1 %1893 }
 0x931   :  { %7475 = vrcp.f32 %v1894_v34 }
 0x934   :  { %v2442_v38 = vpop.permute.xlu1 %2441 }
 0x93b   :  { %v7476_v35 = vpop.eup %7475 }
 0x93c   :  { %v1902_v37 = vmul.f32 %v7476_v35, %v7468_v8 }
 0x93e   :  { %7056 = vmatmul.mubr.msk.f32.vlgmr.msra.gmra.mrb[26].mxu0 %vm233_vm2, %v1902_v37 }
 0x93f   :  { %7064 = vmatpush3.xpose.msk.msra.mxu0 %vm233_vm2, %v2288_v18  ;;  %7065 = vmatprep.mubr.msk.f32.mxu0 %vm7630_vm1, %v7629_v62 }
 0x940   :  { %7073 = vmatprep.subr.mxu0 %v7629_v62 }
 0x942   :  { %7066 = vmatmul.mubr.msk.f32.vlgmr.msra.gmra.mrb[28].mxu0 %vm233_vm2, %v2286_v19 }
 0x943   :  { %7074 = vmatpush3.xpose.msk.msra.mxu0 %vm233_vm2, %v2444_v33  ;;  %7075 = vmatprep.mubr.msk.f32.mxu0 %vm7630_vm1, %v7629_v62 }
 0x944   :  { %7083 = vmatprep.subr.mxu0 %v7629_v62 }
 0x946   :  { %7076 = vmatmul.mubr.msk.f32.vlgmr.msra.gmra.mrb[30].mxu0 %vm233_vm2, %v2442_v38 }
 0x947   :  { %7085 = vmatprep.mubr.msk.f32.mxu0 %vm7630_vm1, %v7629_v62 }
 0x9ab   :  { %v1975_v39 = vpop.f32.mrb[20].mxu1 }
 0x9ac   :  { %v7042_v41 = vpop.f32.mrb[21].mxu1 }
 0x9dc   :  { %v2051_v44 = vpop.f32.mrb[24].mxu0 }
 0x9dd   :  { %v7351_v46 = vpack.i.bf16 %v2051_v44, %v1975_v39  ;;  %v7047_v48 = vpop.f32.mrb[25].mxu0 }
 0x9e0   :  { %v8030_v49 = vpop.f32.mrb[22].mxu1 }
 0x9e1   :  { %v7052_v50 = vpop.f32.mrb[23].mxu1 }
 0x9e4   :  { %v2281_v51 = vpop.f32.mrb[24].mxu1 }
 0x9e5   :  { %v2282_v52 = vadd.f32 %v2281_v51, %v7786_v26  ;;  %v7062_v55 = vpop.f32.mrb[25].mxu1 }
 0x9e7   :  { %v2519_v56 = vsel %vm233_vm2, %v2282_v52, -inf }
 0x9e8   :  { %2520 = vmax.xlane.f32.xlu0 %v2519_v56  ;;  %v2437_v57 = vpop.f32.mrb[26].mxu1 }
 0x9e9   :  { %v2438_v58 = vadd.f32 %v2437_v57, %v7793_v36  ;;  %v7072_v61 = vpop.f32.mrb[27].mxu1 }
 0x9ea   :  { %v7403_v61 = vld [vmem:[%s8649_s4] sm:$0xff]  }
 0x9eb   :  { %v2525_v63 = vsel %vm233_vm2, %v2438_v58, -inf }
 0x9ec   :  { %2526 = vmax.xlane.f32.xlu0 %v2525_v63 }
 0xa11   :  { %v2203_v0 = vpop.f32.mrb[26].mxu0 }
 0xa12   :  { %v7356_v1 = vpack.i.bf16 %v2203_v0, %v8030_v49  ;;  %v7057_v3 = vpop.f32.mrb[27].mxu0 }
 0xa15   :  { %v2359_v4 = vpop.f32.mrb[28].mxu0 }
 0xa16   :  { %v2360_v8 = vadd.f32 %v2359_v4, %v7788_v27  ;;  %v7067_v10 = vpop.f32.mrb[29].mxu0 }
 0xa18   :  { %v2522_v14 = vsel %vm233_vm2, %v2360_v8, -inf }
 0xa19   :  { %2523 = vmax.xlane.f32.xlu1 %v2522_v14  ;;  %v2515_v15 = vpop.f32.mrb[30].mxu0 }
 0xa1a   :  { %v2516_v16 = vadd.f32 %v2515_v15, %v7797_v42  ;;  %v7077_v17 = vpop.f32.mrb[31].mxu0 }
 0xa1c   :  { %v2528_v18 = vsel %vm233_vm2, %v2516_v16, -inf }
 0xa1d   :  { %2529 = vmax.xlane.f32.xlu0 %v2528_v18 }
 0xa75   :  { %v2521_v19 = vpop.xlane.xlu0 %2520 }
 0xa76   :  { %v2531_v20 = vsub.f32 %v2282_v52, %v2521_v19 }
 0xa78   :  { %v2535_v21 = vmul.f32 1.442695, %v2531_v20 }
 0xa79   :  { %v2527_v22 = vpop.xlane.xlu0 %2526 }
 0xa7a   :  { %7477 = vpow2.f32 %v2535_v21  ;;  %v2533_v23 = vsub.f32 %v2438_v58, %v2527_v22 }
 0xa7c   :  { %v2539_v28 = vmul.f32 1.442695, %v2533_v23 }
 0xa7e   :  { %7479 = vpow2.f32 %v2539_v28 }
 0xa84   :  { %v7478_v29 = vpop.eup %7477 }
 0xa85   :  { %v2543_v30 = vsel %vm233_vm2, %v7478_v29, 0.0 }
 0xa86   :  { %2544 = vadd.xlane.f32.xlu0 %v2543_v30 }
 0xa88   :  { %v7480_v31 = vpop.eup %7479 }
 0xa89   :  { %v2549_v32 = vsel %vm233_vm2, %v7480_v31, 0.0 }
 0xa8a   :  { %2550 = vadd.xlane.f32.xlu0 %v2549_v32 }
 0xaa0   :  { %2563 = vrot.lane.b32.xlu0 %v7743_v2, %s7642_s29 }
 0xaa4   :  { %7342 = vrot.lane.b32.xlu0 %v7341_v12, %s7643_s30 }
 0xaa6   :  { %v2524_v33 = vpop.xlane.xlu1 %2523 }
 0xaa7   :  { %v2532_v34 = vsub.f32 %v2360_v8, %v2524_v33  ;;  %v7404_v8 = vld [vmem:[%s8649_s4 + $0x8] sm:$0xff]  }
 0xaa8   :  { %7352 = vrot.lane.b32.xlu0 %v7351_v46, %s7644_s8 }
 0xaa9   :  { %v2537_v35 = vmul.f32 1.442695, %v2532_v34 }
 0xaaa   :  { %v2530_v2 = vpop.xlane.xlu0 %2529 }
 0xaab   :  { %7481 = vpow2.f32 %v2537_v35  ;;  %v2534_v9 = vsub.f32 %v2516_v16, %v2530_v2 }
 0xaad   :  { %v2541_v11 = vmul.f32 1.442695, %v2534_v9 }
 0xaaf   :  { %7483 = vpow2.f32 %v2541_v11 }
 0xab5   :  { %v7482_v37 = vpop.eup %7481 }
 0xab6   :  { %v2546_v38 = vsel %vm233_vm2, %v7482_v37, 0.0 }
 0xab7   :  { %2547 = vadd.xlane.f32.xlu1 %v2546_v38 }
 0xab9   :  { %v7484_v12 = vpop.eup %7483 }
 0xaba   :  { %v2552_v39 = vsel %vm233_vm2, %v7484_v12, 0.0 }
 0xac8   :  { %2639 = vrot.lane.b32.xlu1 %v7745_v5, %s7642_s29 }
 0xacc   :  { %2715 = vrot.lane.b32.xlu1 %v7751_v6, %s7642_s29 }
 0xaf0   :  { %2553 = vadd.xlane.f32.xlu1 %v2552_v39 }
 0xb01   :  { %2791 = vrot.lane.b32.xlu1 %v7755_v7, %s7642_s29 }
 0xb05   :  { %7347 = vrot.lane.b32.xlu1 %v7346_v25, %s7643_s30 }
 0xb09   :  { %7357 = vrot.lane.b32.xlu1 %v7356_v1, %s7644_s8 }
 0xb13   :  { %v2545_v5 = vpop.xlane.xlu0 %2544 }
 0xb14   :  { %7485 = vrcp.f32 %v2545_v5 }
 0xb17   :  { %v2551_v6 = vpop.xlane.xlu0 %2550 }
 0xb18   :  { %7487 = vrcp.f32 %v2551_v6 }
 0xb1b   :  { %v2564_v41 = vpop.permute.xlu0 %2563 }
 0xb1c   :  { %7079 = vmatpush3.msra.mxu1 %v2564_v41 }
 0xb1d   :  { %7088 = vmatprep.subr.mxu1 %v7629_v62 }
 0xb1e   :  { %v7486_v44 = vpop.eup %7485 }
 0xb1f   :  { %v2559_v46 = vmul.f32 %v7486_v44, %v7478_v29  ;;  %v7343_v16 = vpop.permute.xlu0 %7342 }
 0xb20   :  { %v7345_v18 = vunpack.i.h.bf16 %v7343_v16  ;;  %v7344_v19 = vunpack.i.l.bf16 %v7343_v16 }
 0xb21   :  { %7081 = vmatmul.mubr.msk.f32.vlgmr.msra.gmra.mrb[28].mxu1 %vm233_vm2, %v2559_v46 }
 0xb22   :  { %7090 = vmatprep.mubr.msk.f32.mxu1 %vm7630_vm1, %v7629_v62  ;;  %v7488_v24 = vpop.eup %7487  ;;  %v2916_v23 = vsel %vm233_vm2, %v7868_v43, %v7345_v18  ;;  %v2915_v28 = vsel %vm233_vm2, %v7866_v40, %v7344_v19 }
 0xb23   :  { %v2561_v48 = vmul.f32 %v7488_v24, %v7480_v31  ;;  %v7353_v17 = vpop.permute.xlu0 %7352 }
 0xb24   :  { %v7355_v20 = vunpack.i.h.bf16 %v7353_v17  ;;  %v7354_v21 = vunpack.i.l.bf16 %v7353_v17 }
 0xb26   :  { %v2920_v31 = vsel %vm2919_vm3, %v2915_v28, %v7354_v21  ;;  %v2921_v32 = vsel %vm2919_vm3, %v2916_v23, %v7355_v20 }
 0xb44   :  { %v2548_v7 = vpop.xlane.xlu1 %2547 }
 0xb45   :  { %7489 = vrcp.f32 %v2548_v7 }
 0xb48   :  { %v2640_v13 = vpop.permute.xlu1 %2639 }
 0xb49   :  { %7084 = vmatpush3.msra.mxu0 %v2640_v13 }
 0xb4a   :  { %7093 = vmatprep.subr.mxu0 %v7629_v62 }
 0xb4c   :  { %v2716_v25 = vpop.permute.xlu1 %2715 }
 0xb4d   :  { %7089 = vmatpush3.msra.mxu1 %v2716_v25 }
 0xb4e   :  { %7091 = vmatmul.mubr.msk.f32.vlgmr.msra.gmra.mrb[30].mxu1 %vm233_vm2, %v2561_v48  ;;  %7098 = vmatprep.subr.bf16.mxu1 %v7403_v61 }
 0xb4f   :  { %v7490_v49 = vpop.eup %7489  ;;  %7099 = vmatpush3.bf16.msra.mxu1 %v7403_v61 }
 0xb50   :  { %v2560_v50 = vmul.f32 %v7490_v49, %v7482_v37  ;;  %7100 = vmatprep.subr.bf16.mxu1 %v7404_v8 }
 0xb52   :  { %7086 = vmatmul.mubr.msk.f32.vlgmr.msra.gmra.mrb[32].mxu0 %vm233_vm2, %v2560_v50 }
 0xb53   :  { %7095 = vmatprep.mubr.msk.f32.mxu0 %vm7630_vm1, %v7629_v62  ;;  %7101 = vmatpush3.bf16.msra.mxu1 %v7404_v8 }
 0xb7d   :  { %v2554_v51 = vpop.xlane.xlu1 %2553 }
 0xb7e   :  { %7491 = vrcp.f32 %v2554_v51 }
 0xb81   :  { %v2792_v52 = vpop.permute.xlu1 %2791 }
 0xb82   :  { %7094 = vmatpush3.msra.mxu0 %v2792_v52 }
 0xb85   :  { %v7348_v37 = vpop.permute.xlu1 %7347 }
 0xb86   :  { %v7350_v2 = vunpack.i.h.bf16 %v7348_v37  ;;  %v7349_v43 = vunpack.i.l.bf16 %v7348_v37 }
 0xb88   :  { %v7492_v55 = vpop.eup %7491  ;;  %v2917_v39 = vsel %vm233_vm2, %v7870_v45, %v7349_v43 }
 0xb89   :  { %v2562_v56 = vmul.f32 %v7492_v55, %v7484_v12  ;;  %v7358_v38 = vpop.permute.xlu1 %7357  ;;  %v2918_v12 = vsel %vm233_vm2, %v7872_v47, %v7350_v2  ;;  %v6651_v47 = vld [vmem:[%s8647_s2 + $0x3] ss:$0 sm:$0xff] }
 0xb8a   :  { %v7360_v9 = vunpack.i.h.bf16 %v7358_v38  ;;  %v7359_v11 = vunpack.i.l.bf16 %v7358_v38 }
 0xb8b   :  { %7096 = vmatmul.mubr.msk.f32.vlgmr.msra.gmra.mrb[34].mxu0 %vm233_vm2, %v2562_v56 }
 0xb8c   :  { %v2922_v41 = vsel %vm2919_vm3, %v2917_v39, %v7359_v11  ;;  %v2923_v44 = vsel %vm2919_vm3, %v2918_v12, %v7360_v9 }
 0xbf4   :  { %v2635_v57 = vpop.f32.mrb[28].mxu1 }
 0xbf5   :  { %v7082_v58 = vpop.f32.mrb[29].mxu1 }
 0xc21   :  { %v2787_v63 = vpop.f32.mrb[30].mxu1 }
 0xc22   :  { %v7092_v0 = vpop.f32.mrb[31].mxu1 }
 0xc25   :  { %v2711_v1 = vpop.f32.mrb[32].mxu0 }
 0xc26   :  { %v7361_v3 = vpack.i.bf16 %v2711_v1, %v2635_v57  ;;  %v7087_v4 = vpop.f32.mrb[33].mxu0 }
 0xc28   :  { %7362 = vrot.lane.b32.xlu0 %v7361_v3, %s7645_s10 }
 0xc5e   :  { %v2863_v10 = vpop.f32.mrb[34].mxu0 }
 0xc5f   :  { %v7366_v14 = vpack.i.bf16 %v2863_v10, %v2787_v63  ;;  %v7097_v15 = vpop.f32.mrb[35].mxu0 }
 0xc61   :  { %7367 = vrot.lane.b32.xlu1 %v7366_v14, %s7645_s10 }
 0xc9a   :  { %v7363_v22 = vpop.permute.xlu0 %7362 }
 0xc9b   :  { %v7365_v29 = vunpack.i.h.bf16 %v7363_v22  ;;  %v7364_v30 = vunpack.i.l.bf16 %v7363_v22 }
 0xc9d   :  { %v2926_v33 = vsel %vm2924_vm4, %v2921_v32, %v7365_v29  ;;  %v2925_v34 = vsel %vm2924_vm4, %v2920_v31, %v7364_v30  ;;  %v7405_v30 = vld [vmem:[%s8650_s5] sm:$0xff]   ;;  %v7406_v31 = vld [vmem:[%s8650_s5 + $0x8] sm:$0xff]  }
 0xc9e   :  { %v2929_v35 = vpack.c.bf16 %v2926_v33, %v2925_v34  ;;  %7106 = vmatprep.subr.bf16.mxu0 %v7405_v30 }
 0xc9f   :  { %7107 = vmatpush3.bf16.msra.mxu0 %v7405_v30 }
 0xca0   :  { %7102 = vmatprep.mubr.msk.bf16.mxu1 %vm34_vm0, %v2929_v35  ;;  %7108 = vmatprep.subr.bf16.mxu0 %v7406_v31 }
 0xca3   :  { %7109 = vmatpush3.bf16.msra.mxu0 %v7406_v31 }
 0xcd3   :  { %v7368_v40 = vpop.permute.xlu1 %7367 }
 0xcd4   :  { %v7370_v5 = vunpack.i.h.bf16 %v7368_v40  ;;  %v7369_v6 = vunpack.i.l.bf16 %v7368_v40 }
 0xcd6   :  { %v2928_v46 = vsel %vm2924_vm4, %v2923_v44, %v7370_v5  ;;  %v2927_v7 = vsel %vm2924_vm4, %v2922_v41, %v7369_v6  ;;  %v6656_v5 = vld [vmem:[%s8647_s2 + $0x4] ss:$0 sm:$0xff] }
 0xcd7   :  { %v2930_v13 = vpack.c.bf16 %v2928_v46, %v2927_v7 }
 0xcd9   :  { %7103 = vmatmul.mubr.msk.bf16.vlgmr.msra.gmra.mrb[32].mxu1 %vm34_vm0, %v2930_v13  ;;  %v6657_v13 = vld [vmem:[%s8647_s2 + $0x5] ss:$0 sm:$0xff] }
 0xdac   :  { %v7104_v24 = vpop.f32.mrb[32].mxu1 }
 0xdad   :  { %v2992_v25 = vpop.f32.mrb[33].mxu1  ;;  %v3001_v45 = vadd.f32 %v7104_v24, %v6651_v47 }
 0xdae   :  { %v2993_v48 = vadd.f32 %v6651_v47, %v2992_v25  ;;  %v7105_v49 = vpop.f32.mrb[34].mxu1 }
 0xdaf   :  { %v2995_v50 = vpop.f32.mrb[35].mxu1  ;;  %v3004_v55 = vadd.f32 %v7105_v49, %v6651_v47  ;;  %v3009_v58 = vadd.f32 %v3001_v45, %v7727_v59 }
 0xdb0   :  { %v2996_v51 = vadd.f32 %v6651_v47, %v2995_v50  ;;  %v3007_v52 = vadd.f32 %v2993_v48, %v7720_v53 }
 0xdb1   :  { %v3019_v63 = vsel %vm34_vm0, %v3009_v58, 0.0  ;;  %v3010_v0 = vadd.f32 %v3004_v55, %v7729_v60 }
 0xdb2   :  { %v3013_v56 = vsel %vm34_vm0, %v3007_v52, 0.0  ;;  %v3008_v57 = vadd.f32 %v2996_v51, %v7722_v54 }
 0xdb3   :  { %3014 = vadd.xlane.f32.xlu0 %v3013_v56  ;;  %v3022_v1 = vsel %vm34_vm0, %v3010_v0, 0.0 }
 0xdb4   :  { %v3016_v61 = vsel %vm34_vm0, %v3008_v57, 0.0 }
 0xdb5   :  { %3017 = vadd.xlane.f32.xlu1 %v3016_v61  ;;  %v7408_v61 = vld [vmem:[%s8651_s6 + $0x8] sm:$0xff]  }
 0xdb7   :  { %3020 = vadd.xlane.f32.xlu0 %v3019_v63  ;;  %v7409_v63 = vld [vmem:[%s8651_s6 + $0x10] sm:$0xff]  }
 0xdbb   :  { %3023 = vadd.xlane.f32.xlu0 %v3022_v1  ;;  %v6658_v1 = vld [vmem:[%s8647_s2 + $0x6] ss:$0 sm:$0xff] }
 0xe40   :  { %v3015_v53 = vpop.xlane.xlu0 %3014 }
 0xe41   :  { %v3025_v3 = vmul.f32 0.03125, %v3015_v53 }
 0xe42   :  { %v3018_v4 = vpop.xlane.xlu1 %3017 }
 0xe43   :  { %v3029_v8 = vsub.f32 %v3007_v52, %v3025_v3  ;;  %v3026_v10 = vmul.f32 0.03125, %v3018_v4 }
 0xe44   :  { %v3021_v54 = vpop.xlane.xlu0 %3020 }
 0xe45   :  { %v3030_v14 = vsub.f32 %v3008_v57, %v3026_v10  ;;  %v3027_v59 = vmul.f32 0.03125, %v3021_v54  ;;  %v3033_v15 = vmul.f32 %v3029_v8, %v3029_v8 }
 0xe47   :  { %v3031_v16 = vsub.f32 %v3009_v58, %v3027_v59  ;;  %v3037_v17 = vsel %vm34_vm0, %v3033_v15, 0.0  ;;  %v3034_v18 = vmul.f32 %v3030_v14, %v3030_v14  ;;  %v7407_v58 = vld [vmem:[%s8651_s6] sm:$0xff]  }
 0xe48   :  { %3038 = vadd.xlane.f32.xlu0 %v3037_v17  ;;  %v3024_v19 = vpop.xlane.xlu0 %3023  ;;  %7114 = vmatprep.subr.bf16.mxu1 %v7407_v58 }
 0xe49   :  { %v3028_v60 = vmul.f32 0.03125, %v3024_v19  ;;  %v3040_v20 = vsel %vm34_vm0, %v3034_v18, 0.0  ;;  %v3035_v21 = vmul.f32 %v3031_v16, %v3031_v16  ;;  %7115 = vmatpush3.bf16.msra.mxu1 %v7407_v58 }
 0xe4a   :  { %3041 = vadd.xlane.f32.xlu1 %v3040_v20  ;;  %7116 = vmatprep.subr.bf16.mxu1 %v7408_v61 }
 0xe4b   :  { %v3032_v22 = vsub.f32 %v3010_v0, %v3028_v60  ;;  %v3043_v23 = vsel %vm34_vm0, %v3035_v21, 0.0  ;;  %v7410_v0 = vld [vmem:[%s8651_s6 + $0x18] sm:$0xff]  }
 0xe4c   :  { %3044 = vadd.xlane.f32.xlu0 %v3043_v23 }
 0xe4d   :  { %v3036_v28 = vmul.f32 %v3032_v22, %v3032_v22  ;;  %7117 = vmatpush3.bf16.msra.mxu1 %v7408_v61 }
 0xe4e   :  { %7118 = vmatprep.subr.bf16.mxu1 %v7409_v63 }
 0xe4f   :  { %v3046_v29 = vsel %vm34_vm0, %v3036_v28, 0.0 }
 0xe50   :  { %3047 = vadd.xlane.f32.xlu1 %v3046_v29 }
 0xe51   :  { %7119 = vmatpush3.bf16.msra.mxu1 %v7409_v63 }
 0xe52   :  { %7120 = vmatprep.subr.bf16.mxu1 %v7410_v0 }
 0xe55   :  { %7121 = vmatpush3.bf16.msra.mxu1 %v7410_v0 }
 0xe56   :  { %7144 = vmatprep.subr.mxu1 %v7629_v62 }
 0xed5   :  { %v3039_v32 = vpop.xlane.xlu0 %3038 }
 0xed6   :  { %v3049_v33 = vmul.f32 0.03125, %v3039_v32 }
 0xed7   :  { %v3042_v34 = vpop.xlane.xlu1 %3041 }
 0xed8   :  { %v3053_v35 = vadd.f32 1e-12, %v3049_v33  ;;  %v3050_v37 = vmul.f32 0.03125, %v3042_v34 }
 0xed9   :  { %v3045_v38 = vpop.xlane.xlu0 %3044 }
 0xeda   :  { %7493 = vrsqrt.f32 %v3053_v35  ;;  %v3054_v2 = vadd.f32 1e-12, %v3050_v37  ;;  %v3051_v43 = vmul.f32 0.03125, %v3045_v38 }
 0xedc   :  { %7495 = vrsqrt.f32 %v3054_v2  ;;  %v3055_v9 = vadd.f32 1e-12, %v3051_v43 }
 0xedd   :  { %v3048_v11 = vpop.xlane.xlu1 %3047 }
 0xede   :  { %7497 = vrsqrt.f32 %v3055_v9  ;;  %v3052_v40 = vmul.f32 0.03125, %v3048_v11 }
 0xee0   :  { %v3056_v12 = vadd.f32 1e-12, %v3052_v40 }
 0xee2   :  { %7499 = vrsqrt.f32 %v3056_v12 }
 0xee4   :  { %v7494_v39 = vpop.eup %7493 }
 0xee5   :  { %v3061_v6 = vmul.f32 %v7494_v39, %v3029_v8 }
 0xee6   :  { %v7496_v41 = vpop.eup %7495 }
 0xee7   :  { %v3062_v44 = vmul.f32 %v7496_v41, %v3030_v14  ;;  %v3069_v46 = vmul.f32 %v6656_v5, %v3061_v6 }
 0xee8   :  { %v7498_v7 = vpop.eup %7497 }
 0xee9   :  { %v3063_v47 = vmul.f32 %v7498_v7, %v3031_v16  ;;  %v3070_v24 = vmul.f32 %v6656_v5, %v3062_v44  ;;  %v8126_v25 = vadd.f32 %v6657_v13, %v3069_v46 }
 0xeeb   :  { %v8128_v45 = vadd.f32 %v6657_v13, %v3070_v24  ;;  %v3071_v51 = vmul.f32 %v6656_v5, %v3063_v47 }
 0xeec   :  { %v7500_v48 = vpop.eup %7499 }
 0xeed   :  { %v3064_v49 = vmul.f32 %v7500_v48, %v3032_v22  ;;  %v3081_v50 = vpack.c.bf16 %v8128_v45, %v8126_v25  ;;  %v8133_v55 = vadd.f32 %v6657_v13, %v3071_v51 }
 0xeef   :  { %7110 = vmatprep.mubr.msk.bf16.mxu0 %vm34_vm0, %v3081_v50  ;;  %v3072_v52 = vmul.f32 %v6656_v5, %v3064_v49  ;;  %v6663_v50 = vld [vmem:[%s8647_s2 + $0x7] ss:$0 sm:$0xff] }
 0xef1   :  { %v8135_v56 = vadd.f32 %v6657_v13, %v3072_v52 }
 0xef3   :  { %v3082_v57 = vpack.c.bf16 %v8135_v56, %v8133_v55 }
 0xef5   :  { %7111 = vmatmul.mubr.msk.bf16.vlgmr.msra.gmra.mrb[36].mxu0 %vm34_vm0, %v3082_v57 }
 0xfc8   :  { %v7112_v53 = vpop.f32.mrb[36].mxu0 }
 0xfc9   :  { %v3153_v3 = vadd.f32 %v7112_v53, %v6658_v1  ;;  %v3144_v4 = vpop.f32.mrb[37].mxu0 }
 0xfca   :  { %v3145_v8 = vadd.f32 %v6658_v1, %v3144_v4  ;;  %v7113_v10 = vpop.f32.mrb[38].mxu0 }
 0xfcb   :  { %v3161_v54 = vmul.f32 %v3153_v3, %v3153_v3  ;;  %v3156_v14 = vadd.f32 %v7113_v10, %v6658_v1  ;;  %v3147_v59 = vpop.f32.mrb[39].mxu0 }
 0xfcc   :  { %v3159_v15 = vmul.f32 %v3145_v8, %v3145_v8  ;;  %v3148_v16 = vadd.f32 %v6658_v1, %v3147_v59 }
 0xfcd   :  { %v3165_v17 = vmul.f32 %v3161_v54, %v3153_v3  ;;  %v3162_v18 = vmul.f32 %v3156_v14, %v3156_v14 }
 0xfce   :  { %v3163_v19 = vmul.f32 %v3159_v15, %v3145_v8  ;;  %v3160_v60 = vmul.f32 %v3148_v16, %v3148_v16 }
 0xfcf   :  { %v3169_v20 = vmul.f32 0.044715, %v3165_v17  ;;  %v3166_v21 = vmul.f32 %v3162_v18, %v3156_v14 }
 0xfd0   :  { %v3167_v22 = vmul.f32 0.044715, %v3163_v19  ;;  %v3164_v23 = vmul.f32 %v3160_v60, %v3148_v16 }
 0xfd1   :  { %v3173_v28 = vadd.f32 %v3169_v20, %v3153_v3  ;;  %v3170_v29 = vmul.f32 0.044715, %v3166_v21 }
 0xfd2   :  { %v3171_v30 = vadd.f32 %v3167_v22, %v3145_v8  ;;  %v3168_v31 = vmul.f32 0.044715, %v3164_v23 }
 0xfd3   :  { %v3177_v32 = vmul.f32 0.7978846, %v3173_v28  ;;  %v3174_v33 = vadd.f32 %v3170_v29, %v3156_v14 }
 0xfd4   :  { %v3175_v34 = vmul.f32 0.7978846, %v3171_v30  ;;  %v3172_v35 = vadd.f32 %v3168_v31, %v3148_v16 }
 0xfd5   :  { %7501 = vtanh.f32 %v3177_v32  ;;  %v3178_v37 = vmul.f32 0.7978846, %v3174_v33 }
 0xfd6   :  { %7503 = vtanh.f32 %v3175_v34  ;;  %v3176_v38 = vmul.f32 0.7978846, %v3172_v35  ;;  %v7411_v34 = vld [vmem:[%s8648_s3 + $0x10] sm:$0xff]   ;;  %v7412_v35 = vld [vmem:[%s8648_s3 + $0x18] sm:$0xff]  }
 0xfd7   :  { %7505 = vtanh.f32 %v3178_v37  ;;  %7126 = vmatprep.subr.bf16.mxu0 %v7411_v34 }
 0xfd8   :  { %7507 = vtanh.f32 %v3176_v38  ;;  %7127 = vmatpush3.bf16.msra.mxu0 %v7411_v34 }
 0xfd9   :  { %7128 = vmatprep.subr.bf16.mxu0 %v7412_v35 }
 0xfdc   :  { %7129 = vmatpush3.bf16.msra.mxu0 %v7412_v35 }
 0xfdd   :  { %7134 = vmatprep.subr.mxu0 %v7629_v62 }
 0xfdf   :  { %v7502_v2 = vpop.eup %7501 }
 0xfe0   :  { %v7504_v43 = vpop.eup %7503  ;;  %v3185_v9 = vadd.f32 1.0, %v7502_v2 }
 0xfe1   :  { %v7506_v11 = vpop.eup %7505  ;;  %v3183_v40 = vadd.f32 1.0, %v7504_v43 }
 0xfe2   :  { %v7508_v12 = vpop.eup %7507  ;;  %v3189_v39 = vmul.f32 0.5, %v3185_v9  ;;  %v3186_v5 = vadd.f32 1.0, %v7506_v11 }
 0xfe3   :  { %v3187_v6 = vmul.f32 0.5, %v3183_v40  ;;  %v3184_v41 = vadd.f32 1.0, %v7508_v12 }
 0xfe4   :  { %v3190_v44 = vmul.f32 0.5, %v3186_v5  ;;  %v3193_v7 = vmul.f32 %v3189_v39, %v3153_v3 }
 0xfe5   :  { %v3188_v46 = vmul.f32 0.5, %v3184_v41  ;;  %v3191_v47 = vmul.f32 %v3187_v6, %v3145_v8 }
 0xfe6   :  { %v3194_v13 = vmul.f32 %v3190_v44, %v3156_v14 }
 0xfe7   :  { %v3192_v24 = vmul.f32 %v3188_v46, %v3148_v16  ;;  %v6670_v46 = vld [vmem:[%s8647_s2 + $0x8] ss:$0 sm:$0xff] }
 0xfe8   :  { %v3196_v48 = vpack.c.bf16 %v3194_v13, %v3193_v7 }
 0xfe9   :  { %v3195_v49 = vpack.c.bf16 %v3192_v24, %v3191_v47 }
 0xfeb   :  { %7122 = vmatprep.mubr.msk.bf16.mxu1 %vm3234_vm5, %v3195_v49  ;;  %v6671_v49 = vld [vmem:[%s8647_s2 + $0x9] ss:$0 sm:$0xff] }
 0xfec   :  { %7123 = vmatmul.mubr.msk.bf16.vlgmr.msra.gmra.mrb[36].mxu1 %vm3234_vm5, %v3196_v48 }
 0xfed   :  { %7146 = vmatprep.mubr.msk.f32.mxu1 %vm7630_vm1, %v7629_v62 }
0x10bf   :  { %v7124_v51 = vpop.f32.mrb[36].mxu1 }
0x10c0   :  { %v3275_v52 = vpop.f32.mrb[37].mxu1  ;;  %v3284_v57 = vadd.f32 %v7124_v51, %v6663_v50 }
0x10c1   :  { %v3276_v58 = vadd.f32 %v6663_v50, %v3275_v52  ;;  %v7125_v61 = vpop.f32.mrb[38].mxu1 }
0x10c2   :  { %v3278_v63 = vpop.f32.mrb[39].mxu1  ;;  %v3287_v1 = vadd.f32 %v7125_v61, %v6663_v50  ;;  %v3292_v3 = vadd.f32 %v3284_v57, %v8133_v55 }
0x10c3   :  { %v3290_v0 = vadd.f32 %v3276_v58, %v8126_v25  ;;  %v3279_v53 = vadd.f32 %v6663_v50, %v3278_v63 }
0x10c4   :  { %v3293_v10 = vadd.f32 %v3287_v1, %v8135_v56  ;;  %v3302_v14 = vsel %vm34_vm0, %v3292_v3, 0.0 }
0x10c5   :  { %v3291_v4 = vadd.f32 %v3279_v53, %v8128_v45  ;;  %v3296_v8 = vsel %vm34_vm0, %v3290_v0, 0.0 }
0x10c6   :  { %3297 = vadd.xlane.f32.xlu0 %v3296_v8  ;;  %v3305_v59 = vsel %vm34_vm0, %v3293_v10, 0.0  ;;  %v6676_v8 = vld [vmem:[%s8647_s2 + $0xa] ss:$0 sm:$0xff] }
0x10c7   :  { %v3299_v54 = vsel %vm34_vm0, %v3291_v4, 0.0 }
0x10c8   :  { %3300 = vadd.xlane.f32.xlu1 %v3299_v54 }
0x10ca   :  { %3303 = vadd.xlane.f32.xlu0 %v3302_v14 }
0x10cc   :  { %3306 = vadd.xlane.f32.xlu1 %v3305_v59 }
0x1153   :  { %v3298_v25 = vpop.xlane.xlu0 %3297 }
0x1154   :  { %v3308_v15 = vmul.f32 0.03125, %v3298_v25 }
0x1155   :  { %v3301_v16 = vpop.xlane.xlu1 %3300 }
0x1156   :  { %v3312_v55 = vsub.f32 %v3290_v0, %v3308_v15  ;;  %v3309_v17 = vmul.f32 0.03125, %v3301_v16 }
0x1157   :  { %v3304_v45 = vpop.xlane.xlu0 %3303 }
0x1158   :  { %v3313_v18 = vsub.f32 %v3291_v4, %v3309_v17  ;;  %v3310_v19 = vmul.f32 0.03125, %v3304_v45  ;;  %v3316_v60 = vmul.f32 %v3312_v55, %v3312_v55 }
0x1159   :  { %v3307_v20 = vpop.xlane.xlu1 %3306 }
0x115a   :  { %v3314_v56 = vsub.f32 %v3292_v3, %v3310_v19  ;;  %v3311_v21 = vmul.f32 0.03125, %v3307_v20  ;;  %v3320_v22 = vsel %vm34_vm0, %v3316_v60, 0.0  ;;  %v3317_v23 = vmul.f32 %v3313_v18, %v3313_v18 }
0x115b   :  { %3321 = vadd.xlane.f32.xlu0 %v3320_v22 }
0x115c   :  { %v3315_v28 = vsub.f32 %v3293_v10, %v3311_v21  ;;  %v3323_v29 = vsel %vm34_vm0, %v3317_v23, 0.0  ;;  %v3318_v30 = vmul.f32 %v3314_v56, %v3314_v56 }
0x115d   :  { %3324 = vadd.xlane.f32.xlu1 %v3323_v29 }
0x115e   :  { %v3326_v31 = vsel %vm34_vm0, %v3318_v30, 0.0  ;;  %v3319_v32 = vmul.f32 %v3315_v28, %v3315_v28 }
0x115f   :  { %3327 = vadd.xlane.f32.xlu0 %v3326_v31 }
0x1160   :  { %v3329_v33 = vsel %vm34_vm0, %v3319_v32, 0.0 }
0x1161   :  { %3330 = vadd.xlane.f32.xlu1 %v3329_v33 }
0x11e8   :  { %v3322_v37 = vpop.xlane.xlu0 %3321 }
0x11e9   :  { %v3332_v38 = vmul.f32 0.03125, %v3322_v37 }
0x11ea   :  { %v3325_v2 = vpop.xlane.xlu1 %3324 }
0x11eb   :  { %v3336_v43 = vadd.f32 1e-12, %v3332_v38  ;;  %v3333_v9 = vmul.f32 0.03125, %v3325_v2 }
0x11ec   :  { %v3328_v11 = vpop.xlane.xlu0 %3327 }
0x11ed   :  { %7509 = vrsqrt.f32 %v3336_v43  ;;  %v3337_v40 = vadd.f32 1e-12, %v3333_v9  ;;  %v3334_v12 = vmul.f32 0.03125, %v3328_v11 }
0x11ee   :  { %v3331_v39 = vpop.xlane.xlu1 %3330 }
0x11ef   :  { %7511 = vrsqrt.f32 %v3337_v40  ;;  %v3338_v5 = vadd.f32 1e-12, %v3334_v12  ;;  %v3335_v6 = vmul.f32 0.03125, %v3331_v39 }
0x11f1   :  { %7513 = vrsqrt.f32 %v3338_v5  ;;  %v3339_v41 = vadd.f32 1e-12, %v3335_v6 }
0x11f3   :  { %7515 = vrsqrt.f32 %v3339_v41 }
0x11f7   :  { %v7510_v44 = vpop.eup %7509 }
0x11f8   :  { %v3344_v7 = vmul.f32 %v7510_v44, %v3312_v55 }
0x11f9   :  { %v7512_v13 = vpop.eup %7511 }
0x11fa   :  { %v3345_v47 = vmul.f32 %v7512_v13, %v3313_v18  ;;  %v3352_v24 = vmul.f32 %v6670_v46, %v3344_v7 }
0x11fb   :  { %v7514_v48 = vpop.eup %7513 }
0x11fc   :  { %v3346_v50 = vmul.f32 %v7514_v48, %v3314_v56  ;;  %v3353_v51 = vmul.f32 %v6670_v46, %v3345_v47  ;;  %v8188_v58 = vadd.f32 %v6671_v49, %v3352_v24 }
0x11fd   :  { %v7516_v52 = vpop.eup %7515 }
0x11fe   :  { %v3347_v57 = vmul.f32 %v7516_v52, %v3315_v28  ;;  %v8190_v61 = vadd.f32 %v6671_v49, %v3353_v51  ;;  %v3354_v63 = vmul.f32 %v6670_v46, %v3346_v50 }
0x1200   :  { %v3364_v0 = vpack.c.bf16 %v8190_v61, %v8188_v58  ;;  %v3355_v1 = vmul.f32 %v6670_v46, %v3347_v57  ;;  %v8195_v53 = vadd.f32 %v6671_v49, %v3354_v63 }
0x1202   :  { %7130 = vmatprep.mubr.msk.bf16.mxu0 %vm34_vm0, %v3364_v0  ;;  %v8197_v3 = vadd.f32 %v6671_v49, %v3355_v1 }
0x1204   :  { %v3365_v4 = vpack.c.bf16 %v8197_v3, %v8195_v53 }
0x1206   :  { %7131 = vmatmul.mubr.msk.bf16.vlgmr.msra.gmra.mrb[40].mxu0 %vm34_vm0, %v3365_v4 }
0x1207   :  { %7136 = vmatprep.mubr.msk.f32.mxu0 %vm7630_vm1, %v7629_v62 }
0x12d9   :  { %v7132_v10 = vpop.f32.mrb[40].mxu0 }
0x12da   :  { %v3428_v54 = vpop.f32.mrb[41].mxu0  ;;  %v8215_v16 = vadd.f32 %v7132_v10, %v6676_v8 }
0x12db   :  { %v8207_v14 = vadd.f32 %v6676_v8, %v3428_v54  ;;  %v7133_v59 = vpop.f32.mrb[42].mxu0 }
0x12dc   :  { %v3431_v25 = vpop.f32.mrb[43].mxu0  ;;  %v8219_v55 = vadd.f32 %v7133_v59, %v6676_v8 }
0x12dd   :  { %v8209_v15 = vadd.f32 %v6676_v8, %v3431_v25  ;;  %3444 = vrot.lane.b32.xlu0 %v8207_v14, %s7631_s18 }
0x12df   :  { %3521 = vrot.lane.b32.xlu1 %v8209_v15, %s7631_s18 }
0x12e3   :  { %3598 = vrot.lane.b32.xlu1 %v8215_v16, %s7631_s18 }
0x12e7   :  { %3675 = vrot.lane.b32.xlu1 %v8219_v55, %s7631_s18 }
0x134f   :  { %v3445_v17 = vpop.permute.xlu0 %3444 }
0x1350   :  { %7135 = vmatpush3.xpose.msk.msra.mxu0 %vm233_vm2, %v3445_v17 }
0x1351   :  { %v3522_v45 = vpop.permute.xlu1 %3521  ;;  %7139 = vmatprep.subr.mxu0 %v7629_v62 }
0x1353   :  { %7137 = vmatmul.mubr.msk.f32.vlgmr.msra.gmra.mrb[44].mxu0 %vm233_vm2, %v8207_v14 }
0x1354   :  { %7140 = vmatpush3.xpose.msk.msra.mxu0 %vm233_vm2, %v3522_v45  ;;  %7141 = vmatprep.mubr.msk.f32.mxu0 %vm7630_vm1, %v7629_v62 }
0x1355   :  { %v3599_v18 = vpop.permute.xlu1 %3598  ;;  %7149 = vmatprep.subr.mxu0 %v7629_v62 }
0x1356   :  { %7145 = vmatpush3.xpose.msk.msra.mxu1 %vm233_vm2, %v3599_v18 }
0x1357   :  { %7142 = vmatmul.mubr.msk.f32.vlgmr.msra.gmra.mrb[46].mxu0 %vm233_vm2, %v8209_v15  ;;  %7154 = vmatprep.subr.mxu1 %v7629_v62 }
0x1358   :  { %7151 = vmatprep.mubr.msk.f32.mxu0 %vm7630_vm1, %v7629_v62 }
0x1359   :  { %7147 = vmatmul.mubr.msk.f32.vlgmr.msra.gmra.mrb[40].mxu1 %vm233_vm2, %v8215_v16  ;;  %v3676_v19 = vpop.permute.xlu1 %3675 }
0x135a   :  { %7150 = vmatpush3.xpose.msk.msra.mxu0 %vm233_vm2, %v3676_v19  ;;  %7156 = vmatprep.mubr.msk.f32.mxu1 %vm7630_vm1, %v7629_v62 }
0x135b   :  { %7159 = vmatprep.subr.mxu0 %v7629_v62 }
0x135d   :  { %7152 = vmatmul.mubr.msk.f32.vlgmr.msra.gmra.mrb[48].mxu0 %vm233_vm2, %v8219_v55 }
0x135e   :  { %7161 = vmatprep.mubr.msk.f32.mxu0 %vm7630_vm1, %v7629_v62 }
0x1426   :  { %v3516_v60 = vpop.f32.mrb[44].mxu0 }
0x1427   :  { %v3517_v20 = vadd.f32 %v3516_v60, %v7786_v26  ;;  %v7138_v56 = vpop.f32.mrb[45].mxu0 }
0x1429   :  { %v3751_v21 = vsel %vm233_vm2, %v3517_v20, -inf }
0x142a   :  { %3752 = vmax.xlane.f32.xlu0 %v3751_v21  ;;  %v3593_v22 = vpop.f32.mrb[46].mxu0 }
0x142b   :  { %v3594_v23 = vadd.f32 %v3593_v22, %v7788_v27  ;;  %v7143_v28 = vpop.f32.mrb[47].mxu0 }
0x142c   :  { %v3670_v29 = vpop.f32.mrb[40].mxu1 }
0x142d   :  { %v3671_v30 = vadd.f32 %v3670_v29, %v7793_v36  ;;  %v7148_v31 = vpop.f32.mrb[41].mxu1  ;;  %v3754_v32 = vsel %vm233_vm2, %v3594_v23, -inf }
0x142e   :  { %3755 = vmax.xlane.f32.xlu1 %v3754_v32 }
0x142f   :  { %v3757_v33 = vsel %vm233_vm2, %v3671_v30, -inf }
0x1430   :  { %3758 = vmax.xlane.f32.xlu0 %v3757_v33  ;;  %v3747_v34 = vpop.f32.mrb[48].mxu0 }
0x1431   :  { %v3748_v35 = vadd.f32 %v3747_v34, %v7797_v42  ;;  %v7153_v37 = vpop.f32.mrb[49].mxu0 }
0x1433   :  { %v3760_v38 = vsel %vm233_vm2, %v3748_v35, -inf }
0x1434   :  { %3761 = vmax.xlane.f32.xlu0 %v3760_v38 }
0x143f   :  { %3871 = vrot.lane.b32.xlu1 %v8209_v15, %s7633_s1 }
0x1443   :  { %3947 = vrot.lane.b32.xlu1 %v8215_v16, %s7633_s1 }
0x1447   :  { %4023 = vrot.lane.b32.xlu1 %v8219_v55, %s7633_s1 }
0x144a   :  { %3795 = vrot.lane.b32.xlu0 %v8207_v14, %s7633_s1 }
0x144b   :  { %4179 = vrot.lane.b32.xlu1 %v8209_v15, %s7634_s21 }
0x144f   :  { %4177 = vrot.lane.b32.xlu1 %v8209_v15, %s7635_s22 }
0x14b7   :  { %v3753_v2 = vpop.xlane.xlu0 %3752 }
0x14b8   :  { %v3763_v9 = vsub.f32 %v3517_v20, %v3753_v2 }
0x14ba   :  { %v3767_v6 = vmul.f32 1.442695, %v3763_v9 }
0x14bb   :  { %v3756_v43 = vpop.xlane.xlu1 %3755 }
0x14bc   :  { %v3764_v11 = vsub.f32 %v3594_v23, %v3756_v43 }
0x14bd   :  { %v3759_v40 = vpop.xlane.xlu0 %3758 }
0x14be   :  { %v3769_v12 = vmul.f32 1.442695, %v3764_v11  ;;  %v3765_v39 = vsub.f32 %v3671_v30, %v3759_v40 }
0x14bf   :  { %v3872_v5 = vpop.permute.xlu1 %3871 }
0x14c0   :  { %7517 = vpow2.f32 %v3769_v12  ;;  %v3771_v41 = vmul.f32 1.442695, %v3765_v39  ;;  %7160 = vmatpush3.msra.mxu0 %v3872_v5 }
0x14c1   :  { %v3762_v44 = vpop.xlane.xlu0 %3761  ;;  %7169 = vmatprep.subr.mxu0 %v7629_v62 }
0x14c2   :  { %7519 = vpow2.f32 %v3771_v41  ;;  %v3766_v46 = vsub.f32 %v3748_v35, %v3762_v44 }
0x14c3   :  { %7521 = vpow2.f32 %v3767_v6  ;;  %v3948_v63 = vpop.permute.xlu1 %3947 }
0x14c4   :  { %v3773_v7 = vmul.f32 1.442695, %v3766_v46 }
0x14c5   :  { %v3796_v13 = vpop.permute.xlu0 %3795 }
0x14c6   :  { %7523 = vpow2.f32 %v3773_v7  ;;  %7155 = vmatpush3.msra.mxu1 %v3796_v13 }
0x14c7   :  { %7164 = vmatprep.subr.mxu1 %v7629_v62  ;;  %v4024_v0 = vpop.permute.xlu1 %4023 }
0x14ca   :  { %v7518_v47 = vpop.eup %7517 }
0x14cb   :  { %v3778_v24 = vsel %vm233_vm2, %v7518_v47, 0.0  ;;  %v4180_v1 = vpop.permute.xlu1 %4179 }
0x14cc   :  { %v7520_v48 = vpop.eup %7519  ;;  %3779 = vadd.xlane.f32.xlu1 %v3778_v24 }
0x14cd   :  { %v3781_v49 = vsel %vm233_vm2, %v7520_v48, 0.0  ;;  %v7522_v50 = vpop.eup %7521 }
0x14ce   :  { %3782 = vadd.xlane.f32.xlu0 %v3781_v49  ;;  %v3775_v52 = vsel %vm233_vm2, %v7522_v50, 0.0 }
0x14cf   :  { %v4178_v4 = vpop.permute.xlu1 %4177 }
0x14d0   :  { %v7524_v51 = vpop.eup %7523 }
0x14d1   :  { %v3784_v57 = vsel %vm233_vm2, %v7524_v51, 0.0 }
0x14d2   :  { %3776 = vadd.xlane.f32.xlu0 %v3775_v52  ;;  %3785 = vadd.xlane.f32.xlu1 %v3784_v57 }
0x14e3   :  { %4335 = vrot.lane.b32.xlu1 %v8219_v55, %s7634_s21 }
0x14e7   :  { %4333 = vrot.lane.b32.xlu1 %v8219_v55, %s7635_s22 }
0x14e8   :  { %4101 = vrot.lane.b32.xlu0 %v8207_v14, %s7634_s21 }
0x14ec   :  { %4099 = vrot.lane.b32.xlu0 %v8207_v14, %s7635_s22 }
0x14f0   :  { %4257 = vrot.lane.b32.xlu0 %v8215_v16, %s7634_s21  ;;  %s7646_s21 = smov [#allocation2]  }
0x14f4   :  { %4255 = vrot.lane.b32.xlu0 %v8215_v16, %s7635_s22  ;;  %s6585_s22 = sshll.u32 %s7646_s21, 4  ;;  %s6586_s22 = int_to_ptr.vmem [resolvable:$true] %s6585_s22 }
0x14f5   :  { %p7610_p1 = scmp.lt.s32.totalorder %s6586_s22, %s6586_s22 }
0x1559   :  { %v3780_v8 = vpop.xlane.xlu1 %3779 }
0x155a   :  { %7525 = vrcp.f32 %v3780_v8 }
0x155b   :  { %v3783_v10 = vpop.xlane.xlu0 %3782 }
0x155f   :  { %v3786_v54 = vpop.xlane.xlu1 %3785  ;;  %v3777_v59 = vpop.xlane.xlu0 %3776 }
0x1560   :  { %7527 = vrcp.f32 %v3786_v54 }
0x1561   :  { %7529 = vrcp.f32 %v3777_v59 }
0x1562   :  { %7531 = vrcp.f32 %v3783_v10 }
0x1563   :  { %v4102_v18 = vpop.permute.xlu0 %4101  ;;  %v4336_v21 = vpop.permute.xlu1 %4335 }
0x1564   :  { %v7526_v25 = vpop.eup %7525 }
0x1565   :  { %v3792_v17 = vmul.f32 %v7526_v25, %v7518_v47 }
0x1567   :  { %7162 = vmatmul.mubr.msk.f32.vlgmr.msra.gmra.mrb[50].mxu0 %vm233_vm2, %v3792_v17  ;;  %v4100_v23 = vpop.permute.xlu0 %4099  ;;  %v4334_v28 = vpop.permute.xlu1 %4333 }
0x1568   :  { %7170 = vmatpush3.msra.mxu0 %v4024_v0  ;;  %7171 = vmatprep.mubr.msk.f32.mxu0 %vm7630_vm1, %v7629_v62 }
0x1569   :  { %7179 = vmatprep.subr.mxu0 %v7629_v62 }
0x156a   :  { %v7528_v45 = vpop.eup %7527 }
0x156b   :  { %v7530_v19 = vpop.eup %7529  ;;  %v3794_v60 = vmul.f32 %v7528_v45, %v7524_v51  ;;  %v4258_v29 = vpop.permute.xlu0 %4257 }
0x156c   :  { %v3791_v20 = vmul.f32 %v7530_v19, %v7522_v50  ;;  %v7532_v56 = vpop.eup %7531 }
0x156d   :  { %7172 = vmatmul.mubr.msk.f32.vlgmr.msra.gmra.mrb[52].mxu0 %vm233_vm2, %v3794_v60  ;;  %v3793_v22 = vmul.f32 %v7532_v56, %v7520_v48 }
0x156e   :  { %7157 = vmatmul.mubr.msk.f32.vlgmr.msra.gmra.mrb[42].mxu1 %vm233_vm2, %v3791_v20  ;;  %7181 = vmatprep.mubr.msk.f32.mxu0 %vm7630_vm1, %v7629_v62 }
0x156f   :  { %7165 = vmatpush3.msra.mxu1 %v3948_v63  ;;  %7180 = vmatpush3.xpose.msk.msra.mxu0 %vm233_vm2, %v4180_v1  ;;  %v4256_v30 = vpop.permute.xlu0 %4255 }
0x1570   :  { %7166 = vmatprep.mubr.msk.f32.mxu1 %vm7630_vm1, %v7629_v62  ;;  %7189 = vmatprep.subr.mxu0 %v7629_v62 }
0x1571   :  { %7174 = vmatprep.subr.mxu1 %v7629_v62 }
0x1572   :  { %7167 = vmatmul.mubr.msk.f32.vlgmr.msra.gmra.mrb[44].mxu1 %vm233_vm2, %v3793_v22  ;;  %7182 = vmatmul.mubr.msk.f32.vlgmr.msra.gmra.mrb[54].mxu0 %vm233_vm2, %v4178_v4 }
0x1573   :  { %7190 = vmatpush3.xpose.msk.msra.mxu0 %vm233_vm2, %v4336_v21  ;;  %7191 = vmatprep.mubr.msk.f32.mxu0 %vm7630_vm1, %v7629_v62 }
0x1574   :  { %7176 = vmatprep.mubr.msk.f32.mxu1 %vm7630_vm1, %v7629_v62  ;;  %7199 = vmatprep.subr.mxu0 %v7629_v62 }
0x1576   :  { %7175 = vmatpush3.xpose.msk.msra.mxu1 %vm233_vm2, %v4102_v18  ;;  %7192 = vmatmul.mubr.msk.f32.vlgmr.msra.gmra.mrb[56].mxu0 %vm233_vm2, %v4334_v28 }
0x1577   :  { %7184 = vmatprep.subr.mxu1 %v7629_v62  ;;  %7201 = vmatprep.mubr.msk.f32.mxu0 %vm7630_vm1, %v7629_v62 }
0x1579   :  { %7177 = vmatmul.mubr.msk.f32.vlgmr.msra.gmra.mrb[46].mxu1 %vm233_vm2, %v4100_v23 }
0x157a   :  { %7185 = vmatpush3.xpose.msk.msra.mxu1 %vm233_vm2, %v4258_v29  ;;  %7186 = vmatprep.mubr.msk.f32.mxu1 %vm7630_vm1, %v7629_v62 }
0x157b   :  { %7194 = vmatprep.subr.mxu1 %v7629_v62 }
0x157d   :  { %7187 = vmatmul.mubr.msk.f32.vlgmr.msra.gmra.mrb[48].mxu1 %vm233_vm2, %v4256_v30 }
0x157e   :  { %7196 = vmatprep.mubr.msk.f32.mxu1 %vm7630_vm1, %v7629_v62 }
0x163a   :  { %v8319_v31 = vpop.f32.mrb[50].mxu0 }
0x163b   :  { %v7163_v32 = vpop.f32.mrb[51].mxu0 }
0x1640   :  { %v8321_v33 = vpop.f32.mrb[52].mxu0 }
0x1641   :  { %v8323_v34 = vpop.f32.mrb[42].mxu1  ;;  %v7173_v35 = vpop.f32.mrb[53].mxu0 }
0x1642   :  { %v7158_v37 = vpop.f32.mrb[43].mxu1 }
0x1645   :  { %v8325_v38 = vpop.f32.mrb[44].mxu1  ;;  %v4251_v2 = vpop.f32.mrb[54].mxu0 }
0x1646   :  { %v4252_v43 = vadd.f32 %v4251_v2, %v7788_v27  ;;  %v7168_v9 = vpop.f32.mrb[45].mxu1  ;;  %v7183_v11 = vpop.f32.mrb[55].mxu0 }
0x1648   :  { %v4414_v40 = vsel %vm233_vm2, %v4252_v43, -inf }
0x1649   :  { %4415 = vmax.xlane.f32.xlu1 %v4414_v40  ;;  %v4407_v12 = vpop.f32.mrb[56].mxu0 }
0x164a   :  { %v7193_v39 = vpop.f32.mrb[57].mxu0  ;;  %v4408_v47 = vadd.f32 %v4407_v12, %v7797_v42 }
0x164c   :  { %v4173_v5 = vpop.f32.mrb[46].mxu1  ;;  %v4420_v48 = vsel %vm233_vm2, %v4408_v47, -inf }
0x164d   :  { %v4174_v6 = vadd.f32 %v4173_v5, %v7786_v26  ;;  %v7178_v41 = vpop.f32.mrb[47].mxu1 }
0x164f   :  { %v4411_v44 = vsel %vm233_vm2, %v4174_v6, -inf }
0x1650   :  { %4412 = vmax.xlane.f32.xlu0 %v4411_v44  ;;  %v4329_v46 = vpop.f32.mrb[48].mxu1 }
0x1651   :  { %v4330_v7 = vadd.f32 %v4329_v46, %v7793_v36  ;;  %v7188_v13 = vpop.f32.mrb[49].mxu1 }
0x1653   :  { %v4417_v24 = vsel %vm233_vm2, %v4330_v7, -inf }
0x1654   :  { %4418 = vmax.xlane.f32.xlu0 %v4417_v24 }
0x1658   :  { %4421 = vmax.xlane.f32.xlu0 %v4420_v48 }
0x165a   :  { %4531 = vrot.lane.b32.xlu1 %v8209_v15, %s7636_s23 }
0x165e   :  { %4607 = vrot.lane.b32.xlu1 %v8215_v16, %s7636_s23 }
0x1662   :  { %4683 = vrot.lane.b32.xlu1 %v8219_v55, %s7636_s23 }
0x1666   :  { %4839 = vrot.lane.b32.xlu1 %v8209_v15, %s7637_s24 }
0x166e   :  { %4455 = vrot.lane.b32.xlu0 %v8207_v14, %s7636_s23 }
0x1672   :  { %4761 = vrot.lane.b32.xlu0 %v8207_v14, %s7637_s24 }
0x16d6   :  { %v4416_v49 = vpop.xlane.xlu1 %4415 }
0x16d7   :  { %v4424_v50 = vsub.f32 %v4252_v43, %v4416_v49 }
0x16d9   :  { %v4429_v51 = vmul.f32 1.442695, %v4424_v50 }
0x16da   :  { %v4532_v52 = vpop.permute.xlu1 %4531 }
0x16db   :  { %7533 = vpow2.f32 %v4429_v51  ;;  %7200 = vmatpush3.msra.mxu0 %v4532_v52 }
0x16dc   :  { %7209 = vmatprep.subr.mxu0 %v7629_v62 }
0x16dd   :  { %v4413_v57 = vpop.xlane.xlu0 %4412 }
0x16de   :  { %v4423_v63 = vsub.f32 %v4174_v6, %v4413_v57  ;;  %v4608_v22 = vpop.permute.xlu1 %4607 }
0x16e0   :  { %v4427_v0 = vmul.f32 1.442695, %v4423_v63 }
0x16e1   :  { %v4419_v1 = vpop.xlane.xlu0 %4418 }
0x16e2   :  { %7535 = vpow2.f32 %v4427_v0  ;;  %v4425_v4 = vsub.f32 %v4330_v7, %v4419_v1  ;;  %v4684_v23 = vpop.permute.xlu1 %4683 }
0x16e4   :  { %v4431_v8 = vmul.f32 1.442695, %v4425_v4 }
0x16e5   :  { %v7534_v10 = vpop.eup %7533  ;;  %v4422_v54 = vpop.xlane.xlu0 %4421 }
0x16e6   :  { %7537 = vpow2.f32 %v4431_v8  ;;  %v4438_v59 = vsel %vm233_vm2, %v7534_v10, 0.0  ;;  %v4426_v60 = vsub.f32 %v4408_v47, %v4422_v54  ;;  %v4840_v28 = vpop.permute.xlu1 %4839 }
0x16e7   :  { %4439 = vadd.xlane.f32.xlu1 %v4438_v59 }
0x16e8   :  { %v4433_v20 = vmul.f32 1.442695, %v4426_v60 }
0x16e9   :  { %v4456_v25 = vpop.permute.xlu0 %4455 }
0x16ea   :  { %7195 = vmatpush3.msra.mxu1 %v4456_v25  ;;  %7539 = vpow2.f32 %v4433_v20 }
0x16eb   :  { %7204 = vmatprep.subr.mxu1 %v7629_v62 }
0x16ec   :  { %v7536_v17 = vpop.eup %7535 }
0x16ed   :  { %v4435_v45 = vsel %vm233_vm2, %v7536_v17, 0.0  ;;  %v4762_v30 = vpop.permute.xlu0 %4761 }
0x16ee   :  { %4436 = vadd.xlane.f32.xlu0 %v4435_v45 }
0x16f0   :  { %v7538_v18 = vpop.eup %7537 }
0x16f1   :  { %v4441_v19 = vsel %vm233_vm2, %v7538_v18, 0.0 }
0x16f2   :  { %4442 = vadd.xlane.f32.xlu0 %v4441_v19 }
0x16f4   :  { %v7540_v56 = vpop.eup %7539 }
0x16f5   :  { %v4444_v21 = vsel %vm233_vm2, %v7540_v56, 0.0 }
0x16f8   :  { %4837 = vrot.lane.b32.xlu1 %v8209_v15, %s7638_s25 }
0x1708   :  { %4759 = vrot.lane.b32.xlu0 %v8207_v14, %s7638_s25 }
0x170c   :  { %4917 = vrot.lane.b32.xlu0 %v8215_v16, %s7637_s24 }
0x1710   :  { %4915 = vrot.lane.b32.xlu0 %v8215_v16, %s7638_s25 }
0x1714   :  { %5115 = vrot.lane.b32.xlu0 %v8207_v14, %s7639_s26 }
0x171c   :  { %4445 = vadd.xlane.f32.xlu1 %v4444_v21 }
0x172d   :  { %4995 = vrot.lane.b32.xlu1 %v8219_v55, %s7637_s24 }
0x1731   :  { %4993 = vrot.lane.b32.xlu1 %v8219_v55, %s7638_s25 }
0x1735   :  { %5191 = vrot.lane.b32.xlu1 %v8209_v15, %s7639_s26 }
0x1739   :  { %5267 = vrot.lane.b32.xlu1 %v8215_v16, %s7639_s26 }
0x173d   :  { %5343 = vrot.lane.b32.xlu1 %v8219_v55, %s7639_s26 }
0x1774   :  { %v4440_v29 = vpop.xlane.xlu1 %4439 }
0x1775   :  { %7541 = vrcp.f32 %v4440_v29 }
0x1778   :  { %v4838_v41 = vpop.permute.xlu1 %4837 }
0x177b   :  { %v4437_v32 = vpop.xlane.xlu0 %4436 }
0x177c   :  { %7543 = vrcp.f32 %v4437_v32 }
0x177f   :  { %v7542_v35 = vpop.eup %7541  ;;  %v4443_v37 = vpop.xlane.xlu0 %4442 }
0x1780   :  { %v4452_v2 = vmul.f32 %v7542_v35, %v7534_v10  ;;  %7545 = vrcp.f32 %v4443_v37 }
0x1782   :  { %7202 = vmatmul.mubr.msk.f32.vlgmr.msra.gmra.mrb[58].mxu0 %vm233_vm2, %v4452_v2 }
0x1783   :  { %7210 = vmatpush3.msra.mxu0 %v4684_v23  ;;  %7211 = vmatprep.mubr.msk.f32.mxu0 %vm7630_vm1, %v7629_v62  ;;  %v4760_v9 = vpop.permute.xlu0 %4759 }
0x1784   :  { %7219 = vmatprep.subr.mxu0 %v7629_v62 }
0x1786   :  { %v7544_v43 = vpop.eup %7543 }
0x1787   :  { %v4451_v11 = vmul.f32 %v7544_v43, %v7536_v17  ;;  %v4918_v39 = vpop.permute.xlu0 %4917 }
0x1789   :  { %7197 = vmatmul.mubr.msk.f32.vlgmr.msra.gmra.mrb[50].mxu1 %vm233_vm2, %v4451_v11 }
0x178a   :  { %v7546_v40 = vpop.eup %7545  ;;  %7205 = vmatpush3.msra.mxu1 %v4608_v22  ;;  %7206 = vmatprep.mubr.msk.f32.mxu1 %vm7630_vm1, %v7629_v62 }
0x178b   :  { %v4453_v12 = vmul.f32 %v7546_v40, %v7538_v18  ;;  %7214 = vmatprep.subr.mxu1 %v7629_v62  ;;  %v4916_v5 = vpop.permute.xlu0 %4915 }
0x178d   :  { %7207 = vmatmul.mubr.msk.f32.vlgmr.msra.gmra.mrb[52].mxu1 %vm233_vm2, %v4453_v12 }
0x178e   :  { %7216 = vmatprep.mubr.msk.f32.mxu1 %vm7630_vm1, %v7629_v62 }
0x178f   :  { %v5116_v6 = vpop.permute.xlu0 %5115 }
0x1791   :  { %7215 = vmatpush3.xpose.msk.msra.mxu1 %vm233_vm2, %v4762_v30 }
0x1792   :  { %7224 = vmatprep.subr.mxu1 %v7629_v62 }
0x1794   :  { %7217 = vmatmul.mubr.msk.f32.vlgmr.msra.gmra.mrb[54].mxu1 %vm233_vm2, %v4760_v9 }
0x1795   :  { %7225 = vmatpush3.xpose.msk.msra.mxu1 %vm233_vm2, %v4918_v39  ;;  %7226 = vmatprep.mubr.msk.f32.mxu1 %vm7630_vm1, %v7629_v62 }
0x1796   :  { %7234 = vmatprep.subr.mxu1 %v7629_v62 }
0x1798   :  { %7227 = vmatmul.mubr.msk.f32.vlgmr.msra.gmra.mrb[56].mxu1 %vm233_vm2, %v4916_v5 }
0x1799   :  { %7235 = vmatpush3.msra.mxu1 %v5116_v6  ;;  %7236 = vmatprep.mubr.msk.f32.mxu1 %vm7630_vm1, %v7629_v62 }
0x179a   :  { %7244 = vmatprep.subr.mxu1 %v7629_v62 }
0x17a9   :  { %v4446_v44 = vpop.xlane.xlu1 %4445 }
0x17aa   :  { %7547 = vrcp.f32 %v4446_v44 }
0x17ad   :  { %v4996_v46 = vpop.permute.xlu1 %4995 }
0x17b1   :  { %v4994_v47 = vpop.permute.xlu1 %4993 }
0x17b4   :  { %v7548_v7 = vpop.eup %7547 }
0x17b5   :  { %v4454_v13 = vmul.f32 %v7548_v7, %v7540_v56  ;;  %v5192_v24 = vpop.permute.xlu1 %5191 }
0x17b7   :  { %7212 = vmatmul.mubr.msk.f32.vlgmr.msra.gmra.mrb[60].mxu0 %vm233_vm2, %v4454_v13 }
0x17b8   :  { %7220 = vmatpush3.xpose.msk.msra.mxu0 %vm233_vm2, %v4840_v28  ;;  %7221 = vmatprep.mubr.msk.f32.mxu0 %vm7630_vm1, %v7629_v62 }
0x17b9   :  { %7229 = vmatprep.subr.mxu0 %v7629_v62  ;;  %v5268_v2 = vpop.permute.xlu1 %5267 }
0x17bb   :  { %7222 = vmatmul.mubr.msk.f32.vlgmr.msra.gmra.mrb[62].mxu0 %vm233_vm2, %v4838_v41 }
0x17bc   :  { %7230 = vmatpush3.xpose.msk.msra.mxu0 %vm233_vm2, %v4996_v46  ;;  %7231 = vmatprep.mubr.msk.f32.mxu0 %vm7630_vm1, %v7629_v62 }
0x17bd   :  { %7239 = vmatprep.subr.mxu0 %v7629_v62  ;;  %v5344_v43 = vpop.permute.xlu1 %5343 }
0x17bf   :  { %7232 = vmatmul.mubr.msk.f32.vlgmr.msra.gmra.mrb[64].mxu0 %vm233_vm2, %v4994_v47 }
0x17c0   :  { %7240 = vmatpush3.msra.mxu0 %v5192_v24  ;;  %7241 = vmatprep.mubr.msk.f32.mxu0 %vm7630_vm1, %v7629_v62 }
0x17c1   :  { %7249 = vmatprep.subr.mxu0 %v7629_v62 }
0x1855   :  { %v8409_v48 = vpop.f32.mrb[58].mxu0 }
0x1856   :  { %v7203_v49 = vpop.f32.mrb[59].mxu0 }
0x185c   :  { %v8411_v50 = vpop.f32.mrb[50].mxu1 }
0x185d   :  { %v7371_v51 = vpack.i.bf16 %v8409_v48, %v8411_v50  ;;  %v7198_v52 = vpop.f32.mrb[51].mxu1 }
0x1860   :  { %v8415_v57 = vpop.f32.mrb[52].mxu1 }
0x1861   :  { %v7208_v63 = vpop.f32.mrb[53].mxu1 }
0x1867   :  { %v4833_v0 = vpop.f32.mrb[54].mxu1 }
0x1868   :  { %v4834_v1 = vadd.f32 %v4833_v0, %v7786_v26  ;;  %v7218_v4 = vpop.f32.mrb[55].mxu1 }
0x186a   :  { %v5071_v8 = vsel %vm233_vm2, %v4834_v1, -inf }
0x186b   :  { %5072 = vmax.xlane.f32.xlu0 %v5071_v8  ;;  %v4989_v10 = vpop.f32.mrb[56].mxu1 }
0x186c   :  { %v4990_v54 = vadd.f32 %v4989_v10, %v7793_v36  ;;  %v7228_v59 = vpop.f32.mrb[57].mxu1 }
0x186e   :  { %v5077_v25 = vsel %vm233_vm2, %v4990_v54, -inf }
0x186f   :  { %5078 = vmax.xlane.f32.xlu0 %v5077_v25 }
0x188a   :  { %v8421_v17 = vpop.f32.mrb[60].mxu0 }
0x188b   :  { %v7376_v45 = vpack.i.bf16 %v8421_v17, %v8415_v57  ;;  %v7213_v18 = vpop.f32.mrb[61].mxu0 }
0x188e   :  { %v4911_v19 = vpop.f32.mrb[62].mxu0 }
0x188f   :  { %v4912_v60 = vadd.f32 %v4911_v19, %v7788_v27  ;;  %v7223_v20 = vpop.f32.mrb[63].mxu0 }
0x1891   :  { %v5074_v56 = vsel %vm233_vm2, %v4912_v60, -inf }
0x1892   :  { %5075 = vmax.xlane.f32.xlu1 %v5074_v56  ;;  %v5067_v21 = vpop.f32.mrb[64].mxu0 }
0x1893   :  { %v5068_v22 = vadd.f32 %v5067_v21, %v7797_v42  ;;  %v7233_v23 = vpop.f32.mrb[65].mxu0 }
0x1895   :  { %v5080_v28 = vsel %vm233_vm2, %v5068_v22, -inf }
0x1896   :  { %5081 = vmax.xlane.f32.xlu0 %v5080_v28 }
0x18a3   :  { %5499 = vrot.lane.b32.xlu1 %v8209_v15, %s7640_s27 }
0x18a7   :  { %5497 = vrot.lane.b32.xlu1 %v8209_v15, %s7641_s28 }
0x18ac   :  { %5421 = vrot.lane.b32.xlu0 %v8207_v14, %s7640_s27 }
0x18f8   :  { %v5073_v29 = vpop.xlane.xlu0 %5072 }
0x18f9   :  { %v5083_v30 = vsub.f32 %v4834_v1, %v5073_v29 }
0x18fb   :  { %v5087_v32 = vmul.f32 1.442695, %v5083_v30 }
0x18fc   :  { %v5079_v12 = vpop.xlane.xlu0 %5078 }
0x18fd   :  { %7549 = vpow2.f32 %v5087_v32  ;;  %v5085_v39 = vsub.f32 %v4990_v54, %v5079_v12 }
0x18ff   :  { %v5091_v5 = vmul.f32 1.442695, %v5085_v39 }
0x1907   :  { %v7550_v35 = vpop.eup %7549 }
0x1908   :  { %v5095_v37 = vsel %vm233_vm2, %v7550_v35, 0.0 }
0x1909   :  { %5096 = vadd.xlane.f32.xlu0 %v5095_v37 }
0x191f   :  { %5419 = vrot.lane.b32.xlu0 %v8207_v14, %s7641_s28  ;;  %v5076_v9 = vpop.xlane.xlu1 %5075 }
0x1920   :  { %v5084_v11 = vsub.f32 %v4912_v60, %v5076_v9 }
0x1922   :  { %v5089_v40 = vmul.f32 1.442695, %v5084_v11 }
0x1923   :  { %v5082_v7 = vpop.xlane.xlu0 %5081  ;;  %v5500_v4 = vpop.permute.xlu1 %5499 }
0x1924   :  { %7551 = vpow2.f32 %v5089_v40  ;;  %v5086_v13 = vsub.f32 %v5068_v22, %v5082_v7 }
0x1925   :  { %7553 = vpow2.f32 %v5091_v5 }
0x1926   :  { %v5093_v47 = vmul.f32 1.442695, %v5086_v13 }
0x1927   :  { %v5422_v52 = vpop.permute.xlu0 %5421  ;;  %v5498_v8 = vpop.permute.xlu1 %5497 }
0x1928   :  { %7555 = vpow2.f32 %v5093_v47 }
0x192e   :  { %v7552_v6 = vpop.eup %7551 }
0x192f   :  { %v5098_v41 = vsel %vm233_vm2, %v7552_v6, 0.0  ;;  %v7554_v44 = vpop.eup %7553 }
0x1930   :  { %5099 = vadd.xlane.f32.xlu1 %v5098_v41  ;;  %v5101_v46 = vsel %vm233_vm2, %v7554_v44, 0.0 }
0x1932   :  { %v7556_v24 = vpop.eup %7555 }
0x1933   :  { %v5104_v49 = vsel %vm233_vm2, %v7556_v24, 0.0 }
0x193e   :  { %5102 = vadd.xlane.f32.xlu0 %v5101_v46 }
0x1941   :  { %5655 = vrot.lane.b32.xlu1 %v8219_v55, %s7640_s27 }
0x1954   :  { %5577 = vrot.lane.b32.xlu0 %v8215_v16, %s7640_s27 }
0x1958   :  { %5575 = vrot.lane.b32.xlu0 %v8215_v16, %s7641_s28 }
0x1965   :  { %5105 = vadd.xlane.f32.xlu1 %v5104_v49 }
0x1976   :  { %5653 = vrot.lane.b32.xlu1 %v8219_v55, %s7641_s28 }
0x1996   :  { %v5097_v63 = vpop.xlane.xlu0 %5096 }
0x1997   :  { %7557 = vrcp.f32 %v5097_v63 }
0x199a   :  { %v5420_v54 = vpop.permute.xlu0 %5419 }
0x19a1   :  { %v7558_v0 = vpop.eup %7557 }
0x19a2   :  { %v5111_v1 = vmul.f32 %v7558_v0, %v7550_v35 }
0x19a4   :  { %7237 = vmatmul.mubr.msk.f32.vlgmr.msra.gmra.mrb[58].mxu1 %vm233_vm2, %v5111_v1 }
0x19a5   :  { %7245 = vmatpush3.msra.mxu1 %v5268_v2  ;;  %7246 = vmatprep.mubr.msk.f32.mxu1 %vm7630_vm1, %v7629_v62 }
0x19a6   :  { %7254 = vmatprep.subr.mxu1 %v7629_v62 }
0x19bd   :  { %v5100_v10 = vpop.xlane.xlu1 %5099 }
0x19be   :  { %7559 = vrcp.f32 %v5100_v10 }
0x19c1   :  { %v5656_v21 = vpop.permute.xlu1 %5655 }
0x19c8   :  { %v7560_v59 = vpop.eup %7559 }
0x19c9   :  { %v5112_v25 = vmul.f32 %v7560_v59, %v7552_v6 }
0x19cb   :  { %v5103_v18 = vpop.xlane.xlu0 %5102  ;;  %7242 = vmatmul.mubr.msk.f32.vlgmr.msra.gmra.mrb[66].mxu0 %vm233_vm2, %v5112_v25 }
0x19cc   :  { %7561 = vrcp.f32 %v5103_v18  ;;  %7250 = vmatpush3.msra.mxu0 %v5344_v43  ;;  %7251 = vmatprep.mubr.msk.f32.mxu0 %vm7630_vm1, %v7629_v62 }
0x19cd   :  { %7259 = vmatprep.subr.mxu0 %v7629_v62 }
0x19cf   :  { %v5578_v20 = vpop.permute.xlu0 %5577 }
0x19d3   :  { %v5576_v56 = vpop.permute.xlu0 %5575 }
0x19d6   :  { %v7562_v19 = vpop.eup %7561 }
0x19d7   :  { %v5113_v60 = vmul.f32 %v7562_v19, %v7554_v44 }
0x19d9   :  { %7247 = vmatmul.mubr.msk.f32.vlgmr.msra.gmra.mrb[60].mxu1 %vm233_vm2, %v5113_v60 }
0x19da   :  { %7255 = vmatpush3.xpose.msk.msra.mxu1 %vm233_vm2, %v5422_v52  ;;  %7256 = vmatprep.mubr.msk.f32.mxu1 %vm7630_vm1, %v7629_v62 }
0x19db   :  { %7264 = vmatprep.subr.mxu1 %v7629_v62 }
0x19dd   :  { %7257 = vmatmul.mubr.msk.f32.vlgmr.msra.gmra.mrb[62].mxu1 %vm233_vm2, %v5420_v54 }
0x19de   :  { %7265 = vmatpush3.xpose.msk.msra.mxu1 %vm233_vm2, %v5578_v20  ;;  %7266 = vmatprep.mubr.msk.f32.mxu1 %vm7630_vm1, %v7629_v62 }
0x19df   :  { %7274 = vmatprep.subr.mxu1 %v7629_v62 }
0x19e1   :  { %7267 = vmatmul.mubr.msk.f32.vlgmr.msra.gmra.mrb[64].mxu1 %vm233_vm2, %v5576_v56 }
0x19e2   :  { %7276 = vmatprep.mubr.msk.f32.mxu1 %vm7630_vm1, %v7629_v62 }
0x19f2   :  { %v5106_v22 = vpop.xlane.xlu1 %5105 }
0x19f3   :  { %7563 = vrcp.f32 %v5106_v22 }
0x19f6   :  { %v5654_v29 = vpop.permute.xlu1 %5653 }
0x19fd   :  { %v7564_v23 = vpop.eup %7563 }
0x19fe   :  { %v5114_v28 = vmul.f32 %v7564_v23, %v7556_v24 }
0x1a00   :  { %7252 = vmatmul.mubr.msk.f32.vlgmr.msra.gmra.mrb[68].mxu0 %vm233_vm2, %v5114_v28 }
0x1a01   :  { %7260 = vmatpush3.xpose.msk.msra.mxu0 %vm233_vm2, %v5500_v4  ;;  %7261 = vmatprep.mubr.msk.f32.mxu0 %vm7630_vm1, %v7629_v62 }
0x1a02   :  { %7269 = vmatprep.subr.mxu0 %v7629_v62 }
0x1a04   :  { %7262 = vmatmul.mubr.msk.f32.vlgmr.msra.gmra.mrb[70].mxu0 %vm233_vm2, %v5498_v8 }
0x1a05   :  { %7270 = vmatpush3.xpose.msk.msra.mxu0 %vm233_vm2, %v5656_v21  ;;  %7271 = vmatprep.mubr.msk.f32.mxu0 %vm7630_vm1, %v7629_v62 }
0x1a06   :  { %7279 = vmatprep.subr.mxu0 %v7629_v62 }
0x1a08   :  { %7272 = vmatmul.mubr.msk.f32.vlgmr.msra.gmra.mrb[72].mxu0 %vm233_vm2, %v5654_v29 }
0x1a09   :  { %7281 = vmatprep.mubr.msk.f32.mxu0 %vm7630_vm1, %v7629_v62 }
0x1a77   :  { %v5187_v30 = vpop.f32.mrb[58].mxu1 }
0x1a78   :  { %v7238_v32 = vpop.f32.mrb[59].mxu1 }
0x1a9e   :  { %v5263_v35 = vpop.f32.mrb[66].mxu0 }
0x1a9f   :  { %v7381_v37 = vpack.i.bf16 %v5263_v35, %v5187_v30  ;;  %v7243_v2 = vpop.f32.mrb[67].mxu0 }
0x1aac   :  { %v5339_v43 = vpop.f32.mrb[60].mxu1 }
0x1aad   :  { %v7248_v9 = vpop.f32.mrb[61].mxu1 }
0x1ab0   :  { %v5493_v11 = vpop.f32.mrb[62].mxu1 }
0x1ab1   :  { %v5494_v40 = vadd.f32 %v5493_v11, %v7786_v26  ;;  %v7258_v12 = vpop.f32.mrb[63].mxu1 }
0x1ab2   :  { %v7413_v12 = vld [vmem:[%s8649_s4 + $0x10] sm:$0xff]  }
0x1ab3   :  { %v5731_v39 = vsel %vm233_vm2, %v5494_v40, -inf }
0x1ab4   :  { %5732 = vmax.xlane.f32.xlu0 %v5731_v39  ;;  %v5649_v5 = vpop.f32.mrb[64].mxu1 }
0x1ab5   :  { %v5650_v6 = vadd.f32 %v5649_v5, %v7793_v36  ;;  %v7268_v41 = vpop.f32.mrb[65].mxu1 }
0x1ab7   :  { %v5737_v44 = vsel %vm233_vm2, %v5650_v6, -inf }
0x1ab8   :  { %5738 = vmax.xlane.f32.xlu0 %v5737_v44  ;;  %v7414_v44 = vld [vmem:[%s8649_s4 + $0x18] sm:$0xff]  }
0x1ad3   :  { %v5415_v46 = vpop.f32.mrb[68].mxu0 }
0x1ad4   :  { %v7386_v7 = vpack.i.bf16 %v5415_v46, %v5339_v43  ;;  %v7253_v13 = vpop.f32.mrb[69].mxu0 }
0x1ad7   :  { %v5571_v47 = vpop.f32.mrb[70].mxu0 }
0x1ad8   :  { %v5572_v24 = vadd.f32 %v5571_v47, %v7788_v27  ;;  %v7263_v49 = vpop.f32.mrb[71].mxu0 }
0x1ada   :  { %v5734_v26 = vsel %vm233_vm2, %v5572_v24, -inf }
0x1adb   :  { %5735 = vmax.xlane.f32.xlu1 %v5734_v26  ;;  %v5727_v52 = vpop.f32.mrb[72].mxu0 }
0x1adc   :  { %v5728_v63 = vadd.f32 %v5727_v52, %v7797_v42  ;;  %v7273_v0 = vpop.f32.mrb[73].mxu0 }
0x1ade   :  { %v5740_v36 = vsel %vm233_vm2, %v5728_v63, -inf }
0x1adf   :  { %5741 = vmax.xlane.f32.xlu0 %v5740_v36 }
0x1b41   :  { %v5733_v1 = vpop.xlane.xlu0 %5732 }
0x1b42   :  { %v5743_v4 = vsub.f32 %v5494_v40, %v5733_v1 }
0x1b44   :  { %v5747_v8 = vmul.f32 1.442695, %v5743_v4 }
0x1b45   :  { %v5739_v10 = vpop.xlane.xlu0 %5738 }
0x1b46   :  { %7565 = vpow2.f32 %v5747_v8  ;;  %v5745_v54 = vsub.f32 %v5650_v6, %v5739_v10 }
0x1b48   :  { %v5751_v59 = vmul.f32 1.442695, %v5745_v54 }
0x1b4a   :  { %7567 = vpow2.f32 %v5751_v59 }
0x1b50   :  { %v7566_v27 = vpop.eup %7565 }
0x1b51   :  { %v5755_v25 = vsel %vm233_vm2, %v7566_v27, 0.0 }
0x1b52   :  { %5756 = vadd.xlane.f32.xlu0 %v5755_v25 }
0x1b54   :  { %v7568_v18 = vpop.eup %7567 }
0x1b55   :  { %v5761_v19 = vsel %vm233_vm2, %v7568_v18, 0.0 }
0x1b56   :  { %5762 = vadd.xlane.f32.xlu0 %v5761_v19 }
0x1b68   :  { %v5736_v42 = vpop.xlane.xlu1 %5735 }
0x1b69   :  { %v5744_v60 = vsub.f32 %v5572_v24, %v5736_v42 }
0x1b6b   :  { %v5749_v20 = vmul.f32 1.442695, %v5744_v60 }
0x1b6c   :  { %5775 = vrot.lane.b32.xlu0 %v8207_v14, %s7642_s29  ;;  %v5742_v22 = vpop.xlane.xlu0 %5741 }
0x1b6d   :  { %7569 = vpow2.f32 %v5749_v20  ;;  %v5746_v14 = vsub.f32 %v5728_v63, %v5742_v22 }
0x1b6f   :  { %v5753_v23 = vmul.f32 1.442695, %v5746_v14 }
0x1b70   :  { %7372 = vrot.lane.b32.xlu0 %v7371_v51, %s7643_s30 }
0x1b71   :  { %7571 = vpow2.f32 %v5753_v23 }
0x1b74   :  { %7382 = vrot.lane.b32.xlu0 %v7381_v37, %s7644_s8 }
0x1b77   :  { %v7570_v56 = vpop.eup %7569 }
0x1b78   :  { %v5758_v21 = vsel %vm233_vm2, %v7570_v56, 0.0 }
0x1b79   :  { %5759 = vadd.xlane.f32.xlu1 %v5758_v21 }
0x1b7b   :  { %v7572_v28 = vpop.eup %7571 }
0x1b7c   :  { %v5764_v48 = vsel %vm233_vm2, %v7572_v28, 0.0 }
0x1b8a   :  { %5851 = vrot.lane.b32.xlu1 %v8209_v15, %s7642_s29 }
0x1b8e   :  { %5927 = vrot.lane.b32.xlu1 %v8215_v16, %s7642_s29 }
0x1bb2   :  { %5765 = vadd.xlane.f32.xlu1 %v5764_v48 }
0x1bc3   :  { %6003 = vrot.lane.b32.xlu1 %v8219_v55, %s7642_s29 }
0x1bc7   :  { %7377 = vrot.lane.b32.xlu1 %v7376_v45, %s7643_s30 }
0x1bcb   :  { %7387 = vrot.lane.b32.xlu1 %v7386_v7, %s7644_s8 }
0x1bdf   :  { %v5757_v15 = vpop.xlane.xlu0 %5756 }
0x1be0   :  { %7573 = vrcp.f32 %v5757_v15 }
0x1be3   :  { %v5763_v16 = vpop.xlane.xlu0 %5762 }
0x1be4   :  { %7575 = vrcp.f32 %v5763_v16 }
0x1be7   :  { %v5776_v50 = vpop.permute.xlu0 %5775 }
0x1be8   :  { %7275 = vmatpush3.msra.mxu1 %v5776_v50 }
0x1be9   :  { %7284 = vmatprep.subr.mxu1 %v7629_v62 }
0x1bea   :  { %v7574_v51 = vpop.eup %7573 }
0x1beb   :  { %v5771_v29 = vmul.f32 %v7574_v51, %v7566_v27  ;;  %v7373_v47 = vpop.permute.xlu0 %7372 }
0x1bec   :  { %v7375_v49 = vunpack.i.h.bf16 %v7373_v47  ;;  %v7374_v26 = vunpack.i.l.bf16 %v7373_v47 }
0x1bed   :  { %7277 = vmatmul.mubr.msk.f32.vlgmr.msra.gmra.mrb[66].mxu1 %vm233_vm2, %v5771_v29 }
0x1bee   :  { %7286 = vmatprep.mubr.msk.f32.mxu1 %vm7630_vm1, %v7629_v62  ;;  %v7576_v17 = vpop.eup %7575  ;;  %v6128_v36 = vsel %vm233_vm2, %v8319_v31, %v7375_v49  ;;  %v6127_v1 = vsel %vm233_vm2, %v8323_v34, %v7374_v26 }
0x1bef   :  { %v5773_v45 = vmul.f32 %v7576_v17, %v7568_v18  ;;  %v7383_v24 = vpop.permute.xlu0 %7382 }
0x1bf0   :  { %v7385_v52 = vunpack.i.h.bf16 %v7383_v24  ;;  %v7384_v63 = vunpack.i.l.bf16 %v7383_v24 }
0x1bf2   :  { %v6131_v10 = vsel %vm2919_vm3, %v6127_v1, %v7384_v63  ;;  %v6132_v54 = vsel %vm2919_vm3, %v6128_v36, %v7385_v52  ;;  %v7415_v63 = vld [vmem:[%s8650_s5 + $0x10] sm:$0xff]  }
0x1c06   :  { %v5760_v55 = vpop.xlane.xlu1 %5759 }
0x1c07   :  { %7577 = vrcp.f32 %v5760_v55 }
0x1c0a   :  { %v5852_v57 = vpop.permute.xlu1 %5851 }
0x1c0b   :  { %7280 = vmatpush3.msra.mxu0 %v5852_v57 }
0x1c0c   :  { %7289 = vmatprep.subr.mxu0 %v7629_v62 }
0x1c0e   :  { %v5928_v30 = vpop.permute.xlu1 %5927 }
0x1c0f   :  { %7285 = vmatpush3.msra.mxu1 %v5928_v30 }
0x1c10   :  { %7287 = vmatmul.mubr.msk.f32.vlgmr.msra.gmra.mrb[68].mxu1 %vm233_vm2, %v5773_v45  ;;  %7294 = vmatprep.subr.bf16.mxu1 %v7413_v12 }
0x1c11   :  { %v7578_v32 = vpop.eup %7577  ;;  %7295 = vmatpush3.bf16.msra.mxu1 %v7413_v12 }
0x1c12   :  { %v5772_v35 = vmul.f32 %v7578_v32, %v7570_v56  ;;  %7296 = vmatprep.subr.bf16.mxu1 %v7414_v44 }
0x1c14   :  { %7282 = vmatmul.mubr.msk.f32.vlgmr.msra.gmra.mrb[74].mxu0 %vm233_vm2, %v5772_v35 }
0x1c15   :  { %7291 = vmatprep.mubr.msk.f32.mxu0 %vm7630_vm1, %v7629_v62  ;;  %7297 = vmatpush3.bf16.msra.mxu1 %v7414_v44 }
0x1c3f   :  { %v5766_v37 = vpop.xlane.xlu1 %5765 }
0x1c40   :  { %7579 = vrcp.f32 %v5766_v37 }
0x1c43   :  { %v6004_v2 = vpop.permute.xlu1 %6003 }
0x1c44   :  { %7290 = vmatpush3.msra.mxu0 %v6004_v2 }
0x1c45   :  { %7302 = vmatprep.subr.bf16.mxu0 %v7415_v63 }
0x1c47   :  { %v7378_v18 = vpop.permute.xlu1 %7377 }
0x1c48   :  { %v7380_v42 = vunpack.i.h.bf16 %v7378_v18  ;;  %v7379_v31 = vunpack.i.l.bf16 %v7378_v18 }
0x1c4a   :  { %v7580_v43 = vpop.eup %7579  ;;  %v6130_v56 = vsel %vm233_vm2, %v8321_v33, %v7380_v42  ;;  %v6129_v21 = vsel %vm233_vm2, %v8325_v38, %v7379_v31  ;;  %v6733_v33 = vld [vmem:[%s8647_s2 + $0xb] ss:$0 sm:$0xff] }
0x1c4b   :  { %v5774_v9 = vmul.f32 %v7580_v43, %v7572_v28  ;;  %v7388_v19 = vpop.permute.xlu1 %7387 }
0x1c4c   :  { %v7390_v60 = vunpack.i.h.bf16 %v7388_v19  ;;  %v7389_v20 = vunpack.i.l.bf16 %v7388_v19 }
0x1c4d   :  { %7292 = vmatmul.mubr.msk.f32.vlgmr.msra.gmra.mrb[76].mxu0 %vm233_vm2, %v5774_v9 }
0x1c4e   :  { %v6133_v23 = vsel %vm2919_vm3, %v6129_v21, %v7389_v20  ;;  %v6134_v28 = vsel %vm2919_vm3, %v6130_v56, %v7390_v60  ;;  %7303 = vmatpush3.bf16.msra.mxu0 %v7415_v63  ;;  %v6738_v60 = vld [vmem:[%s8647_s2 + $0xc] ss:$0 sm:$0xff] }
0x1cc0   :  { %v5847_v11 = vpop.f32.mrb[66].mxu1 }
0x1cc1   :  { %v7278_v40 = vpop.f32.mrb[67].mxu1 }
0x1ce3   :  { %v5999_v39 = vpop.f32.mrb[68].mxu1 }
0x1ce4   :  { %v7288_v5 = vpop.f32.mrb[69].mxu1 }
0x1ce7   :  { %v5923_v6 = vpop.f32.mrb[74].mxu0 }
0x1ce8   :  { %v7391_v62 = vpack.i.bf16 %v5923_v6, %v5847_v11  ;;  %v7283_v41 = vpop.f32.mrb[75].mxu0 }
0x1cea   :  { %7392 = vrot.lane.b32.xlu0 %v7391_v62, %s7645_s10 }
0x1d20   :  { %v6075_v46 = vpop.f32.mrb[76].mxu0 }
0x1d21   :  { %v7396_v7 = vpack.i.bf16 %v6075_v46, %v5999_v39  ;;  %v7293_v13 = vpop.f32.mrb[77].mxu0 }
0x1d23   :  { %7397 = vrot.lane.b32.xlu1 %v7396_v7, %s7645_s10 }
0x1d5c   :  { %v7393_v0 = vpop.permute.xlu0 %7392 }
0x1d5d   :  { %v7395_v4 = vunpack.i.h.bf16 %v7393_v0  ;;  %v7394_v8 = vunpack.i.l.bf16 %v7393_v0  ;;  %v7416_v0 = vld [vmem:[%s8650_s5 + $0x18] sm:$0xff]  }
0x1d5e   :  { %7304 = vmatprep.subr.bf16.mxu0 %v7416_v0 }
0x1d5f   :  { %v6136_v59 = vsel %vm2924_vm4, %v6132_v54, %v7395_v4  ;;  %v6135_v27 = vsel %vm2924_vm4, %v6131_v10, %v7394_v8  ;;  %7305 = vmatpush3.bf16.msra.mxu0 %v7416_v0 }
0x1d60   :  { %v6139_v25 = vpack.c.bf16 %v6136_v59, %v6135_v27 }
0x1d62   :  { %7298 = vmatprep.mubr.msk.bf16.mxu1 %vm34_vm0, %v6139_v25 }
0x1d95   :  { %v7398_v34 = vpop.permute.xlu1 %7397 }
0x1d96   :  { %v7400_v22 = vunpack.i.h.bf16 %v7398_v34  ;;  %v7399_v14 = vunpack.i.l.bf16 %v7398_v34 }
0x1d98   :  { %v6138_v48 = vsel %vm2924_vm4, %v6134_v28, %v7400_v22  ;;  %v6137_v15 = vsel %vm2924_vm4, %v6133_v23, %v7399_v14  ;;  %v6739_v14 = vld [vmem:[%s8647_s2 + $0xd] ss:$0 sm:$0xff] }
0x1d99   :  { %v6140_v16 = vpack.c.bf16 %v6138_v48, %v6137_v15 }
0x1d9b   :  { %7299 = vmatmul.mubr.msk.bf16.vlgmr.msra.gmra.mrb[72].mxu1 %vm34_vm0, %v6140_v16 }
0x1e6e   :  { %v7300_v50 = vpop.f32.mrb[72].mxu1 }
0x1e6f   :  { %v6203_v51 = vpop.f32.mrb[73].mxu1  ;;  %v6212_v38 = vadd.f32 %v7300_v50, %v6733_v33 }
0x1e70   :  { %v6204_v29 = vadd.f32 %v6733_v33, %v6203_v51  ;;  %v7301_v55 = vpop.f32.mrb[74].mxu1 }
0x1e71   :  { %v6206_v57 = vpop.f32.mrb[75].mxu1  ;;  %v6220_v30 = vadd.f32 %v6212_v38, %v8195_v53  ;;  %v6215_v32 = vadd.f32 %v7301_v55, %v6733_v33 }
0x1e72   :  { %v6218_v17 = vadd.f32 %v6204_v29, %v8188_v58  ;;  %v6207_v45 = vadd.f32 %v6733_v33, %v6206_v57 }
0x1e73   :  { %v6221_v43 = vadd.f32 %v6215_v32, %v8197_v3  ;;  %v6230_v9 = vsel %vm34_vm0, %v6220_v30, 0.0  ;;  %v7420_v32 = vld [vmem:[%s8651_s6 + $0x38] sm:$0xff]  }
0x1e74   :  { %v6219_v35 = vadd.f32 %v6207_v45, %v8190_v61  ;;  %v6224_v37 = vsel %vm34_vm0, %v6218_v17, 0.0  ;;  %v7418_v45 = vld [vmem:[%s8651_s6 + $0x28] sm:$0xff]  }
0x1e75   :  { %6225 = vadd.xlane.f32.xlu0 %v6224_v37  ;;  %v6233_v11 = vsel %vm34_vm0, %v6221_v43, 0.0 }
0x1e76   :  { %v6227_v2 = vsel %vm34_vm0, %v6219_v35, 0.0 }
0x1e77   :  { %6228 = vadd.xlane.f32.xlu1 %v6227_v2 }
0x1e79   :  { %6231 = vadd.xlane.f32.xlu0 %v6230_v9 }
0x1e7d   :  { %6234 = vadd.xlane.f32.xlu0 %v6233_v11 }
0x1f02   :  { %v6226_v58 = vpop.xlane.xlu0 %6225 }
0x1f03   :  { %v6236_v40 = vmul.f32 0.03125, %v6226_v58 }
0x1f04   :  { %v6229_v53 = vpop.xlane.xlu1 %6228 }
0x1f05   :  { %v6240_v12 = vsub.f32 %v6218_v17, %v6236_v40  ;;  %v6237_v39 = vmul.f32 0.03125, %v6229_v53  ;;  %v7417_v17 = vld [vmem:[%s8651_s6 + $0x20] sm:$0xff]  }
0x1f06   :  { %v6232_v61 = vpop.xlane.xlu0 %6231  ;;  %7310 = vmatprep.subr.bf16.mxu1 %v7417_v17 }
0x1f07   :  { %v6241_v5 = vsub.f32 %v6219_v35, %v6237_v39  ;;  %v6238_v6 = vmul.f32 0.03125, %v6232_v61  ;;  %v6244_v62 = vmul.f32 %v6240_v12, %v6240_v12  ;;  %7311 = vmatpush3.bf16.msra.mxu1 %v7417_v17  ;;  %v6744_v35 = vld [vmem:[%s8647_s2 + $0xe] ss:$0 sm:$0xff] }
0x1f08   :  { %7312 = vmatprep.subr.bf16.mxu1 %v7418_v45 }
0x1f09   :  { %v6242_v41 = vsub.f32 %v6220_v30, %v6238_v6  ;;  %v6248_v44 = vsel %vm34_vm0, %v6244_v62, 0.0  ;;  %v6245_v46 = vmul.f32 %v6241_v5, %v6241_v5  ;;  %v7419_v30 = vld [vmem:[%s8651_s6 + $0x30] sm:$0xff]  }
0x1f0a   :  { %6249 = vadd.xlane.f32.xlu0 %v6248_v44  ;;  %v6235_v3 = vpop.xlane.xlu0 %6234 }
0x1f0b   :  { %v6239_v7 = vmul.f32 0.03125, %v6235_v3  ;;  %v6251_v13 = vsel %vm34_vm0, %v6245_v46, 0.0  ;;  %v6246_v47 = vmul.f32 %v6242_v41, %v6242_v41  ;;  %7313 = vmatpush3.bf16.msra.mxu1 %v7418_v45 }
0x1f0c   :  { %6252 = vadd.xlane.f32.xlu1 %v6251_v13  ;;  %7314 = vmatprep.subr.bf16.mxu1 %v7419_v30 }
0x1f0d   :  { %v6243_v24 = vsub.f32 %v6221_v43, %v6239_v7  ;;  %v6254_v49 = vsel %vm34_vm0, %v6246_v47, 0.0 }
0x1f0e   :  { %6255 = vadd.xlane.f32.xlu0 %v6254_v49 }
0x1f0f   :  { %v6247_v26 = vmul.f32 %v6243_v24, %v6243_v24  ;;  %7315 = vmatpush3.bf16.msra.mxu1 %v7419_v30 }
0x1f10   :  { %7316 = vmatprep.subr.bf16.mxu1 %v7420_v32 }
0x1f11   :  { %v6257_v52 = vsel %vm34_vm0, %v6247_v26, 0.0 }
0x1f12   :  { %6258 = vadd.xlane.f32.xlu1 %v6257_v52 }
0x1f13   :  { %7317 = vmatpush3.bf16.msra.mxu1 %v7420_v32 }
0x1f97   :  { %v6250_v36 = vpop.xlane.xlu0 %6249 }
0x1f98   :  { %v6260_v1 = vmul.f32 0.03125, %v6250_v36 }
0x1f99   :  { %v6253_v4 = vpop.xlane.xlu1 %6252 }
0x1f9a   :  { %v6264_v8 = vadd.f32 1e-12, %v6260_v1  ;;  %v6261_v10 = vmul.f32 0.03125, %v6253_v4 }
0x1f9b   :  { %v6256_v54 = vpop.xlane.xlu0 %6255 }
0x1f9c   :  { %7581 = vrsqrt.f32 %v6264_v8  ;;  %v6265_v59 = vadd.f32 1e-12, %v6261_v10  ;;  %v6262_v27 = vmul.f32 0.03125, %v6256_v54 }
0x1f9e   :  { %7583 = vrsqrt.f32 %v6265_v59  ;;  %v6266_v25 = vadd.f32 1e-12, %v6262_v27 }
0x1f9f   :  { %v6259_v18 = vpop.xlane.xlu1 %6258 }
0x1fa0   :  { %7585 = vrsqrt.f32 %v6266_v25  ;;  %v6263_v19 = vmul.f32 0.03125, %v6259_v18 }
0x1fa2   :  { %v6267_v42 = vadd.f32 1e-12, %v6263_v19 }
0x1fa4   :  { %7587 = vrsqrt.f32 %v6267_v42 }
0x1fa6   :  { %v7582_v31 = vpop.eup %7581 }
0x1fa7   :  { %v6272_v20 = vmul.f32 %v7582_v31, %v6240_v12 }
0x1fa8   :  { %v7584_v34 = vpop.eup %7583 }
0x1fa9   :  { %v6273_v56 = vmul.f32 %v7584_v34, %v6241_v5  ;;  %v6280_v21 = vmul.f32 %v6738_v60, %v6272_v20 }
0x1faa   :  { %v7586_v22 = vpop.eup %7585 }
0x1fab   :  { %v6274_v23 = vmul.f32 %v7586_v22, %v6242_v41  ;;  %v6281_v28 = vmul.f32 %v6738_v60, %v6273_v56  ;;  %v8576_v48 = vadd.f32 %v6739_v14, %v6280_v21 }
0x1fad   :  { %v8578_v15 = vadd.f32 %v6739_v14, %v6281_v28  ;;  %v6282_v33 = vmul.f32 %v6738_v60, %v6274_v23 }
0x1fae   :  { %v7588_v16 = vpop.eup %7587 }
0x1faf   :  { %v6275_v50 = vmul.f32 %v7588_v16, %v6243_v24  ;;  %v6292_v51 = vpack.c.bf16 %v8578_v15, %v8576_v48  ;;  %v8583_v29 = vadd.f32 %v6739_v14, %v6282_v33 }
0x1fb1   :  { %v6283_v38 = vmul.f32 %v6738_v60, %v6275_v50  ;;  %7306 = vmatprep.mubr.msk.bf16.mxu0 %vm34_vm0, %v6292_v51 }
0x1fb3   :  { %v8585_v55 = vadd.f32 %v6739_v14, %v6283_v38  ;;  %v6757_v14 = vld [vmem:[%s8647_s2 + $0xf] ss:$0 sm:$0xff] }
0x1fb5   :  { %v6293_v57 = vpack.c.bf16 %v8585_v55, %v8583_v29 }
0x1fb7   :  { %7307 = vmatmul.mubr.msk.bf16.vlgmr.msra.gmra.mrb[80].mxu0 %vm34_vm0, %v6293_v57 }
0x208a   :  { %v7308_v37 = vpop.f32.mrb[80].mxu0 }
0x208b   :  { %v6365_v2 = vadd.f32 %v7308_v37, %v6744_v35  ;;  %v6356_v43 = vpop.f32.mrb[81].mxu0 }
0x208c   :  { %v6357_v9 = vadd.f32 %v6744_v35, %v6356_v43  ;;  %v7309_v11 = vpop.f32.mrb[82].mxu0 }
0x208d   :  { %v6373_v58 = vmul.f32 %v6365_v2, %v6365_v2  ;;  %v6368_v40 = vadd.f32 %v7309_v11, %v6744_v35  ;;  %v6359_v53 = vpop.f32.mrb[83].mxu0 }
0x208e   :  { %v6371_v12 = vmul.f32 %v6357_v9, %v6357_v9  ;;  %v6360_v39 = vadd.f32 %v6744_v35, %v6359_v53 }
0x208f   :  { %v6377_v61 = vmul.f32 %v6373_v58, %v6365_v2  ;;  %v6374_v5 = vmul.f32 %v6368_v40, %v6368_v40 }
0x2090   :  { %v6375_v6 = vmul.f32 %v6371_v12, %v6357_v9  ;;  %v6372_v62 = vmul.f32 %v6360_v39, %v6360_v39 }
0x2091   :  { %v6381_v41 = vmul.f32 0.044715, %v6377_v61  ;;  %v6378_v44 = vmul.f32 %v6374_v5, %v6368_v40 }
0x2092   :  { %v6379_v46 = vmul.f32 0.044715, %v6375_v6  ;;  %v6376_v3 = vmul.f32 %v6372_v62, %v6360_v39 }
0x2093   :  { %v6385_v7 = vadd.f32 %v6381_v41, %v6365_v2  ;;  %v6382_v13 = vmul.f32 0.044715, %v6378_v44 }
0x2094   :  { %v6383_v47 = vadd.f32 %v6379_v46, %v6357_v9  ;;  %v6380_v24 = vmul.f32 0.044715, %v6376_v3 }
0x2095   :  { %v6389_v49 = vmul.f32 0.7978846, %v6385_v7  ;;  %v6386_v26 = vadd.f32 %v6382_v13, %v6368_v40 }
0x2096   :  { %v6387_v52 = vmul.f32 0.7978846, %v6383_v47  ;;  %v6384_v63 = vadd.f32 %v6380_v24, %v6360_v39 }
0x2097   :  { %7589 = vtanh.f32 %v6389_v49  ;;  %v6390_v0 = vmul.f32 0.7978846, %v6386_v26 }
0x2098   :  { %7591 = vtanh.f32 %v6387_v52  ;;  %v6388_v36 = vmul.f32 0.7978846, %v6384_v63 }
0x2099   :  { %7593 = vtanh.f32 %v6390_v0 }
0x209a   :  { %7595 = vtanh.f32 %v6388_v36 }
0x20a1   :  { %v7590_v1 = vpop.eup %7589 }
0x20a2   :  { %v7592_v4 = vpop.eup %7591  ;;  %v6397_v8 = vadd.f32 1.0, %v7590_v1 }
0x20a3   :  { %v7594_v10 = vpop.eup %7593  ;;  %v6395_v54 = vadd.f32 1.0, %v7592_v4 }
0x20a4   :  { %v7596_v59 = vpop.eup %7595  ;;  %v6401_v27 = vmul.f32 0.5, %v6397_v8  ;;  %v6398_v25 = vadd.f32 1.0, %v7594_v10 }
0x20a5   :  { %v6399_v18 = vmul.f32 0.5, %v6395_v54  ;;  %v6396_v19 = vadd.f32 1.0, %v7596_v59  ;;  %v6764_v54 = vld [vmem:[%s8647_s2 + $0x10] ss:$0 sm:$0xff] }
0x20a6   :  { %v6402_v42 = vmul.f32 0.5, %v6398_v25  ;;  %v6405_v60 = vmul.f32 %v6401_v27, %v6365_v2  ;;  %v6765_v25 = vld [vmem:[%s8647_s2 + $0x11] ss:$0 sm:$0xff]  ;;  %s7605_s2 = scalar_lea.vmem %s6586_s22, 512 }
0x20a7   :  { %v6400_v31 = vmul.f32 0.5, %v6396_v19  ;;  %v6403_v34 = vmul.f32 %v6399_v18, %v6357_v9  ;;  %p7606_p0 = scmp.ne.s32.totalorder %s6586_s22, %s7605_s2  ;;  %p7611_p2 = scmp.lt.s32.totalorder %s7605_s2, %s7605_s2 }
0x20a8   :  { %v6406_v20 = vmul.f32 %v6402_v42, %v6368_v40 }
0x20a9   :  { %v6404_v56 = vmul.f32 %v6400_v31, %v6360_v39  ;;  %p7612_p3 = por %p7611_p2, %p7610_p1 }
0x20aa   :  { %v6408_v21 = vpack.c.bf16 %v6406_v20, %v6405_v60 }
0x20ab   :  { %v6407_v22 = vpack.c.bf16 %v6404_v56, %v6403_v34  ;;  %p7613_p4 = pnand %p7612_p3, %p7606_p0 }
0x20ad   :  { %7318 = vmatprep.mubr.msk.bf16.mxu1 %vm3234_vm5, %v6407_v22 }
0x20ae   :  { %7319 = vmatmul.mubr.msk.bf16.vlgmr.msra.gmra.mrb[76].mxu1 %vm3234_vm5, %v6408_v21 }
0x2181   :  { %v7320_v23 = vpop.f32.mrb[76].mxu1 }
0x2182   :  { %v6487_v28 = vpop.f32.mrb[77].mxu1  ;;  %v6496_v16 = vadd.f32 %v7320_v23, %v6757_v14 }
0x2183   :  { %v6488_v33 = vadd.f32 %v6757_v14, %v6487_v28  ;;  %v7321_v50 = vpop.f32.mrb[78].mxu1 }
0x2184   :  { %v6490_v51 = vpop.f32.mrb[79].mxu1  ;;  %v6499_v57 = vadd.f32 %v7321_v50, %v6757_v14  ;;  %v6504_v45 = vadd.f32 %v6496_v16, %v8583_v29 }
0x2185   :  { %v6502_v38 = vadd.f32 %v6488_v33, %v8576_v48  ;;  %v6491_v17 = vadd.f32 %v6757_v14, %v6490_v51 }
0x2186   :  { %v6505_v35 = vadd.f32 %v6499_v57, %v8585_v55  ;;  %v6514_v2 = vsel %vm34_vm0, %v6504_v45, 0.0 }
0x2187   :  { %v6503_v30 = vadd.f32 %v6491_v17, %v8578_v15  ;;  %v6508_v32 = vsel %vm34_vm0, %v6502_v38, 0.0 }
0x2188   :  { %6509 = vadd.xlane.f32.xlu0 %v6508_v32  ;;  %v6517_v43 = vsel %vm34_vm0, %v6505_v35, 0.0 }
0x2189   :  { %v6511_v37 = vsel %vm34_vm0, %v6503_v30, 0.0 }
0x218a   :  { %6512 = vadd.xlane.f32.xlu1 %v6511_v37 }
0x218c   :  { %6515 = vadd.xlane.f32.xlu0 %v6514_v2 }
0x218e   :  { %6518 = vadd.xlane.f32.xlu1 %v6517_v43 }
0x2215   :  { %v6510_v48 = vpop.xlane.xlu0 %6509 }
0x2216   :  { %v6520_v9 = vmul.f32 0.03125, %v6510_v48 }
0x2217   :  { %v6513_v11 = vpop.xlane.xlu1 %6512 }
0x2218   :  { %v6524_v29 = vsub.f32 %v6502_v38, %v6520_v9  ;;  %v6521_v58 = vmul.f32 0.03125, %v6513_v11 }
0x2219   :  { %v6516_v15 = vpop.xlane.xlu0 %6515 }
0x221a   :  { %v6525_v40 = vsub.f32 %v6503_v30, %v6521_v58  ;;  %v6522_v53 = vmul.f32 0.03125, %v6516_v15  ;;  %v6528_v12 = vmul.f32 %v6524_v29, %v6524_v29 }
0x221b   :  { %v6519_v39 = vpop.xlane.xlu1 %6518 }
0x221c   :  { %v6526_v55 = vsub.f32 %v6504_v45, %v6522_v53  ;;  %v6523_v61 = vmul.f32 0.03125, %v6519_v39  ;;  %v6532_v5 = vsel %vm34_vm0, %v6528_v12, 0.0  ;;  %v6529_v6 = vmul.f32 %v6525_v40, %v6525_v40 }
0x221d   :  { %6533 = vadd.xlane.f32.xlu0 %v6532_v5 }
0x221e   :  { %v6527_v62 = vsub.f32 %v6505_v35, %v6523_v61  ;;  %v6535_v41 = vsel %vm34_vm0, %v6529_v6, 0.0  ;;  %v6530_v44 = vmul.f32 %v6526_v55, %v6526_v55 }
0x221f   :  { %6536 = vadd.xlane.f32.xlu1 %v6535_v41 }
0x2220   :  { %v6538_v46 = vsel %vm34_vm0, %v6530_v44, 0.0  ;;  %v6531_v3 = vmul.f32 %v6527_v62, %v6527_v62 }
0x2221   :  { %6539 = vadd.xlane.f32.xlu0 %v6538_v46 }
0x2222   :  { %v6541_v7 = vsel %vm34_vm0, %v6531_v3, 0.0 }
0x2223   :  { %6542 = vadd.xlane.f32.xlu1 %v6541_v7 }
0x22aa   :  { %v6534_v13 = vpop.xlane.xlu0 %6533 }
0x22ab   :  { %v6544_v47 = vmul.f32 0.03125, %v6534_v13 }
0x22ac   :  { %v6537_v24 = vpop.xlane.xlu1 %6536 }
0x22ad   :  { %v6548_v49 = vadd.f32 1e-12, %v6544_v47  ;;  %v6545_v26 = vmul.f32 0.03125, %v6537_v24 }
0x22ae   :  { %v6540_v52 = vpop.xlane.xlu0 %6539 }
0x22af   :  { %7597 = vrsqrt.f32 %v6548_v49  ;;  %v6549_v63 = vadd.f32 1e-12, %v6545_v26  ;;  %v6546_v0 = vmul.f32 0.03125, %v6540_v52 }
0x22b0   :  { %v6543_v36 = vpop.xlane.xlu1 %6542 }
0x22b1   :  { %7599 = vrsqrt.f32 %v6549_v63  ;;  %v6550_v1 = vadd.f32 1e-12, %v6546_v0  ;;  %v6547_v4 = vmul.f32 0.03125, %v6543_v36 }
0x22b3   :  { %7601 = vrsqrt.f32 %v6550_v1  ;;  %v6551_v8 = vadd.f32 1e-12, %v6547_v4 }
0x22b5   :  { %7603 = vrsqrt.f32 %v6551_v8 }
0x22b9   :  { %v7598_v10 = vpop.eup %7597 }
0x22ba   :  { %v6556_v59 = vmul.f32 %v7598_v10, %v6524_v29 }
0x22bb   :  { %v7600_v27 = vpop.eup %7599 }
0x22bc   :  { %v6564_v18 = vmul.f32 %v6764_v54, %v6556_v59  ;;  %v6557_v19 = vmul.f32 %v7600_v27, %v6525_v40 }
0x22bd   :  { %v7602_v42 = vpop.eup %7601 }
0x22be   :  { %v6572_v31 = vadd.f32 %v6765_v25, %v6564_v18  ;;  %v6565_v60 = vmul.f32 %v6764_v54, %v6557_v19  ;;  %v6558_v20 = vmul.f32 %v7602_v42, %v6526_v55 }
0x22bf   :  { %v7604_v34 = vpop.eup %7603 }
0x22c0   :  { %6576 = vst.msk [vmem:[#allocation2] sm:$0xff] %vm34_vm0, %v6572_v31  ;;  %v6573_v56 = vadd.f32 %v6765_v25, %v6565_v60  ;;  %v6566_v21 = vmul.f32 %v6764_v54, %v6558_v20  ;;  %v6559_v22 = vmul.f32 %v7604_v34, %v6527_v62 }
0x22c2   :  { %6577 = vst.msk [vmem:[#allocation2 + $0x8] sm:$0xff] %vm34_vm0, %v6573_v56  ;;  %v6574_v14 = vadd.f32 %v6765_v25, %v6566_v21  ;;  %v6567_v23 = vmul.f32 %v6764_v54, %v6559_v22 }
0x22c4   :  { %6578 = vst.msk [vmem:[#allocation2 + $0x10] sm:$0xff] %vm34_vm0, %v6574_v14  ;;  %v6575_v28 = vadd.f32 %v6765_v25, %v6567_v23 }
0x22c6   :  { %6579 = vst.msk [vmem:[#allocation2 + $0x18] sm:$0xff] %vm34_vm0, %v6575_v28 }
0x22c7   :  { %7616 = shalt.err (!%p7613_p4)
}
0x22c8   :  { %s7617_s24 = scalar_lea.hbm %s8652_s7, 512 }
0x22c9   :  { %p7618_p5 = scmp.ne.s32.totalorder %s8652_s7, %s7617_s24  ;;  %p7621_p6 = scmp.lt.u32.totalorder %s7617_s24, %s8652_s7 }
0x22cb   :  { %p7623_p7 = pnand %p7621_p6, %p7618_p5 }
0x22cd   :  { %7626 = shalt.err (!%p7623_p7)
}
0x22ce   :  { %s7647_s28 = smov 128  }
0x22cf   :  { %6591 = dma.vmem_to_hbm [thread:$0]  %s6586_s22, 512, %s8652_s7, [#allocation3], %s7647_s28, %s7647_s28, %s7643_s30  }
0x22d0   :  { %7627 = dma.done.wait [#allocation3], 512  }
0x22d1   :  { %7628 = vsyncadd [#allocation3], 4294966784 }
0x22d2   :  { %6595 = vsyncpa [#allocation3], 1 }

</bundles_post_ra>
